<compile_context>
chip_gen: v7x
topology: tpu7x:2x2x1
jax: 0.10.0
libtpu: 0.0.40
codegen_flags: <defaults>
</compile_context>

<pallas_src>
import functools
from typing import NamedTuple

import numpy as np
import jax
import jax.numpy as jnp
from jax import lax
from jax.experimental import pallas as pl
from jax.experimental.pallas import tpu as pltpu


# ============================================================================
# Static per-block configuration
# ============================================================================
class BlockCfg(NamedTuple):
    N: int
    H: int
    W: int
    in_ch: int
    out_ch: int
    mid_ch: int
    groups: int
    stride: int
    use_se: bool
    se_ch: int
    proj: bool
    Ho: int
    Wo: int
    Hp: int
    Wp: int
    rowpack: int     # output rows packed into the lane dim of one matmul row
    win_rows: int    # padded input rows covered by one matmul row's window
    tgroups: int     # Ho // rowpack


def _pick_rowpack(Ho, Wo, Cout, target_lanes=128):
    """Smallest divisor of Ho giving >=128-lane-wide output rows (unmasked stores)."""
    for r in range(1, Ho + 1):
        if Ho % r == 0 and r * Wo * Cout >= target_lanes:
            return r
    return Ho


def make_block_cfg(N, H, W, in_ch, out_ch, bottleneck_ratio, group_width,
                   stride, se_ratio):
    mid_ch = int(out_ch // bottleneck_ratio)
    groups = int(mid_ch // group_width)
    Ho = (H - 1) // stride + 1
    Wo = (W - 1) // stride + 1
    rowpack = _pick_rowpack(Ho, Wo, out_ch)
    return BlockCfg(
        N=N, H=H, W=W, in_ch=in_ch, out_ch=out_ch, mid_ch=mid_ch, groups=groups,
        stride=stride,
        use_se=se_ratio is not None,
        se_ch=(in_ch // se_ratio) if se_ratio is not None else 0,
        proj=(stride != 1 or in_ch != out_ch),
        Ho=Ho, Wo=Wo, Hp=H + 2, Wp=W + 2,
        rowpack=rowpack,
        win_rows=stride * (rowpack - 1) + 3,
        tgroups=Ho // rowpack)


# ============================================================================
# Fused XBlock kernel (single pallas_call, grid=(1,))
# ============================================================================
def _conv_trunk(winx_ref, mask_ref, w1_ref, a1_ref, b1_ref,
                w2_ref, a2_ref, b2_ref,
                p2_ref, pcol_ref, wse1_ref, bse1_ref, wse2_ref, bse2_ref,
                tilec_ref, w3_ref, a3_ref, b3_ref, use_se):
    f32 = jnp.float32
    bf16 = jnp.bfloat16

    # conv1: 1x1 conv + folded-BN + ReLU on the im2col window of the block input.
    # Window positions that cover conv padding would give relu(bn(0)) != 0, so the
    # precomputed mask zeroes them (conv2 expects zero padding of y1).
    y1 = jnp.dot(winx_ref[...], w1_ref[...], preferred_element_type=f32)
    y1 = jnp.maximum(y1 * a1_ref[...] + b1_ref[...], 0.0) * mask_ref[...]

    # conv2: 3x3 grouped conv (kh/kw/stride/group structure baked into the big
    # precomputed weight) + folded-BN + ReLU.  Single MXU matmul, K = win*Wp*Cmid.
    y2 = jnp.dot(y1.astype(bf16), w2_ref[...], preferred_element_type=f32)
    y2 = jnp.maximum(y2 * a2_ref[...] + b2_ref[...], 0.0)

    if use_se:
        # Squeeze-excite entirely in-kernel; pooling and per-row broadcast are
        # expressed as tiny matmuls (MXU) so no value relayouts are needed.
        colsum = jnp.dot(y2, pcol_ref[...], preferred_element_type=f32)
        pooled = jnp.dot(p2_ref[...], colsum, preferred_element_type=f32)
        h = jnp.maximum(
            jnp.dot(pooled, wse1_ref[...], preferred_element_type=f32) + bse1_ref[...],
            0.0)
        se = jax.nn.sigmoid(
            jnp.dot(h, wse2_ref[...], preferred_element_type=f32) + bse2_ref[...])
        y2 = y2 * jnp.dot(se, tilec_ref[...], preferred_element_type=f32)

    # conv3: 1x1 conv + folded-BN (activation applied after the residual add).
    y3 = jnp.dot(y2.astype(bf16), w3_ref[...], preferred_element_type=f32)
    return y3 * a3_ref[...] + b3_ref[...]


def _xblock_kernel_id(winx_ref, mask_ref, w1_ref, a1_ref, b1_ref,
                      w2_ref, a2_ref, b2_ref,
                      p2_ref, pcol_ref, wse1_ref, bse1_ref, wse2_ref, bse2_ref,
                      tilec_ref, w3_ref, a3_ref, b3_ref,
                      xres_ref, o_ref, *, use_se):
    y3 = _conv_trunk(winx_ref, mask_ref, w1_ref, a1_ref, b1_ref,
                     w2_ref, a2_ref, b2_ref,
                     p2_ref, pcol_ref, wse1_ref, bse1_ref, wse2_ref, bse2_ref,
                     tilec_ref, w3_ref, a3_ref, b3_ref, use_se)
    out = jnp.maximum(y3 + xres_ref[...].astype(jnp.float32), 0.0)
    o_ref[...] = out.astype(o_ref.dtype)


def _xblock_kernel_proj(winx_ref, mask_ref, w1_ref, a1_ref, b1_ref,
                        w2_ref, a2_ref, b2_ref,
                        p2_ref, pcol_ref, wse1_ref, bse1_ref, wse2_ref, bse2_ref,
                        tilec_ref, w3_ref, a3_ref, b3_ref,
                        xres_ref, wsc_ref, asc_ref, bsc_ref, o_ref, *, use_se):
    y3 = _conv_trunk(winx_ref, mask_ref, w1_ref, a1_ref, b1_ref,
                     w2_ref, a2_ref, b2_ref,
                     p2_ref, pcol_ref, wse1_ref, bse1_ref, wse2_ref, bse2_ref,
                     tilec_ref, w3_ref, a3_ref, b3_ref, use_se)
    sc = jnp.dot(xres_ref[...], wsc_ref[...], preferred_element_type=jnp.float32)
    out = jnp.maximum(y3 + sc * asc_ref[...] + bsc_ref[...], 0.0)
    o_ref[...] = out.astype(o_ref.dtype)


# ============================================================================
# One-time weight preprocessing (hoisted OUT of the jitted forward)
# ============================================================================
def prepare_xblock(raw, cfg):
    Cin, Cmid, Cout = cfg.in_ch, cfg.mid_ch, cfg.out_ch
    s, RP, WIN, Tg = cfg.stride, cfg.rowpack, cfg.win_rows, cfg.tgroups
    H, W, Wp, Ho, Wo = cfg.H, cfg.W, cfg.Wp, cfg.Ho, cfg.Wo
    Q1 = WIN * Wp            # conv1 window positions per matmul row
    PX = RP * Wo             # output pixels packed per matmul row
    L1 = Q1 * Cmid
    L2 = PX * Cmid
    M2 = cfg.N * Tg

    eyeQ1 = np.eye(Q1, dtype=np.float32)
    eyePX = np.eye(PX, dtype=np.float32)
    eyeC = np.eye(Cmid, dtype=np.float32)

    a = {}
    # conv1: kron-packed 1x1 weight + lane-tiled folded BN
    a['w1k'] = jnp.asarray(np.kron(eyeQ1, raw['w1']), jnp.bfloat16)
    a['a1'] = jnp.asarray(np.tile(raw['bn1_scale'], Q1)[None, :], jnp.float32)
    a['b1'] = jnp.asarray(np.tile(raw['bn1_shift'], Q1)[None, :], jnp.float32)

    # pad mask: 1 where the window position lies inside the image, 0 on conv padding
    mask_t = np.zeros((Tg, L1), np.float32)
    for t in range(Tg):
        for j in range(WIN):
            if not (1 <= s * RP * t + j <= H):
                continue
            for wp in range(1, W + 1):
                base = (j * Wp + wp) * Cmid
                mask_t[t, base:base + Cmid] = 1.0
    a['mask'] = jnp.asarray(np.tile(mask_t, (cfg.N, 1)), jnp.float32)

    # conv2: densify the grouped 3x3 weight (block-diagonal over groups) and bake
    # the (kh, kw, stride, output pixel) selection into one [L1, L2] matrix.
    gw = Cmid // cfg.groups
    dense = np.zeros((3, 3, Cmid, Cmid), np.float32)
    for g in range(cfg.groups):
        lo, hi = g * gw, (g + 1) * gw
        dense[:, :, lo:hi, lo:hi] = np.transpose(raw['w2_raw'][lo:hi], (2, 3, 1, 0))
    w2k = np.zeros((L1, L2), np.float32)
    for r in range(RP):
        for ow in range(Wo):
            col = (r * Wo + ow) * Cmid
            for kh in range(3):
                for kw in range(3):
                    row = ((s * r + kh) * Wp + (s * ow + kw)) * Cmid
                    w2k[row:row + Cmid, col:col + Cmid] = dense[kh, kw]
    a['w2k'] = jnp.asarray(w2k, jnp.bfloat16)
    a['a2'] = jnp.asarray(np.tile(raw['bn2_scale'], PX)[None, :], jnp.float32)
    a['b2'] = jnp.asarray(np.tile(raw['bn2_shift'], PX)[None, :], jnp.float32)

    # SE helpers: global-average-pool and per-row broadcast as matmul operands.
    p2 = np.zeros((M2, M2), np.float32)
    for m in range(M2):
        for mp in range(M2):
            if m // Tg == mp // Tg:
                p2[m, mp] = 1.0 / float(Ho * Wo)
    a['p2'] = jnp.asarray(p2, jnp.float32)
    a['pcol'] = jnp.asarray(np.tile(eyeC, (PX, 1)), jnp.float32)
    a['tilec'] = jnp.asarray(np.tile(eyeC, (1, PX)), jnp.float32)
    sep = max(8, cfg.se_ch)  # zero-pad the tiny SE hidden dim (exact)
    wse1 = np.zeros((Cmid, sep), np.float32)
    bse1 = np.zeros((1, sep), np.float32)
    wse2 = np.zeros((sep, Cmid), np.float32)
    bse2 = np.zeros((1, Cmid), np.float32)
    if cfg.use_se:
        wse1[:, :cfg.se_ch] = raw['w_se1']
        bse1[0, :cfg.se_ch] = raw['b_se1']
        wse2[:cfg.se_ch, :] = raw['w_se2']
        bse2[0, :] = raw['b_se2']
    a['wse1'] = jnp.asarray(wse1)
    a['bse1'] = jnp.asarray(bse1)
    a['wse2'] = jnp.asarray(wse2)
    a['bse2'] = jnp.asarray(bse2)

    # conv3 / projection shortcut: kron-packed 1x1 weights + lane-tiled folded BN
    a['w3k'] = jnp.asarray(np.kron(eyePX, raw['w3']), jnp.bfloat16)
    a['a3'] = jnp.asarray(np.tile(raw['bn3_scale'], PX)[None, :], jnp.float32)
    a['b3'] = jnp.asarray(np.tile(raw['bn3_shift'], PX)[None, :], jnp.float32)
    if cfg.proj:
        a['wsck'] = jnp.asarray(np.kron(eyePX, raw['w_sc']), jnp.bfloat16)
        a['asc'] = jnp.asarray(np.tile(raw['bn_sc_scale'], PX)[None, :], jnp.float32)
        a['bsc'] = jnp.asarray(np.tile(raw['bn_sc_shift'], PX)[None, :], jnp.float32)
    return a


# ============================================================================
# Jitted forward (only cheap input reshaping + one pallas_call per block)
# ============================================================================
def xblock_forward(x, cfg, arrs):
    N, H, W, Cin = x.shape
    assert (N, H, W, Cin) == (cfg.N, cfg.H, cfg.W, cfg.in_ch), (x.shape, cfg)
    s, RP, WIN, Tg = cfg.stride, cfg.rowpack, cfg.win_rows, cfg.tgroups
    Wp, Ho, Wo, Cout = cfg.Wp, cfg.Ho, cfg.Wo, cfg.out_ch
    M2 = N * Tg
    L3 = RP * Wo * Cout

    xb = x.astype(jnp.bfloat16)

    # im2col row-window of the zero-padded block input: one matmul row per
    # (image, group of `rowpack` output rows).  Cheap pad/slice/stack on the
    # block input only; every intermediate stays inside the kernel.
    xpad = jnp.pad(xb, ((0, 0), (1, 1), (1, 1), (0, 0)))
    step = s * RP
    slabs = [xpad[:, j:j + step * (Tg - 1) + 1:step, :, :] for j in range(WIN)]
    winx = jnp.stack(slabs, axis=2).reshape(M2, WIN * Wp * Cin)

    if cfg.proj:
        xs = xb[:, ::s, ::s, :][:, :Ho, :Wo, :]
        xres = xs.reshape(M2, RP * Wo * Cin)
    else:
        xres = xb.reshape(M2, RP * Wo * Cout)

    inputs = [winx, arrs['mask'], arrs['w1k'], arrs['a1'], arrs['b1'],
              arrs['w2k'], arrs['a2'], arrs['b2'],
              arrs['p2'], arrs['pcol'], arrs['wse1'], arrs['bse1'],
              arrs['wse2'], arrs['bse2'], arrs['tilec'],
              arrs['w3k'], arrs['a3'], arrs['b3'], xres]
    if cfg.proj:
        inputs += [arrs['wsck'], arrs['asc'], arrs['bsc']]
        kern = functools.partial(_xblock_kernel_proj, use_se=cfg.use_se)
    else:
        kern = functools.partial(_xblock_kernel_id, use_se=cfg.use_se)

    in_specs = [pl.BlockSpec(a.shape, lambda i: (0, 0)) for a in inputs]
    out = pl.pallas_call(
        kern,
        out_shape=jax.ShapeDtypeStruct((M2, L3), jnp.bfloat16),
        grid=(1,),
        in_specs=in_specs,
        out_specs=pl.BlockSpec((M2, L3), lambda i: (0, 0)),
        compiler_params=pltpu.CompilerParams(dimension_semantics=("arbitrary",)),
    )(*inputs)
    return out.reshape(N, Tg, RP, Wo, Cout).reshape(N, Ho, Wo, Cout)


def stage_forward(x, preps, *, cfgs):
    for cfg, arrs in zip(cfgs, preps):
        x = xblock_forward(x, cfg, arrs)
    return x


# ============================================================================
# Raw (PyTorch-like) parameters and a pure-JAX float32 reference
# ============================================================================
def _rand_bn(key, c, eps=1e-5):
    k1, k2, k3, k4 = jax.random.split(key, 4)
    gamma = 1.0 + 0.1 * jax.random.normal(k1, (c,), jnp.float32)
    beta = 0.1 * jax.random.normal(k2, (c,), jnp.float32)
    mean = 0.1 * jax.random.normal(k3, (c,), jnp.float32)
    var = 0.5 + jax.random.uniform(k4, (c,), jnp.float32)
    scale = gamma / jnp.sqrt(var + eps)
    shift = beta - mean * scale
    return np.asarray(scale), np.asarray(shift)


def make_xblock_raw_params(key, cfg):
    keys = jax.random.split(key, 12)

    def nrm(k, shape, s=0.1):
        return np.asarray(s * jax.random.normal(k, shape, jnp.float32))

    Cin, Cmid, Cout = cfg.in_ch, cfg.mid_ch, cfg.out_ch
    gw = Cmid // cfg.groups
    p = {}
    p['w1'] = nrm(keys[0], (Cin, Cmid))
    p['bn1_scale'], p['bn1_shift'] = _rand_bn(keys[1], Cmid)
    p['w2_raw'] = nrm(keys[2], (Cmid, gw, 3, 3))   # grouped conv, PyTorch layout
    p['bn2_scale'], p['bn2_shift'] = _rand_bn(keys[3], Cmid)
    if cfg.use_se:
        p['w_se1'] = nrm(keys[4], (Cmid, cfg.se_ch))
        p['b_se1'] = nrm(keys[5], (cfg.se_ch,))
        p['w_se2'] = nrm(keys[6], (cfg.se_ch, Cmid))
        p['b_se2'] = nrm(keys[7], (Cmid,))
    p['w3'] = nrm(keys[8], (Cmid, Cout))
    p['bn3_scale'], p['bn3_shift'] = _rand_bn(keys[9], Cout)
    if cfg.proj:
        p['w_sc'] = nrm(keys[10], (Cin, Cout))
        p['bn_sc_scale'], p['bn_sc_shift'] = _rand_bn(keys[11], Cout)
    return p


def xblock_reference(x, raw, cfg):
    s = cfg.stride
    y = jnp.einsum('nhwi,io->nhwo', x, raw['w1'])
    y = jnp.maximum(y * raw['bn1_scale'] + raw['bn1_shift'], 0.0)
    k2 = jnp.transpose(jnp.asarray(raw['w2_raw']), (2, 3, 1, 0))  # HWIO (grouped)
    y = lax.conv_general_dilated(
        y, k2, window_strides=(s, s), padding=((1, 1), (1, 1)),
        dimension_numbers=('NHWC', 'HWIO', 'NHWC'),
        feature_group_count=cfg.groups)
    y = jnp.maximum(y * raw['bn2_scale'] + raw['bn2_shift'], 0.0)
    if cfg.use_se:
        pooled = jnp.mean(y, axis=(1, 2))
        h = jnp.maximum(pooled @ raw['w_se1'] + raw['b_se1'], 0.0)
        se = jax.nn.sigmoid(h @ raw['w_se2'] + raw['b_se2'])
        y = y * se[:, None, None, :]
    y = jnp.einsum('nhwi,io->nhwo', y, raw['w3'])
    y = y * raw['bn3_scale'] + raw['bn3_shift']
    if cfg.proj:
        xs = x[:, ::s, ::s, :][:, :cfg.Ho, :cfg.Wo, :]
        sc = jnp.einsum('nhwi,io->nhwo', xs, raw['w_sc'])
        sc = sc * raw['bn_sc_scale'] + raw['bn_sc_shift']
    else:
        sc = x
    # DropPath(p=0.0) == identity
    return jnp.maximum(y + sc, 0.0)


def stage_reference(x, raws, cfgs):
    for raw, cfg in zip(raws, cfgs):
        x = xblock_reference(x, raw, cfg)
    return x


# ============================================================================
# Main
# ============================================================================
if __name__ == "__main__":
    key = jax.random.PRNGKey(0)
    k_x, k_p = jax.random.split(key)

    # Stage config (small, consistent with RegNet Stage semantics)
    num_blocks = 2
    in_channels, out_channels = 8, 16
    bottleneck_ratio, group_width = 1, 4
    stride, se_ratio = 2, 4
    # droppath_prob = 0.0 -> DropPath is identity (inference)
    N, H, W = 2, 8, 8

    # PyTorch-convention NCHW input, transposed to NHWC for the kernels.
    x_nchw = jax.random.normal(k_x, (N, in_channels, H, W), jnp.float32)
    x_nhwc = jnp.transpose(x_nchw, (0, 2, 3, 1))

    block_keys = jax.random.split(k_p, num_blocks)
    cfgs, raws = [], []
    cur_in, cur_h, cur_w, cur_stride = in_channels, H, W, stride
    for i in range(num_blocks):
        cfg = make_block_cfg(N, cur_h, cur_w, cur_in, out_channels,
                             bottleneck_ratio, group_width, cur_stride, se_ratio)
        cfgs.append(cfg)
        raws.append(make_xblock_raw_params(block_keys[i], cfg))
        cur_in, cur_h, cur_w, cur_stride = out_channels, cfg.Ho, cfg.Wo, 1

    # One-time weight preprocessing (outside jit, runs once).
    preps = [prepare_xblock(raw, cfg) for raw, cfg in zip(raws, cfgs)]

    fwd = jax.jit(functools.partial(stage_forward, cfgs=tuple(cfgs)))
    y_nhwc = fwd(x_nhwc, preps)
    jax.block_until_ready(y_nhwc)

    # Tolerance check against a pure-JAX float32 reference (bf16 MXU path).
    y_ref = np.asarray(stage_reference(x_nhwc, raws, cfgs), np.float32)
    y_out = np.asarray(jnp.asarray(y_nhwc, jnp.float32))
    assert y_out.shape == y_ref.shape, (y_out.shape, y_ref.shape)
    max_err = float(np.max(np.abs(y_out - y_ref)))
    assert np.allclose(y_out, y_ref, atol=5e-2, rtol=5e-2), f"max_abs_err={max_err}"

    y_nchw = jnp.transpose(y_nhwc, (0, 3, 1, 2)).astype(jnp.float32)
    expected = (N, out_channels, H // stride, W // stride)
    assert y_nchw.shape == expected, (y_nchw.shape, expected)
    print("KERNEL_OK")
</pallas_src>

<mosaic_0001>
module attributes {stable_mosaic.version = 11 : i64} {
  func.func @_xblock_kernel_proj(%arg0: i32, %arg1: memref<4x400xbf16, #tpu.memory_space<vmem>>, %arg2: memref<4x800xf32, #tpu.memory_space<vmem>>, %arg3: memref<400x800xbf16, #tpu.memory_space<vmem>>, %arg4: memref<1x800xf32, #tpu.memory_space<vmem>>, %arg5: memref<1x800xf32, #tpu.memory_space<vmem>>, %arg6: memref<800x128xbf16, #tpu.memory_space<vmem>>, %arg7: memref<1x128xf32, #tpu.memory_space<vmem>>, %arg8: memref<1x128xf32, #tpu.memory_space<vmem>>, %arg9: memref<4x4xf32, #tpu.memory_space<vmem>>, %arg10: memref<128x16xf32, #tpu.memory_space<vmem>>, %arg11: memref<16x8xf32, #tpu.memory_space<vmem>>, %arg12: memref<1x8xf32, #tpu.memory_space<vmem>>, %arg13: memref<8x16xf32, #tpu.memory_space<vmem>>, %arg14: memref<1x16xf32, #tpu.memory_space<vmem>>, %arg15: memref<16x128xf32, #tpu.memory_space<vmem>>, %arg16: memref<128x128xbf16, #tpu.memory_space<vmem>>, %arg17: memref<1x128xf32, #tpu.memory_space<vmem>>, %arg18: memref<1x128xf32, #tpu.memory_space<vmem>>, %arg19: memref<4x64xbf16, #tpu.memory_space<vmem>>, %arg20: memref<64x128xbf16, #tpu.memory_space<vmem>>, %arg21: memref<1x128xf32, #tpu.memory_space<vmem>>, %arg22: memref<1x128xf32, #tpu.memory_space<vmem>>, %arg23: memref<4x128xbf16, #tpu.memory_space<vmem>>) attributes {dimension_semantics = [#tpu.dimension_semantics<arbitrary>], iteration_bounds = array<i64: 1>, scalar_prefetch = 0 : i64, scratch_operands = 0 : i64, tpu.core_type = #tpu.core_type<tc>, window_params = [{pipeline_mode = #tpu.pipeline_mode<synchronous>, transform_indices = @transform_0, window_bounds = array<i64: 4, 400>}, {pipeline_mode = #tpu.pipeline_mode<synchronous>, transform_indices = @transform_1, window_bounds = array<i64: 4, 800>}, {pipeline_mode = #tpu.pipeline_mode<synchronous>, transform_indices = @transform_2, window_bounds = array<i64: 400, 800>}, {pipeline_mode = #tpu.pipeline_mode<synchronous>, transform_indices = @transform_3, window_bounds = array<i64: 1, 800>}, {pipeline_mode = #tpu.pipeline_mode<synchronous>, transform_indices = @transform_4, window_bounds = array<i64: 1, 800>}, {pipeline_mode = #tpu.pipeline_mode<synchronous>, transform_indices = @transform_5, window_bounds = array<i64: 800, 128>}, {pipeline_mode = #tpu.pipeline_mode<synchronous>, transform_indices = @transform_6, window_bounds = array<i64: 1, 128>}, {pipeline_mode = #tpu.pipeline_mode<synchronous>, transform_indices = @transform_7, window_bounds = array<i64: 1, 128>}, {pipeline_mode = #tpu.pipeline_mode<synchronous>, transform_indices = @transform_8, window_bounds = array<i64: 4, 4>}, {pipeline_mode = #tpu.pipeline_mode<synchronous>, transform_indices = @transform_9, window_bounds = array<i64: 128, 16>}, {pipeline_mode = #tpu.pipeline_mode<synchronous>, transform_indices = @transform_10, window_bounds = array<i64: 16, 8>}, {pipeline_mode = #tpu.pipeline_mode<synchronous>, transform_indices = @transform_11, window_bounds = array<i64: 1, 8>}, {pipeline_mode = #tpu.pipeline_mode<synchronous>, transform_indices = @transform_12, window_bounds = array<i64: 8, 16>}, {pipeline_mode = #tpu.pipeline_mode<synchronous>, transform_indices = @transform_13, window_bounds = array<i64: 1, 16>}, {pipeline_mode = #tpu.pipeline_mode<synchronous>, transform_indices = @transform_14, window_bounds = array<i64: 16, 128>}, {pipeline_mode = #tpu.pipeline_mode<synchronous>, transform_indices = @transform_15, window_bounds = array<i64: 128, 128>}, {pipeline_mode = #tpu.pipeline_mode<synchronous>, transform_indices = @transform_16, window_bounds = array<i64: 1, 128>}, {pipeline_mode = #tpu.pipeline_mode<synchronous>, transform_indices = @transform_17, window_bounds = array<i64: 1, 128>}, {pipeline_mode = #tpu.pipeline_mode<synchronous>, transform_indices = @transform_18, window_bounds = array<i64: 4, 64>}, {pipeline_mode = #tpu.pipeline_mode<synchronous>, transform_indices = @transform_19, window_bounds = array<i64: 64, 128>}, {pipeline_mode = #tpu.pipeline_mode<synchronous>, transform_indices = @transform_20, window_bounds = array<i64: 1, 128>}, {pipeline_mode = #tpu.pipeline_mode<synchronous>, transform_indices = @transform_21, window_bounds = array<i64: 1, 128>}, {pipeline_mode = #tpu.pipeline_mode<synchronous>, transform_indices = @transform_22, window_bounds = array<i64: 4, 128>}]} {
    %c0 = arith.constant 0 : index
    %c0_0 = arith.constant 0 : index
    %0 = vector.load %arg1[%c0, %c0_0] : memref<4x400xbf16, #tpu.memory_space<vmem>>, vector<4x400xbf16>
    %c0_1 = arith.constant 0 : index
    %c0_2 = arith.constant 0 : index
    %1 = vector.load %arg3[%c0_1, %c0_2] : memref<400x800xbf16, #tpu.memory_space<vmem>>, vector<400x800xbf16>
    %cst = arith.constant dense<0.000000e+00> : vector<4x800xf32>
    %2 = tpu.matmul %0, %1, %cst {dimension_numbers = #tpu.dot_dimension_numbers<[1], [0], [0], [1], [0, 0, 1, 1], [], []>} : vector<4x400xbf16>, vector<400x800xbf16>, vector<4x800xf32> -> vector<4x800xf32>
    %c0_3 = arith.constant 0 : index
    %c0_4 = arith.constant 0 : index
    %3 = vector.load %arg4[%c0_3, %c0_4] : memref<1x800xf32, #tpu.memory_space<vmem>>, vector<1x800xf32>
    %4 = vector.broadcast %3 : vector<1x800xf32> to vector<4x800xf32>
    %5 = arith.mulf %2, %4 : vector<4x800xf32>
    %c0_5 = arith.constant 0 : index
    %c0_6 = arith.constant 0 : index
    %6 = vector.load %arg5[%c0_5, %c0_6] : memref<1x800xf32, #tpu.memory_space<vmem>>, vector<1x800xf32>
    %7 = vector.broadcast %6 : vector<1x800xf32> to vector<4x800xf32>
    %8 = arith.addf %5, %7 : vector<4x800xf32>
    %cst_7 = arith.constant 0.000000e+00 : f32
    %9 = vector.broadcast %cst_7 : f32 to vector<4x800xf32>
    %10 = arith.maximumf %8, %9 : vector<4x800xf32>
    %c0_8 = arith.constant 0 : index
    %c0_9 = arith.constant 0 : index
    %11 = vector.load %arg2[%c0_8, %c0_9] : memref<4x800xf32, #tpu.memory_space<vmem>>, vector<4x800xf32>
    %12 = arith.mulf %10, %11 : vector<4x800xf32>
    %13 = arith.truncf %12 : vector<4x800xf32> to vector<4x800xbf16>
    %c0_10 = arith.constant 0 : index
    %c0_11 = arith.constant 0 : index
    %14 = vector.load %arg6[%c0_10, %c0_11] : memref<800x128xbf16, #tpu.memory_space<vmem>>, vector<800x128xbf16>
    %cst_12 = arith.constant dense<0.000000e+00> : vector<4x128xf32>
    %15 = tpu.matmul %13, %14, %cst_12 {dimension_numbers = #tpu.dot_dimension_numbers<[1], [0], [0], [1], [0, 0, 1, 1], [], []>} : vector<4x800xbf16>, vector<800x128xbf16>, vector<4x128xf32> -> vector<4x128xf32>
    %c0_13 = arith.constant 0 : index
    %c0_14 = arith.constant 0 : index
    %16 = vector.load %arg7[%c0_13, %c0_14] : memref<1x128xf32, #tpu.memory_space<vmem>>, vector<1x128xf32>
    %17 = vector.broadcast %16 : vector<1x128xf32> to vector<4x128xf32>
    %18 = arith.mulf %15, %17 : vector<4x128xf32>
    %c0_15 = arith.constant 0 : index
    %c0_16 = arith.constant 0 : index
    %19 = vector.load %arg8[%c0_15, %c0_16] : memref<1x128xf32, #tpu.memory_space<vmem>>, vector<1x128xf32>
    %20 = vector.broadcast %19 : vector<1x128xf32> to vector<4x128xf32>
    %21 = arith.addf %18, %20 : vector<4x128xf32>
    %cst_17 = arith.constant 0.000000e+00 : f32
    %22 = vector.broadcast %cst_17 : f32 to vector<4x128xf32>
    %23 = arith.maximumf %21, %22 : vector<4x128xf32>
    %c0_18 = arith.constant 0 : index
    %c0_19 = arith.constant 0 : index
    %24 = vector.load %arg10[%c0_18, %c0_19] : memref<128x16xf32, #tpu.memory_space<vmem>>, vector<128x16xf32>
    %cst_20 = arith.constant dense<0.000000e+00> : vector<4x16xf32>
    %25 = tpu.matmul %23, %24, %cst_20 {dimension_numbers = #tpu.dot_dimension_numbers<[1], [0], [0], [1], [0, 0, 1, 1], [], []>} : vector<4x128xf32>, vector<128x16xf32>, vector<4x16xf32> -> vector<4x16xf32>
    %c0_21 = arith.constant 0 : index
    %c0_22 = arith.constant 0 : index
    %26 = vector.load %arg9[%c0_21, %c0_22] : memref<4x4xf32, #tpu.memory_space<vmem>>, vector<4x4xf32>
    %cst_23 = arith.constant dense<0.000000e+00> : vector<4x16xf32>
    %27 = tpu.matmul %26, %25, %cst_23 {dimension_numbers = #tpu.dot_dimension_numbers<[1], [0], [0], [1], [0, 0, 1, 1], [], []>} : vector<4x4xf32>, vector<4x16xf32>, vector<4x16xf32> -> vector<4x16xf32>
    %c0_24 = arith.constant 0 : index
    %c0_25 = arith.constant 0 : index
    %28 = vector.load %arg11[%c0_24, %c0_25] : memref<16x8xf32, #tpu.memory_space<vmem>>, vector<16x8xf32>
    %cst_26 = arith.constant dense<0.000000e+00> : vector<4x8xf32>
    %29 = tpu.matmul %27, %28, %cst_26 {dimension_numbers = #tpu.dot_dimension_numbers<[1], [0], [0], [1], [0, 0, 1, 1], [], []>} : vector<4x16xf32>, vector<16x8xf32>, vector<4x8xf32> -> vector<4x8xf32>
    %c0_27 = arith.constant 0 : index
    %c0_28 = arith.constant 0 : index
    %30 = vector.load %arg12[%c0_27, %c0_28] : memref<1x8xf32, #tpu.memory_space<vmem>>, vector<1x8xf32>
    %31 = vector.broadcast %30 : vector<1x8xf32> to vector<4x8xf32>
    %32 = arith.addf %29, %31 : vector<4x8xf32>
    %cst_29 = arith.constant 0.000000e+00 : f32
    %33 = vector.broadcast %cst_29 : f32 to vector<4x8xf32>
    %34 = arith.maximumf %32, %33 : vector<4x8xf32>
    %c0_30 = arith.constant 0 : index
    %c0_31 = arith.constant 0 : index
    %35 = vector.load %arg13[%c0_30, %c0_31] : memref<8x16xf32, #tpu.memory_space<vmem>>, vector<8x16xf32>
    %cst_32 = arith.constant dense<0.000000e+00> : vector<4x16xf32>
    %36 = tpu.matmul %34, %35, %cst_32 {dimension_numbers = #tpu.dot_dimension_numbers<[1], [0], [0], [1], [0, 0, 1, 1], [], []>} : vector<4x8xf32>, vector<8x16xf32>, vector<4x16xf32> -> vector<4x16xf32>
    %c0_33 = arith.constant 0 : index
    %c0_34 = arith.constant 0 : index
    %37 = vector.load %arg14[%c0_33, %c0_34] : memref<1x16xf32, #tpu.memory_space<vmem>>, vector<1x16xf32>
    %38 = vector.broadcast %37 : vector<1x16xf32> to vector<4x16xf32>
    %39 = arith.addf %36, %38 : vector<4x16xf32>
    %40 = arith.negf %39 : vector<4x16xf32>
    %41 = math.exp %40 : vector<4x16xf32>
    %cst_35 = arith.constant 1.000000e+00 : f32
    %42 = vector.broadcast %cst_35 : f32 to vector<4x16xf32>
    %43 = arith.addf %42, %41 : vector<4x16xf32>
    %44 = arith.divf %42, %43 : vector<4x16xf32>
    %c0_36 = arith.constant 0 : index
    %c0_37 = arith.constant 0 : index
    %45 = vector.load %arg15[%c0_36, %c0_37] : memref<16x128xf32, #tpu.memory_space<vmem>>, vector<16x128xf32>
    %cst_38 = arith.constant dense<0.000000e+00> : vector<4x128xf32>
    %46 = tpu.matmul %44, %45, %cst_38 {dimension_numbers = #tpu.dot_dimension_numbers<[1], [0], [0], [1], [0, 0, 1, 1], [], []>} : vector<4x16xf32>, vector<16x128xf32>, vector<4x128xf32> -> vector<4x128xf32>
    %47 = arith.mulf %23, %46 : vector<4x128xf32>
    %48 = arith.truncf %47 : vector<4x128xf32> to vector<4x128xbf16>
    %c0_39 = arith.constant 0 : index
    %c0_40 = arith.constant 0 : index
    %49 = vector.load %arg16[%c0_39, %c0_40] : memref<128x128xbf16, #tpu.memory_space<vmem>>, vector<128x128xbf16>
    %cst_41 = arith.constant dense<0.000000e+00> : vector<4x128xf32>
    %50 = tpu.matmul %48, %49, %cst_41 {dimension_numbers = #tpu.dot_dimension_numbers<[1], [0], [0], [1], [0, 0, 1, 1], [], []>} : vector<4x128xbf16>, vector<128x128xbf16>, vector<4x128xf32> -> vector<4x128xf32>
    %c0_42 = arith.constant 0 : index
    %c0_43 = arith.constant 0 : index
    %51 = vector.load %arg17[%c0_42, %c0_43] : memref<1x128xf32, #tpu.memory_space<vmem>>, vector<1x128xf32>
    %52 = vector.broadcast %51 : vector<1x128xf32> to vector<4x128xf32>
    %53 = arith.mulf %50, %52 : vector<4x128xf32>
    %c0_44 = arith.constant 0 : index
    %c0_45 = arith.constant 0 : index
    %54 = vector.load %arg18[%c0_44, %c0_45] : memref<1x128xf32, #tpu.memory_space<vmem>>, vector<1x128xf32>
    %55 = vector.broadcast %54 : vector<1x128xf32> to vector<4x128xf32>
    %56 = arith.addf %53, %55 : vector<4x128xf32>
    %c0_46 = arith.constant 0 : index
    %c0_47 = arith.constant 0 : index
    %57 = vector.load %arg19[%c0_46, %c0_47] : memref<4x64xbf16, #tpu.memory_space<vmem>>, vector<4x64xbf16>
    %c0_48 = arith.constant 0 : index
    %c0_49 = arith.constant 0 : index
    %58 = vector.load %arg20[%c0_48, %c0_49] : memref<64x128xbf16, #tpu.memory_space<vmem>>, vector<64x128xbf16>
    %cst_50 = arith.constant dense<0.000000e+00> : vector<4x128xf32>
    %59 = tpu.matmul %57, %58, %cst_50 {dimension_numbers = #tpu.dot_dimension_numbers<[1], [0], [0], [1], [0, 0, 1, 1], [], []>} : vector<4x64xbf16>, vector<64x128xbf16>, vector<4x128xf32> -> vector<4x128xf32>
    %c0_51 = arith.constant 0 : index
    %c0_52 = arith.constant 0 : index
    %60 = vector.load %arg21[%c0_51, %c0_52] : memref<1x128xf32, #tpu.memory_space<vmem>>, vector<1x128xf32>
    %61 = vector.broadcast %60 : vector<1x128xf32> to vector<4x128xf32>
    %62 = arith.mulf %59, %61 : vector<4x128xf32>
    %63 = arith.addf %56, %62 : vector<4x128xf32>
    %c0_53 = arith.constant 0 : index
    %c0_54 = arith.constant 0 : index
    %64 = vector.load %arg22[%c0_53, %c0_54] : memref<1x128xf32, #tpu.memory_space<vmem>>, vector<1x128xf32>
    %65 = vector.broadcast %64 : vector<1x128xf32> to vector<4x128xf32>
    %66 = arith.addf %63, %65 : vector<4x128xf32>
    %cst_55 = arith.constant 0.000000e+00 : f32
    %67 = vector.broadcast %cst_55 : f32 to vector<4x128xf32>
    %68 = arith.maximumf %66, %67 : vector<4x128xf32>
    %69 = arith.truncf %68 : vector<4x128xf32> to vector<4x128xbf16>
    %c0_56 = arith.constant 0 : index
    %c0_57 = arith.constant 0 : index
    %70 = vector.load %arg23[%c0_56, %c0_57] : memref<4x128xbf16, #tpu.memory_space<vmem>>, vector<4x128xbf16>
    tpu.vector_store %arg23[%c0_56, %c0_57], %69 {strides = array<i32>} : memref<4x128xbf16, #tpu.memory_space<vmem>>, vector<4x128xbf16>,
    return
  }
  func.func @transform_0(%arg0: i32) -> (i32, i32) {
    %c0_i32 = arith.constant 0 : i32
    %c0_i32_0 = arith.constant 0 : i32
    %c0_i32_1 = arith.constant 0 : i32
    return %c0_i32, %c0_i32_0 : i32, i32
  }
  func.func @transform_1(%arg0: i32) -> (i32, i32) {
    %c0_i32 = arith.constant 0 : i32
    %c0_i32_0 = arith.constant 0 : i32
    %c0_i32_1 = arith.constant 0 : i32
    return %c0_i32, %c0_i32_0 : i32, i32
  }
  func.func @transform_2(%arg0: i32) -> (i32, i32) {
    %c0_i32 = arith.constant 0 : i32
    %c0_i32_0 = arith.constant 0 : i32
    %c0_i32_1 = arith.constant 0 : i32
    return %c0_i32, %c0_i32_0 : i32, i32
  }
  func.func @transform_3(%arg0: i32) -> (i32, i32) {
    %c0_i32 = arith.constant 0 : i32
    %c0_i32_0 = arith.constant 0 : i32
    %c0_i32_1 = arith.constant 0 : i32
    return %c0_i32, %c0_i32_0 : i32, i32
  }
  func.func @transform_4(%arg0: i32) -> (i32, i32) {
    %c0_i32 = arith.constant 0 : i32
    %c0_i32_0 = arith.constant 0 : i32
    %c0_i32_1 = arith.constant 0 : i32
    return %c0_i32, %c0_i32_0 : i32, i32
  }
  func.func @transform_5(%arg0: i32) -> (i32, i32) {
    %c0_i32 = arith.constant 0 : i32
    %c0_i32_0 = arith.constant 0 : i32
    %c0_i32_1 = arith.constant 0 : i32
    return %c0_i32, %c0_i32_0 : i32, i32
  }
  func.func @transform_6(%arg0: i32) -> (i32, i32) {
    %c0_i32 = arith.constant 0 : i32
    %c0_i32_0 = arith.constant 0 : i32
    %c0_i32_1 = arith.constant 0 : i32
    return %c0_i32, %c0_i32_0 : i32, i32
  }
  func.func @transform_7(%arg0: i32) -> (i32, i32) {
    %c0_i32 = arith.constant 0 : i32
    %c0_i32_0 = arith.constant 0 : i32
    %c0_i32_1 = arith.constant 0 : i32
    return %c0_i32, %c0_i32_0 : i32, i32
  }
  func.func @transform_8(%arg0: i32) -> (i32, i32) {
    %c0_i32 = arith.constant 0 : i32
    %c0_i32_0 = arith.constant 0 : i32
    %c0_i32_1 = arith.constant 0 : i32
    return %c0_i32, %c0_i32_0 : i32, i32
  }
  func.func @transform_9(%arg0: i32) -> (i32, i32) {
    %c0_i32 = arith.constant 0 : i32
    %c0_i32_0 = arith.constant 0 : i32
    %c0_i32_1 = arith.constant 0 : i32
    return %c0_i32, %c0_i32_0 : i32, i32
  }
  func.func @transform_10(%arg0: i32) -> (i32, i32) {
    %c0_i32 = arith.constant 0 : i32
    %c0_i32_0 = arith.constant 0 : i32
    %c0_i32_1 = arith.constant 0 : i32
    return %c0_i32, %c0_i32_0 : i32, i32
  }
  func.func @transform_11(%arg0: i32) -> (i32, i32) {
    %c0_i32 = arith.constant 0 : i32
    %c0_i32_0 = arith.constant 0 : i32
    %c0_i32_1 = arith.constant 0 : i32
    return %c0_i32, %c0_i32_0 : i32, i32
  }
  func.func @transform_12(%arg0: i32) -> (i32, i32) {
    %c0_i32 = arith.constant 0 : i32
    %c0_i32_0 = arith.constant 0 : i32
    %c0_i32_1 = arith.constant 0 : i32
    return %c0_i32, %c0_i32_0 : i32, i32
  }
  func.func @transform_13(%arg0: i32) -> (i32, i32) {
    %c0_i32 = arith.constant 0 : i32
    %c0_i32_0 = arith.constant 0 : i32
    %c0_i32_1 = arith.constant 0 : i32
    return %c0_i32, %c0_i32_0 : i32, i32
  }
  func.func @transform_14(%arg0: i32) -> (i32, i32) {
    %c0_i32 = arith.constant 0 : i32
    %c0_i32_0 = arith.constant 0 : i32
    %c0_i32_1 = arith.constant 0 : i32
    return %c0_i32, %c0_i32_0 : i32, i32
  }
  func.func @transform_15(%arg0: i32) -> (i32, i32) {
    %c0_i32 = arith.constant 0 : i32
    %c0_i32_0 = arith.constant 0 : i32
    %c0_i32_1 = arith.constant 0 : i32
    return %c0_i32, %c0_i32_0 : i32, i32
  }
  func.func @transform_16(%arg0: i32) -> (i32, i32) {
    %c0_i32 = arith.constant 0 : i32
    %c0_i32_0 = arith.constant 0 : i32
    %c0_i32_1 = arith.constant 0 : i32
    return %c0_i32, %c0_i32_0 : i32, i32
  }
  func.func @transform_17(%arg0: i32) -> (i32, i32) {
    %c0_i32 = arith.constant 0 : i32
    %c0_i32_0 = arith.constant 0 : i32
    %c0_i32_1 = arith.constant 0 : i32
    return %c0_i32, %c0_i32_0 : i32, i32
  }
  func.func @transform_18(%arg0: i32) -> (i32, i32) {
    %c0_i32 = arith.constant 0 : i32
    %c0_i32_0 = arith.constant 0 : i32
    %c0_i32_1 = arith.constant 0 : i32
    return %c0_i32, %c0_i32_0 : i32, i32
  }
  func.func @transform_19(%arg0: i32) -> (i32, i32) {
    %c0_i32 = arith.constant 0 : i32
    %c0_i32_0 = arith.constant 0 : i32
    %c0_i32_1 = arith.constant 0 : i32
    return %c0_i32, %c0_i32_0 : i32, i32
  }
  func.func @transform_20(%arg0: i32) -> (i32, i32) {
    %c0_i32 = arith.constant 0 : i32
    %c0_i32_0 = arith.constant 0 : i32
    %c0_i32_1 = arith.constant 0 : i32
    return %c0_i32, %c0_i32_0 : i32, i32
  }
  func.func @transform_21(%arg0: i32) -> (i32, i32) {
    %c0_i32 = arith.constant 0 : i32
    %c0_i32_0 = arith.constant 0 : i32
    %c0_i32_1 = arith.constant 0 : i32
    return %c0_i32, %c0_i32_0 : i32, i32
  }
  func.func @transform_22(%arg0: i32) -> (i32, i32) {
    %c0_i32 = arith.constant 0 : i32
    %c0_i32_0 = arith.constant 0 : i32
    %c0_i32_1 = arith.constant 0 : i32
    return %c0_i32, %c0_i32_0 : i32, i32
  }
}

module attributes {stable_mosaic.version = 11 : i64} {
  func.func @_xblock_kernel_id(%arg0: i32, %arg1: memref<4x384xbf16, #tpu.memory_space<vmem>>, %arg2: memref<4x384xf32, #tpu.memory_space<vmem>>, %arg3: memref<384x384xbf16, #tpu.memory_space<vmem>>, %arg4: memref<1x384xf32, #tpu.memory_space<vmem>>, %arg5: memref<1x384xf32, #tpu.memory_space<vmem>>, %arg6: memref<384x128xbf16, #tpu.memory_space<vmem>>, %arg7: memref<1x128xf32, #tpu.memory_space<vmem>>, %arg8: memref<1x128xf32, #tpu.memory_space<vmem>>, %arg9: memref<4x4xf32, #tpu.memory_space<vmem>>, %arg10: memref<128x16xf32, #tpu.memory_space<vmem>>, %arg11: memref<16x8xf32, #tpu.memory_space<vmem>>, %arg12: memref<1x8xf32, #tpu.memory_space<vmem>>, %arg13: memref<8x16xf32, #tpu.memory_space<vmem>>, %arg14: memref<1x16xf32, #tpu.memory_space<vmem>>, %arg15: memref<16x128xf32, #tpu.memory_space<vmem>>, %arg16: memref<128x128xbf16, #tpu.memory_space<vmem>>, %arg17: memref<1x128xf32, #tpu.memory_space<vmem>>, %arg18: memref<1x128xf32, #tpu.memory_space<vmem>>, %arg19: memref<4x128xbf16, #tpu.memory_space<vmem>>, %arg20: memref<4x128xbf16, #tpu.memory_space<vmem>>) attributes {dimension_semantics = [#tpu.dimension_semantics<arbitrary>], iteration_bounds = array<i64: 1>, scalar_prefetch = 0 : i64, scratch_operands = 0 : i64, tpu.core_type = #tpu.core_type<tc>, window_params = [{pipeline_mode = #tpu.pipeline_mode<synchronous>, transform_indices = @transform_0, window_bounds = array<i64: 4, 384>}, {pipeline_mode = #tpu.pipeline_mode<synchronous>, transform_indices = @transform_1, window_bounds = array<i64: 4, 384>}, {pipeline_mode = #tpu.pipeline_mode<synchronous>, transform_indices = @transform_2, window_bounds = array<i64: 384, 384>}, {pipeline_mode = #tpu.pipeline_mode<synchronous>, transform_indices = @transform_3, window_bounds = array<i64: 1, 384>}, {pipeline_mode = #tpu.pipeline_mode<synchronous>, transform_indices = @transform_4, window_bounds = array<i64: 1, 384>}, {pipeline_mode = #tpu.pipeline_mode<synchronous>, transform_indices = @transform_5, window_bounds = array<i64: 384, 128>}, {pipeline_mode = #tpu.pipeline_mode<synchronous>, transform_indices = @transform_6, window_bounds = array<i64: 1, 128>}, {pipeline_mode = #tpu.pipeline_mode<synchronous>, transform_indices = @transform_7, window_bounds = array<i64: 1, 128>}, {pipeline_mode = #tpu.pipeline_mode<synchronous>, transform_indices = @transform_8, window_bounds = array<i64: 4, 4>}, {pipeline_mode = #tpu.pipeline_mode<synchronous>, transform_indices = @transform_9, window_bounds = array<i64: 128, 16>}, {pipeline_mode = #tpu.pipeline_mode<synchronous>, transform_indices = @transform_10, window_bounds = array<i64: 16, 8>}, {pipeline_mode = #tpu.pipeline_mode<synchronous>, transform_indices = @transform_11, window_bounds = array<i64: 1, 8>}, {pipeline_mode = #tpu.pipeline_mode<synchronous>, transform_indices = @transform_12, window_bounds = array<i64: 8, 16>}, {pipeline_mode = #tpu.pipeline_mode<synchronous>, transform_indices = @transform_13, window_bounds = array<i64: 1, 16>}, {pipeline_mode = #tpu.pipeline_mode<synchronous>, transform_indices = @transform_14, window_bounds = array<i64: 16, 128>}, {pipeline_mode = #tpu.pipeline_mode<synchronous>, transform_indices = @transform_15, window_bounds = array<i64: 128, 128>}, {pipeline_mode = #tpu.pipeline_mode<synchronous>, transform_indices = @transform_16, window_bounds = array<i64: 1, 128>}, {pipeline_mode = #tpu.pipeline_mode<synchronous>, transform_indices = @transform_17, window_bounds = array<i64: 1, 128>}, {pipeline_mode = #tpu.pipeline_mode<synchronous>, transform_indices = @transform_18, window_bounds = array<i64: 4, 128>}, {pipeline_mode = #tpu.pipeline_mode<synchronous>, transform_indices = @transform_19, window_bounds = array<i64: 4, 128>}]} {
    %c0 = arith.constant 0 : index
    %c0_0 = arith.constant 0 : index
    %0 = vector.load %arg1[%c0, %c0_0] : memref<4x384xbf16, #tpu.memory_space<vmem>>, vector<4x384xbf16>
    %c0_1 = arith.constant 0 : index
    %c0_2 = arith.constant 0 : index
    %1 = vector.load %arg3[%c0_1, %c0_2] : memref<384x384xbf16, #tpu.memory_space<vmem>>, vector<384x384xbf16>
    %cst = arith.constant dense<0.000000e+00> : vector<4x384xf32>
    %2 = tpu.matmul %0, %1, %cst {dimension_numbers = #tpu.dot_dimension_numbers<[1], [0], [0], [1], [0, 0, 1, 1], [], []>} : vector<4x384xbf16>, vector<384x384xbf16>, vector<4x384xf32> -> vector<4x384xf32>
    %c0_3 = arith.constant 0 : index
    %c0_4 = arith.constant 0 : index
    %3 = vector.load %arg4[%c0_3, %c0_4] : memref<1x384xf32, #tpu.memory_space<vmem>>, vector<1x384xf32>
    %4 = vector.broadcast %3 : vector<1x384xf32> to vector<4x384xf32>
    %5 = arith.mulf %2, %4 : vector<4x384xf32>
    %c0_5 = arith.constant 0 : index
    %c0_6 = arith.constant 0 : index
    %6 = vector.load %arg5[%c0_5, %c0_6] : memref<1x384xf32, #tpu.memory_space<vmem>>, vector<1x384xf32>
    %7 = vector.broadcast %6 : vector<1x384xf32> to vector<4x384xf32>
    %8 = arith.addf %5, %7 : vector<4x384xf32>
    %cst_7 = arith.constant 0.000000e+00 : f32
    %9 = vector.broadcast %cst_7 : f32 to vector<4x384xf32>
    %10 = arith.maximumf %8, %9 : vector<4x384xf32>
    %c0_8 = arith.constant 0 : index
    %c0_9 = arith.constant 0 : index
    %11 = vector.load %arg2[%c0_8, %c0_9] : memref<4x384xf32, #tpu.memory_space<vmem>>, vector<4x384xf32>
    %12 = arith.mulf %10, %11 : vector<4x384xf32>
    %13 = arith.truncf %12 : vector<4x384xf32> to vector<4x384xbf16>
    %c0_10 = arith.constant 0 : index
    %c0_11 = arith.constant 0 : index
    %14 = vector.load %arg6[%c0_10, %c0_11] : memref<384x128xbf16, #tpu.memory_space<vmem>>, vector<384x128xbf16>
    %cst_12 = arith.constant dense<0.000000e+00> : vector<4x128xf32>
    %15 = tpu.matmul %13, %14, %cst_12 {dimension_numbers = #tpu.dot_dimension_numbers<[1], [0], [0], [1], [0, 0, 1, 1], [], []>} : vector<4x384xbf16>, vector<384x128xbf16>, vector<4x128xf32> -> vector<4x128xf32>
    %c0_13 = arith.constant 0 : index
    %c0_14 = arith.constant 0 : index
    %16 = vector.load %arg7[%c0_13, %c0_14] : memref<1x128xf32, #tpu.memory_space<vmem>>, vector<1x128xf32>
    %17 = vector.broadcast %16 : vector<1x128xf32> to vector<4x128xf32>
    %18 = arith.mulf %15, %17 : vector<4x128xf32>
    %c0_15 = arith.constant 0 : index
    %c0_16 = arith.constant 0 : index
    %19 = vector.load %arg8[%c0_15, %c0_16] : memref<1x128xf32, #tpu.memory_space<vmem>>, vector<1x128xf32>
    %20 = vector.broadcast %19 : vector<1x128xf32> to vector<4x128xf32>
    %21 = arith.addf %18, %20 : vector<4x128xf32>
    %cst_17 = arith.constant 0.000000e+00 : f32
    %22 = vector.broadcast %cst_17 : f32 to vector<4x128xf32>
    %23 = arith.maximumf %21, %22 : vector<4x128xf32>
    %c0_18 = arith.constant 0 : index
    %c0_19 = arith.constant 0 : index
    %24 = vector.load %arg10[%c0_18, %c0_19] : memref<128x16xf32, #tpu.memory_space<vmem>>, vector<128x16xf32>
    %cst_20 = arith.constant dense<0.000000e+00> : vector<4x16xf32>
    %25 = tpu.matmul %23, %24, %cst_20 {dimension_numbers = #tpu.dot_dimension_numbers<[1], [0], [0], [1], [0, 0, 1, 1], [], []>} : vector<4x128xf32>, vector<128x16xf32>, vector<4x16xf32> -> vector<4x16xf32>
    %c0_21 = arith.constant 0 : index
    %c0_22 = arith.constant 0 : index
    %26 = vector.load %arg9[%c0_21, %c0_22] : memref<4x4xf32, #tpu.memory_space<vmem>>, vector<4x4xf32>
    %cst_23 = arith.constant dense<0.000000e+00> : vector<4x16xf32>
    %27 = tpu.matmul %26, %25, %cst_23 {dimension_numbers = #tpu.dot_dimension_numbers<[1], [0], [0], [1], [0, 0, 1, 1], [], []>} : vector<4x4xf32>, vector<4x16xf32>, vector<4x16xf32> -> vector<4x16xf32>
    %c0_24 = arith.constant 0 : index
    %c0_25 = arith.constant 0 : index
    %28 = vector.load %arg11[%c0_24, %c0_25] : memref<16x8xf32, #tpu.memory_space<vmem>>, vector<16x8xf32>
    %cst_26 = arith.constant dense<0.000000e+00> : vector<4x8xf32>
    %29 = tpu.matmul %27, %28, %cst_26 {dimension_numbers = #tpu.dot_dimension_numbers<[1], [0], [0], [1], [0, 0, 1, 1], [], []>} : vector<4x16xf32>, vector<16x8xf32>, vector<4x8xf32> -> vector<4x8xf32>
    %c0_27 = arith.constant 0 : index
    %c0_28 = arith.constant 0 : index
    %30 = vector.load %arg12[%c0_27, %c0_28] : memref<1x8xf32, #tpu.memory_space<vmem>>, vector<1x8xf32>
    %31 = vector.broadcast %30 : vector<1x8xf32> to vector<4x8xf32>
    %32 = arith.addf %29, %31 : vector<4x8xf32>
    %cst_29 = arith.constant 0.000000e+00 : f32
    %33 = vector.broadcast %cst_29 : f32 to vector<4x8xf32>
    %34 = arith.maximumf %32, %33 : vector<4x8xf32>
    %c0_30 = arith.constant 0 : index
    %c0_31 = arith.constant 0 : index
    %35 = vector.load %arg13[%c0_30, %c0_31] : memref<8x16xf32, #tpu.memory_space<vmem>>, vector<8x16xf32>
    %cst_32 = arith.constant dense<0.000000e+00> : vector<4x16xf32>
    %36 = tpu.matmul %34, %35, %cst_32 {dimension_numbers = #tpu.dot_dimension_numbers<[1], [0], [0], [1], [0, 0, 1, 1], [], []>} : vector<4x8xf32>, vector<8x16xf32>, vector<4x16xf32> -> vector<4x16xf32>
    %c0_33 = arith.constant 0 : index
    %c0_34 = arith.constant 0 : index
    %37 = vector.load %arg14[%c0_33, %c0_34] : memref<1x16xf32, #tpu.memory_space<vmem>>, vector<1x16xf32>
    %38 = vector.broadcast %37 : vector<1x16xf32> to vector<4x16xf32>
    %39 = arith.addf %36, %38 : vector<4x16xf32>
    %40 = arith.negf %39 : vector<4x16xf32>
    %41 = math.exp %40 : vector<4x16xf32>
    %cst_35 = arith.constant 1.000000e+00 : f32
    %42 = vector.broadcast %cst_35 : f32 to vector<4x16xf32>
    %43 = arith.addf %42, %41 : vector<4x16xf32>
    %44 = arith.divf %42, %43 : vector<4x16xf32>
    %c0_36 = arith.constant 0 : index
    %c0_37 = arith.constant 0 : index
    %45 = vector.load %arg15[%c0_36, %c0_37] : memref<16x128xf32, #tpu.memory_space<vmem>>, vector<16x128xf32>
    %cst_38 = arith.constant dense<0.000000e+00> : vector<4x128xf32>
    %46 = tpu.matmul %44, %45, %cst_38 {dimension_numbers = #tpu.dot_dimension_numbers<[1], [0], [0], [1], [0, 0, 1, 1], [], []>} : vector<4x16xf32>, vector<16x128xf32>, vector<4x128xf32> -> vector<4x128xf32>
    %47 = arith.mulf %23, %46 : vector<4x128xf32>
    %48 = arith.truncf %47 : vector<4x128xf32> to vector<4x128xbf16>
    %c0_39 = arith.constant 0 : index
    %c0_40 = arith.constant 0 : index
    %49 = vector.load %arg16[%c0_39, %c0_40] : memref<128x128xbf16, #tpu.memory_space<vmem>>, vector<128x128xbf16>
    %cst_41 = arith.constant dense<0.000000e+00> : vector<4x128xf32>
    %50 = tpu.matmul %48, %49, %cst_41 {dimension_numbers = #tpu.dot_dimension_numbers<[1], [0], [0], [1], [0, 0, 1, 1], [], []>} : vector<4x128xbf16>, vector<128x128xbf16>, vector<4x128xf32> -> vector<4x128xf32>
    %c0_42 = arith.constant 0 : index
    %c0_43 = arith.constant 0 : index
    %51 = vector.load %arg17[%c0_42, %c0_43] : memref<1x128xf32, #tpu.memory_space<vmem>>, vector<1x128xf32>
    %52 = vector.broadcast %51 : vector<1x128xf32> to vector<4x128xf32>
    %53 = arith.mulf %50, %52 : vector<4x128xf32>
    %c0_44 = arith.constant 0 : index
    %c0_45 = arith.constant 0 : index
    %54 = vector.load %arg18[%c0_44, %c0_45] : memref<1x128xf32, #tpu.memory_space<vmem>>, vector<1x128xf32>
    %55 = vector.broadcast %54 : vector<1x128xf32> to vector<4x128xf32>
    %56 = arith.addf %53, %55 : vector<4x128xf32>
    %c0_46 = arith.constant 0 : index
    %c0_47 = arith.constant 0 : index
    %57 = vector.load %arg19[%c0_46, %c0_47] : memref<4x128xbf16, #tpu.memory_space<vmem>>, vector<4x128xbf16>
    %58 = arith.extf %57 : vector<4x128xbf16> to vector<4x128xf32>
    %59 = arith.addf %56, %58 : vector<4x128xf32>
    %cst_48 = arith.constant 0.000000e+00 : f32
    %60 = vector.broadcast %cst_48 : f32 to vector<4x128xf32>
    %61 = arith.maximumf %59, %60 : vector<4x128xf32>
    %62 = arith.truncf %61 : vector<4x128xf32> to vector<4x128xbf16>
    %c0_49 = arith.constant 0 : index
    %c0_50 = arith.constant 0 : index
    %63 = vector.load %arg20[%c0_49, %c0_50] : memref<4x128xbf16, #tpu.memory_space<vmem>>, vector<4x128xbf16>
    tpu.vector_store %arg20[%c0_49, %c0_50], %62 {strides = array<i32>} : memref<4x128xbf16, #tpu.memory_space<vmem>>, vector<4x128xbf16>,
    return
  }
  func.func @transform_0(%arg0: i32) -> (i32, i32) {
    %c0_i32 = arith.constant 0 : i32
    %c0_i32_0 = arith.constant 0 : i32
    %c0_i32_1 = arith.constant 0 : i32
    return %c0_i32, %c0_i32_0 : i32, i32
  }
  func.func @transform_1(%arg0: i32) -> (i32, i32) {
    %c0_i32 = arith.constant 0 : i32
    %c0_i32_0 = arith.constant 0 : i32
    %c0_i32_1 = arith.constant 0 : i32
    return %c0_i32, %c0_i32_0 : i32, i32
  }
  func.func @transform_2(%arg0: i32) -> (i32, i32) {
    %c0_i32 = arith.constant 0 : i32
    %c0_i32_0 = arith.constant 0 : i32
    %c0_i32_1 = arith.constant 0 : i32
    return %c0_i32, %c0_i32_0 : i32, i32
  }
  func.func @transform_3(%arg0: i32) -> (i32, i32) {
    %c0_i32 = arith.constant 0 : i32
    %c0_i32_0 = arith.constant 0 : i32
    %c0_i32_1 = arith.constant 0 : i32
    return %c0_i32, %c0_i32_0 : i32, i32
  }
  func.func @transform_4(%arg0: i32) -> (i32, i32) {
    %c0_i32 = arith.constant 0 : i32
    %c0_i32_0 = arith.constant 0 : i32
    %c0_i32_1 = arith.constant 0 : i32
    return %c0_i32, %c0_i32_0 : i32, i32
  }
  func.func @transform_5(%arg0: i32) -> (i32, i32) {
    %c0_i32 = arith.constant 0 : i32
    %c0_i32_0 = arith.constant 0 : i32
    %c0_i32_1 = arith.constant 0 : i32
    return %c0_i32, %c0_i32_0 : i32, i32
  }
  func.func @transform_6(%arg0: i32) -> (i32, i32) {
    %c0_i32 = arith.constant 0 : i32
    %c0_i32_0 = arith.constant 0 : i32
    %c0_i32_1 = arith.constant 0 : i32
    return %c0_i32, %c0_i32_0 : i32, i32
  }
  func.func @transform_7(%arg0: i32) -> (i32, i32) {
    %c0_i32 = arith.constant 0 : i32
    %c0_i32_0 = arith.constant 0 : i32
    %c0_i32_1 = arith.constant 0 : i32
    return %c0_i32, %c0_i32_0 : i32, i32
  }
  func.func @transform_8(%arg0: i32) -> (i32, i32) {
    %c0_i32 = arith.constant 0 : i32
    %c0_i32_0 = arith.constant 0 : i32
    %c0_i32_1 = arith.constant 0 : i32
    return %c0_i32, %c0_i32_0 : i32, i32
  }
  func.func @transform_9(%arg0: i32) -> (i32, i32) {
    %c0_i32 = arith.constant 0 : i32
    %c0_i32_0 = arith.constant 0 : i32
    %c0_i32_1 = arith.constant 0 : i32
    return %c0_i32, %c0_i32_0 : i32, i32
  }
  func.func @transform_10(%arg0: i32) -> (i32, i32) {
    %c0_i32 = arith.constant 0 : i32
    %c0_i32_0 = arith.constant 0 : i32
    %c0_i32_1 = arith.constant 0 : i32
    return %c0_i32, %c0_i32_0 : i32, i32
  }
  func.func @transform_11(%arg0: i32) -> (i32, i32) {
    %c0_i32 = arith.constant 0 : i32
    %c0_i32_0 = arith.constant 0 : i32
    %c0_i32_1 = arith.constant 0 : i32
    return %c0_i32, %c0_i32_0 : i32, i32
  }
  func.func @transform_12(%arg0: i32) -> (i32, i32) {
    %c0_i32 = arith.constant 0 : i32
    %c0_i32_0 = arith.constant 0 : i32
    %c0_i32_1 = arith.constant 0 : i32
    return %c0_i32, %c0_i32_0 : i32, i32
  }
  func.func @transform_13(%arg0: i32) -> (i32, i32) {
    %c0_i32 = arith.constant 0 : i32
    %c0_i32_0 = arith.constant 0 : i32
    %c0_i32_1 = arith.constant 0 : i32
    return %c0_i32, %c0_i32_0 : i32, i32
  }
  func.func @transform_14(%arg0: i32) -> (i32, i32) {
    %c0_i32 = arith.constant 0 : i32
    %c0_i32_0 = arith.constant 0 : i32
    %c0_i32_1 = arith.constant 0 : i32
    return %c0_i32, %c0_i32_0 : i32, i32
  }
  func.func @transform_15(%arg0: i32) -> (i32, i32) {
    %c0_i32 = arith.constant 0 : i32
    %c0_i32_0 = arith.constant 0 : i32
    %c0_i32_1 = arith.constant 0 : i32
    return %c0_i32, %c0_i32_0 : i32, i32
  }
  func.func @transform_16(%arg0: i32) -> (i32, i32) {
    %c0_i32 = arith.constant 0 : i32
    %c0_i32_0 = arith.constant 0 : i32
    %c0_i32_1 = arith.constant 0 : i32
    return %c0_i32, %c0_i32_0 : i32, i32
  }
  func.func @transform_17(%arg0: i32) -> (i32, i32) {
    %c0_i32 = arith.constant 0 : i32
    %c0_i32_0 = arith.constant 0 : i32
    %c0_i32_1 = arith.constant 0 : i32
    return %c0_i32, %c0_i32_0 : i32, i32
  }
  func.func @transform_18(%arg0: i32) -> (i32, i32) {
    %c0_i32 = arith.constant 0 : i32
    %c0_i32_0 = arith.constant 0 : i32
    %c0_i32_1 = arith.constant 0 : i32
    return %c0_i32, %c0_i32_0 : i32, i32
  }
  func.func @transform_19(%arg0: i32) -> (i32, i32) {
    %c0_i32 = arith.constant 0 : i32
    %c0_i32_0 = arith.constant 0 : i32
    %c0_i32_1 = arith.constant 0 : i32
    return %c0_i32, %c0_i32_0 : i32, i32
  }
}

</mosaic_0001>

<bundles_post_ra>
// kernel: stage_forward.3
= control target key start
LH: loop header
LB: loop body
LE: loop exit
PB: predicated region body
PF: predicated region fallthrough
CT: control target
= control target key end

     0   :  { %v165_v19 = vlaneseq  ;;  %v2119_v22 = vmov 1983009808   ;;  %v2120_v45 = vmov 0.0   ;;  %vm2121_vm0 = vmmov 0   ;;  %s2723_s2 = inlined_call_operand.vmem [shape: bf16[384,384], index: 2, kind: input, shape index: {}]   ;;  %s2724_s0 = inlined_call_operand.vmem [shape: bf16[4,384], index: 0, kind: input, shape index: {}]   ;;  %s2725_s5 = inlined_call_operand.vmem [shape: bf16[384,128], index: 5, kind: input, shape index: {}]   ;;  %s2726_s3 = inlined_call_operand.vmem [shape: f32[1,384], index: 3, kind: input, shape index: {}]   ;;  %s2727_s4 = inlined_call_operand.vmem [shape: f32[1,384], index: 4, kind: input, shape index: {}]   ;;  %s2728_s1 = inlined_call_operand.vmem [shape: f32[4,384], index: 1, kind: input, shape index: {}]   ;;  %s2729_s9 = inlined_call_operand.vmem [shape: f32[128,16], index: 9, kind: input, shape index: {}]   ;;  %s2730_s6 = inlined_call_operand.vmem [shape: f32[1,128], index: 6, kind: input, shape index: {}]   ;;  %s2731_s7 = inlined_call_operand.vmem [shape: f32[1,128], index: 7, kind: input, shape index: {}]   ;;  %s2732_s10 = inlined_call_operand.vmem [shape: f32[16,8], index: 10, kind: input, shape index: {}]   ;;  %s2733_s8 = inlined_call_operand.vmem [shape: f32[4,4], index: 8, kind: input, shape index: {}]   ;;  %s2734_s12 = inlined_call_operand.vmem [shape: f32[8,16], index: 12, kind: input, shape index: {}]   ;;  %s2735_s11 = inlined_call_operand.vmem [shape: f32[1,8], index: 11, kind: input, shape index: {}]   ;;  %s2736_s14 = inlined_call_operand.vmem [shape: f32[16,128], index: 14, kind: input, shape index: {}]   ;;  %s2737_s15 = inlined_call_operand.vmem [shape: bf16[128,128], index: 15, kind: input, shape index: {}]   ;;  %s2738_s13 = inlined_call_operand.vmem [shape: f32[1,16], index: 13, kind: input, shape index: {}]   ;;  %s2739_s16 = inlined_call_operand.vmem [shape: f32[1,128], index: 16, kind: input, shape index: {}]   ;;  %s2740_s18 = inlined_call_operand.vmem [shape: bf16[4,128], index: 18, kind: input, shape index: {}]   ;;  %s2741_s17 = inlined_call_operand.vmem [shape: f32[1,128], index: 17, kind: input, shape index: {}]   ;;  %s2742_s19 = inlined_call_operand.vmem [shape: bf16[4,128], index: 19, kind: output, shape index: {}]  }
   0x1   :  { %2745 = sst [smem:[#allocation2_spill]] %s2723_s2  ;;  %v163_v23 = vunpack.c.l.s4 %v2119_v22  ;;  %vm1160_vm1 = vcmask 1043456   ;;  %vm1156_vm2 = vcmask 31744   ;;  %vm1243_vm3 = vcmask 130048  }
   0x2   :  { %2746 = sst [smem:[#allocation3_spill]] %s2724_s0  ;;  %s2749_s20 = sld [smem:[#allocation2_spill]]  ;;  %v2293_v26 = vshrl.u32 %v165_v19, 7  ;;  %vm1326_vm4 = vcmask 64512  }
   0x3   :  { %2747 = sst [smem:[#allocation4_spill]] %s2725_s5  ;;  %v164_v29 = vunpack.c.0.s8 %v163_v23  ;;  %s2750_s26 = sld [smem:[#allocation3_spill]] }
   0x4   :  { %2748 = sst [smem:[#allocation5_spill]] %s2726_s3  ;;  %s2751_s3 = sld [smem:[#allocation4_spill]] }
   0x5   :  { %v2314_v34 = vsub.s32 %v164_v29, %v2293_v26  ;;  %s2752_s30 = sld [smem:[#allocation5_spill]] }
   0x8   :  { %v1985_v0 = vld [vmem:[%s2749_s20 + $0x4] ss:$12 sps:$4 sm:$0xff]   ;;  %v1987_v1 = vld [vmem:[%s2749_s20] ss:$12 sps:$4 sm:$0xff]   ;;  %v1988_v2 = vld [vmem:[%s2749_s20 + $0xc8] ss:$12 sps:$4 sm:$0xff]  }
   0x9   :  { %564 = vmatprep.subr.bf16.mxu0 %v1985_v0  ;;  %v1989_v3 = vld [vmem:[%s2749_s20 + $0x1c] ss:$12 sps:$4 sm:$0xff]   ;;  %1729 = vmatprep.subr.bf16.mxu1 %v1988_v2  ;;  %v1992_v5 = vld [vmem:[%s2749_s20 + $0x18] ss:$12 sps:$4 sm:$0xff]   ;;  %v1993_v6 = vld [vmem:[%s2749_s20 + $0xe0] ss:$12 sps:$4 sm:$0xff]  }
   0xa   :  { %565 = vmatpush1.bf16.msra.mxu0 %v1987_v1  ;;  %v1991_v4 = vld [vmem:[%s2749_s20 + $0x8] ss:$12 sps:$4 sm:$0xff]   ;;  %v1996_v8 = vld [vmem:[%s2749_s20 + $0x20] ss:$12 sps:$4 sm:$0xff]   ;;  %v1997_v9 = vld [vmem:[%s2749_s20 + $0x30] ss:$12 sps:$4 sm:$0xff]  }
   0xb   :  { %566 = vmatprep.subr.bf16.mxu0 %v1989_v3  ;;  %1730 = vmatpush3.bf16.msra.mxu1 %v1991_v4  ;;  %v1994_v7 = vld [vmem:[%s2749_s20 + $0x34] ss:$12 sps:$4 sm:$0xff]   ;;  %v1998_v10 = vld [vmem:[%s2749_s20 + $0xf8] ss:$12 sps:$4 sm:$0xff]   ;;  %v2003_v14 = vld [vmem:[%s2749_s20 + $0x110] ss:$12 sps:$4 sm:$0xff]  }
   0xc   :  { %1731 = vmatprep.subr.bf16.mxu1 %v1993_v6  ;;  %v1999_v11 = vld [vmem:[%s2749_s20 + $0x4c] ss:$12 sps:$4 sm:$0xff]   ;;  %v2002_v13 = vld [vmem:[%s2749_s20 + $0x48] ss:$12 sps:$4 sm:$0xff]   ;;  %v2004_v15 = vld [vmem:[%s2749_s20 + $0x64] ss:$12 sps:$4 sm:$0xff]  }
   0xd   :  { %v2001_v12 = vld [vmem:[%s2749_s20 + $0x38] ss:$12 sps:$4 sm:$0xff]   ;;  %v2006_v16 = vld [vmem:[%s2749_s20 + $0x50] ss:$12 sps:$4 sm:$0xff]   ;;  %v2007_v17 = vld [vmem:[%s2749_s20 + $0x60] ss:$12 sps:$4 sm:$0xff]  }
   0xe   :  { %567 = vmatpush1.bf16.msra.mxu0 %v1992_v5  ;;  %v2008_v18 = vld [vmem:[%s2749_s20 + $0x128] ss:$12 sps:$4 sm:$0xff]   ;;  %v2012_v24 = vld [vmem:[%s2749_s20 + $0x78] ss:$12 sps:$4 sm:$0xff]   ;;  %v2013_v25 = vld [vmem:[%s2749_s20 + $0x140] ss:$12 sps:$4 sm:$0xff]  }
   0xf   :  { %568 = vmatprep.subr.bf16.mxu0 %v1994_v7  ;;  %1732 = vmatpush3.bf16.msra.mxu1 %v1996_v8  ;;  %v2009_v20 = vld [vmem:[%s2749_s20 + $0x7c] ss:$12 sps:$4 sm:$0xff]   ;;  %v2014_v27 = vld [vmem:[%s2749_s20 + $0x94] ss:$12 sps:$4 sm:$0xff]   ;;  %v2018_v31 = vld [vmem:[%s2749_s20 + $0x158] ss:$12 sps:$4 sm:$0xff]  }
  0x10   :  { %1733 = vmatprep.subr.bf16.mxu1 %v1998_v10  ;;  %v2011_v21 = vld [vmem:[%s2749_s20 + $0x68] ss:$12 sps:$4 sm:$0xff]   ;;  %v2016_v28 = vld [vmem:[%s2749_s20 + $0x80] ss:$12 sps:$4 sm:$0xff]   ;;  %v2017_v30 = vld [vmem:[%s2749_s20 + $0x90] ss:$12 sps:$4 sm:$0xff]  }
  0x11   :  { %v2019_v32 = vld [vmem:[%s2749_s20 + $0xac] ss:$12 sps:$4 sm:$0xff]   ;;  %v2022_v35 = vld [vmem:[%s2749_s20 + $0xa8] ss:$12 sps:$4 sm:$0xff]   ;;  %v2023_v36 = vld [vmem:[%s2749_s20 + $0x170] ss:$12 sps:$4 sm:$0xff]  }
  0x12   :  { %569 = vmatpush1.bf16.msra.mxu0 %v1997_v9  ;;  %v2021_v33 = vld [vmem:[%s2749_s20 + $0x98] ss:$12 sps:$4 sm:$0xff]   ;;  %v2026_v40 = vld [vmem:[%s2749_s20 + $0xb0] ss:$12 sps:$4 sm:$0xff]   ;;  %v2027_v41 = vld [vmem:[%s2749_s20 + $0xc0] ss:$12 sps:$4 sm:$0xff]  }
  0x13   :  { %570 = vmatprep.subr.bf16.mxu0 %v1999_v11  ;;  %1734 = vmatpush3.bf16.msra.mxu1 %v2001_v12  ;;  %v2024_v37 = vld [vmem:[%s2749_s20 + $0xc4] ss:$12 sps:$4 sm:$0xff]   ;;  %v2029_v43 = vld [vmem:[%s2749_s20 + $0xdc] ss:$12 sps:$4 sm:$0xff]   ;;  %v2033_v47 = vld [vmem:[%s2749_s20 + $0xf4] ss:$12 sps:$4 sm:$0xff]  }
  0x14   :  { %1735 = vmatprep.subr.bf16.mxu1 %v2003_v14  ;;  %v2328_v38 = vld [vmem:[%s2750_s26] sm:$0x3f]  ;;  %v2031_v44 = vld [vmem:[%s2749_s20 + $0x188] ss:$12 sps:$4 sm:$0xff]   ;;  %v2036_v49 = vld [vmem:[%s2749_s20 + $0xf0] ss:$12 sps:$4 sm:$0xff]  }
  0x15   :  { %v2332_v39 = vrot.slane %v2328_v38, %v2314_v34  ;;  %v2032_v46 = vld [vmem:[%s2749_s20 + $0xd8] ss:$12 sps:$4 sm:$0xff]   ;;  %v2035_v48 = vld [vmem:[%s2749_s20 + $0x1a0] ss:$12 sps:$4 sm:$0xff]   ;;  %v2040_v52 = vld [vmem:[%s2749_s20 + $0x108] ss:$12 sps:$4 sm:$0xff]   ;;  %v161_v3 = vcombine.high %v2328_v38, %v2328_v38 }
  0x16   :  { %571 = vmatpush1.bf16.msra.mxu0 %v2002_v13  ;;  %v2037_v50 = vld [vmem:[%s2749_s20 + $0x10c] ss:$12 sps:$4 sm:$0xff]   ;;  %v2041_v53 = vld [vmem:[%s2749_s20 + $0x124] ss:$12 sps:$4 sm:$0xff]   ;;  %v2045_v56 = vld [vmem:[%s2749_s20 + $0x13c] ss:$12 sps:$4 sm:$0xff]  }
  0x17   :  { %572 = vmatprep.subr.bf16.mxu0 %v2004_v15  ;;  %1736 = vmatpush3.bf16.msra.mxu1 %v2006_v16  ;;  %v176_v42 = vcombine.high %v2332_v39, %v2332_v39  ;;  %v2039_v51 = vld [vmem:[%s2749_s20 + $0x1b8] ss:$12 sps:$4 sm:$0xff]   ;;  %v2043_v54 = vld [vmem:[%s2749_s20 + $0x1d0] ss:$12 sps:$4 sm:$0xff]   ;;  %v2044_v55 = vld [vmem:[%s2749_s20 + $0x120] ss:$12 sps:$4 sm:$0xff]   ;;  %v175_v6 = vrot.slane %v161_v3, %v2314_v34 }
  0x18   :  { %1737 = vmatprep.subr.bf16.mxu1 %v2008_v18  ;;  %v2047_v57 = vld [vmem:[%s2749_s20 + $0x1e8] ss:$12 sps:$4 sm:$0xff]   ;;  %v2048_v58 = vld [vmem:[%s2749_s20 + $0x138] ss:$12 sps:$4 sm:$0xff]   ;;  %v2051_v60 = vld [vmem:[%s2749_s20 + $0x200] ss:$12 sps:$4 sm:$0xff]  }
  0x19   :  { %678 = vmatprep.mubr.bf16.mxu1 %v176_v42  ;;  %596 = vmatprep.mubr.bf16.mxu0 %v176_v42  ;;  %v2049_v59 = vld [vmem:[%s2749_s20 + $0x154] ss:$12 sps:$4 sm:$0xff]   ;;  %v2052_v61 = vld [vmem:[%s2749_s20 + $0x150] ss:$12 sps:$4 sm:$0xff]   ;;  %v2053_v62 = vld [vmem:[%s2749_s20 + $0x16c] ss:$12 sps:$4 sm:$0xff]  }
  0x1a   :  { %573 = vmatpush1.bf16.msra.mxu0 %v2007_v17  ;;  %v2055_v63 = vld [vmem:[%s2749_s20 + $0x218] ss:$12 sps:$4 sm:$0xff]   ;;  %v2056_v0 = vld [vmem:[%s2749_s20 + $0x168] ss:$12 sps:$4 sm:$0xff]   ;;  %v2060_v2 = vld [vmem:[%s2749_s20 + $0x230] ss:$12 sps:$4 sm:$0xff]  }
  0x1b   :  { %574 = vmatprep.subr.bf16.mxu0 %v2009_v20  ;;  %1738 = vmatpush3.bf16.msra.mxu1 %v2011_v21  ;;  %v2059_v1 = vld [vmem:[%s2749_s20 + $0x184] ss:$12 sps:$4 sm:$0xff]   ;;  %v2057_v4 = vld [vmem:[%s2749_s20 + $0x180] ss:$12 sps:$4 sm:$0xff]   ;;  %v2063_v5 = vld [vmem:[%s2749_s20 + $0x19c] ss:$12 sps:$4 sm:$0xff]  }
  0x1c   :  { %1739 = vmatprep.subr.bf16.mxu1 %v2013_v25  ;;  %v2061_v7 = vld [vmem:[%s2749_s20 + $0x198] ss:$12 sps:$4 sm:$0xff]   ;;  %v2066_v8 = vld [vmem:[%s2749_s20 + $0x1b4] ss:$12 sps:$4 sm:$0xff]   ;;  %v2122_v9 = vmov 0   ;;  %v2083_v22 = vld [vmem:[%s2751_s3 + $0x88] sm:$0xff]  }
  0x1d   :  { %v2064_v10 = vld [vmem:[%s2749_s20 + $0x1b0] ss:$12 sps:$4 sm:$0xff]   ;;  %v2069_v11 = vld [vmem:[%s2749_s20 + $0x1cc] ss:$12 sps:$4 sm:$0xff]   ;;  %v2067_v12 = vld [vmem:[%s2749_s20 + $0x1c8] ss:$12 sps:$4 sm:$0xff]  }
  0x1e   :  { %575 = vmatpush1.bf16.msra.mxu0 %v2012_v24  ;;  %v2072_v13 = vld [vmem:[%s2749_s20 + $0x1e4] ss:$12 sps:$4 sm:$0xff]   ;;  %v2070_v14 = vld [vmem:[%s2749_s20 + $0x1e0] ss:$12 sps:$4 sm:$0xff]   ;;  %v2075_v15 = vld [vmem:[%s2749_s20 + $0x1fc] ss:$12 sps:$4 sm:$0xff]  }
  0x1f   :  { %576 = vmatprep.subr.bf16.mxu0 %v2014_v27  ;;  %1740 = vmatpush3.bf16.msra.mxu1 %v2016_v28  ;;  %v2073_v16 = vld [vmem:[%s2749_s20 + $0x1f8] ss:$12 sps:$4 sm:$0xff]   ;;  %v2078_v17 = vld [vmem:[%s2749_s20 + $0x214] ss:$12 sps:$4 sm:$0xff]   ;;  %v2076_v18 = vld [vmem:[%s2749_s20 + $0x210] ss:$12 sps:$4 sm:$0xff]  }
  0x20   :  { %1741 = vmatprep.subr.bf16.mxu1 %v2018_v31  ;;  %v2081_v19 = vld [vmem:[%s2749_s20 + $0x22c] ss:$12 sps:$4 sm:$0xff]   ;;  %v2079_v20 = vld [vmem:[%s2749_s20 + $0x228] ss:$12 sps:$4 sm:$0xff]   ;;  %v2082_v21 = vld [vmem:[%s2751_s3 + $0x80] sm:$0xff]  }
  0x21   :  { %v2084_v23 = vld [vmem:[%s2751_s3 + $0x90] sm:$0xff]   ;;  %v2085_v24 = vld [vmem:[%s2751_s3 + $0x98] sm:$0xff]   ;;  %v2086_v25 = vld [vmem:[%s2751_s3 + $0xa0] sm:$0xff]  }
  0x22   :  { %577 = vmatpush1.bf16.msra.mxu0 %v2017_v30  ;;  %v2087_v27 = vld [vmem:[%s2751_s3 + $0xa8] sm:$0xff]   ;;  %v2088_v28 = vld [vmem:[%s2751_s3 + $0xb0] sm:$0xff]   ;;  %v2089_v29 = vld [vmem:[%s2751_s3 + $0x40] sm:$0xff]  }
  0x23   :  { %578 = vmatprep.subr.bf16.mxu0 %v2019_v32  ;;  %1742 = vmatpush3.bf16.msra.mxu1 %v2021_v33  ;;  %v2090_v30 = vld [vmem:[%s2751_s3 + $0xb8] sm:$0xff]   ;;  %v2091_v31 = vld [vmem:[%s2751_s3] sm:$0xff]   ;;  %v2092_v32 = vld [vmem:[%s2751_s3 + $0x48] sm:$0xff]  }
  0x24   :  { %1743 = vmatprep.subr.bf16.mxu1 %v2023_v36  ;;  %v2093_v33 = vld [vmem:[%s2751_s3 + $0x8] sm:$0xff]   ;;  %v2094_v34 = vld [vmem:[%s2751_s3 + $0x50] sm:$0xff]   ;;  %v2096_v36 = vld [vmem:[%s2751_s3 + $0x58] sm:$0xff]  }
  0x25   :  { %v2098_v38 = vld [vmem:[%s2751_s3 + $0x60] sm:$0xff]   ;;  %v2102_v42 = vld [vmem:[%s2751_s3 + $0x70] sm:$0xff]  }
  0x26   :  { %579 = vmatpush1.bf16.msra.mxu0 %v2022_v35  ;;  %v2095_v35 = vld [vmem:[%s2751_s3 + $0x10] sm:$0xff]  }
  0x27   :  { %580 = vmatprep.subr.bf16.mxu0 %v2024_v37  ;;  %1744 = vmatpush3.bf16.msra.mxu1 %v2026_v40  ;;  %v2097_v37 = vld [vmem:[%s2751_s3 + $0x18] sm:$0xff]   ;;  %v2100_v40 = vld [vmem:[%s2751_s3 + $0x68] sm:$0xff]  }
  0x28   :  { %1827 = vmatprep.subr.bf16.mxu1 %v2120_v45 }
  0x2a   :  { %581 = vmatpush1.bf16.msra.mxu0 %v2027_v41  ;;  %679 = vmatmul.mubr.bf16.vlgmr.msra.gmra.mrb[0].mxu1 %v2332_v39  ;;  %v2101_v41 = vld [vmem:[%s2751_s3 + $0x28] sm:$0xff]  }
  0x2b   :  { %582 = vmatprep.subr.bf16.mxu0 %v2029_v43  ;;  %1828 = vmatpush3.bf16.msra.mxu1 %v2031_v44  ;;  %v2103_v43 = vld [vmem:[%s2751_s3 + $0x30] sm:$0xff]   ;;  %v2104_v44 = vld [vmem:[%s2751_s3 + $0x78] sm:$0xff]  }
  0x2c   :  { %1843 = vmatprep.mubr.msk.bf16.mxu1 %vm2121_vm0, %v2120_v45  ;;  %1829 = vmatprep.subr.bf16.mxu1 %v2120_v45 }
  0x2e   :  { %583 = vmatpush1.bf16.msra.mxu0 %v2032_v46  ;;  %v2105_v46 = vld [vmem:[%s2751_s3 + $0x38] sm:$0xff]  }
  0x2f   :  { %584 = vmatprep.subr.bf16.mxu0 %v2033_v47  ;;  %1830 = vmatpush3.bf16.msra.mxu1 %v2035_v48 }
  0x30   :  { %1831 = vmatprep.subr.bf16.mxu1 %v2120_v45 }
  0x32   :  { %585 = vmatpush1.bf16.msra.mxu0 %v2036_v49 }
  0x33   :  { %586 = vmatprep.subr.bf16.mxu0 %v2037_v50  ;;  %1832 = vmatpush3.bf16.msra.mxu1 %v2039_v51 }
  0x34   :  { %1833 = vmatprep.subr.bf16.mxu1 %v2120_v45 }
  0x36   :  { %587 = vmatpush1.bf16.msra.mxu0 %v2040_v52  ;;  %v738_v52 = vsub.s32 2, %v2293_v26 }
  0x37   :  { %588 = vmatprep.subr.bf16.mxu0 %v2041_v53  ;;  %1834 = vmatpush3.bf16.msra.mxu1 %v2043_v54  ;;  %v726_v53 = vld [vmem:[%s2752_s30] sm:$0x7] }
  0x38   :  { %1835 = vmatprep.subr.bf16.mxu1 %v2120_v45  ;;  %v746_v54 = vld [vmem:[%s2727_s4] sm:$0x7] }
  0x3a   :  { %589 = vmatpush1.bf16.msra.mxu0 %v2044_v55  ;;  %v739_v55 = vrot.slane %v726_v53, %v738_v52 }
  0x3b   :  { %590 = vmatprep.subr.bf16.mxu0 %v2045_v56  ;;  %1836 = vmatpush3.bf16.msra.mxu1 %v2047_v57 }
  0x3c   :  { %1837 = vmatprep.subr.bf16.mxu1 %v2120_v45 }
  0x3e   :  { %591 = vmatpush1.bf16.msra.mxu0 %v2048_v58  ;;  %v759_v58 = vrot.slane %v746_v54, %v738_v52 }
  0x3f   :  { %592 = vmatprep.subr.bf16.mxu0 %v2049_v59  ;;  %1838 = vmatpush3.bf16.msra.mxu1 %v2051_v60 }
  0x40   :  { %1839 = vmatprep.subr.bf16.mxu1 %v2120_v45 }
  0x42   :  { %593 = vmatpush1.bf16.msra.mxu0 %v2052_v61 }
  0x43   :  { %594 = vmatprep.subr.bf16.mxu0 %v2053_v62  ;;  %1840 = vmatpush3.bf16.msra.mxu1 %v2055_v63 }
  0x44   :  { %1841 = vmatprep.subr.bf16.mxu1 %v2120_v45 }
  0x46   :  { %595 = vmatpush1.bf16.msra.mxu0 %v2056_v0  ;;  %v770_v0 = vld [vmem:[%s2728_s1 + $0x8] sm:$0xf] }
  0x47   :  { %605 = vmatprep.subr.bf16.mxu0 %v2059_v1  ;;  %1842 = vmatpush3.bf16.msra.mxu1 %v2060_v2 }
  0x48   :  { %1760 = vmatprep.subr.bf16.mxu1 %v2089_v29  ;;  %v1071_v29 = vld [vmem:[%s2729_s9 + $0x10] sm:$0xff] }
  0x49   :  { %597 = vmatmul.mubr.bf16.vlgmr.msra.gmra.mrb[0].mxu0 %v2332_v39  ;;  %v2099_v39 = vld [vmem:[%s2751_s3 + $0x20] sm:$0xff]  }
  0x4a   :  { %606 = vmatpush1.bf16.msra.mxu0 %v2057_v4  ;;  %637 = vmatprep.mubr.bf16.mxu0 %v2122_v9  ;;  %v730_v4 = vsub.s32 0, %v2293_v26 }
  0x4b   :  { %607 = vmatprep.subr.bf16.mxu0 %v2063_v5  ;;  %1844 = vmatmul.mubr.bf16.vlgmr.msra.gmra.mrb[4].mxu1 %v175_v6  ;;  %v734_v5 = vsub.s32 1, %v2293_v26 }
  0x4c   :  { %1761 = vmatpush3.bf16.msra.mxu1 %v2091_v31  ;;  %v1072_v31 = vld [vmem:[%s2729_s9 + $0x18] sm:$0xff] }
  0x4d   :  { %1762 = vmatprep.subr.bf16.mxu1 %v2092_v32  ;;  %v1950_v32 = vpack.c.bf16 %v1072_v31, %v1071_v29  ;;  %v2108_v29 = vld [vmem:[%s2737_s15 + $0x8] sm:$0xff]   ;;  %v2110_v31 = vld [vmem:[%s2737_s15 + $0x18] sm:$0xff]  }
  0x4e   :  { %608 = vmatpush1.bf16.msra.mxu0 %v2061_v7  ;;  %v735_v7 = vrot.slane %v726_v53, %v734_v5 }
  0x4f   :  { %609 = vmatprep.subr.bf16.mxu0 %v2066_v8  ;;  %v751_v8 = vrot.slane %v746_v54, %v730_v4 }
  0x50   :  { %1763 = vmatpush3.bf16.msra.mxu1 %v2093_v33  ;;  %v1073_v33 = vld [vmem:[%s2729_s9 + $0x20] sm:$0xff] }
  0x51   :  { %1764 = vmatprep.subr.bf16.mxu1 %v2094_v34  ;;  %v1074_v34 = vld [vmem:[%s2729_s9 + $0x28] sm:$0xff] }
  0x52   :  { %610 = vmatpush1.bf16.msra.mxu0 %v2064_v10  ;;  %v755_v10 = vrot.slane %v746_v54, %v734_v5  ;;  %v1155_v5 = vld [vmem:[%s2733_s8] sm:$0xf] }
  0x53   :  { %611 = vmatprep.subr.bf16.mxu0 %v2069_v11 }
  0x54   :  { %1765 = vmatpush3.bf16.msra.mxu1 %v2095_v35  ;;  %v1953_v35 = vpack.c.bf16 %v1074_v34, %v1073_v33  ;;  %v2112_v33 = vld [vmem:[%s2737_s15 + $0x28] sm:$0xff]   ;;  %v2113_v34 = vld [vmem:[%s2737_s15 + $0x30] sm:$0xff]  }
  0x55   :  { %1766 = vmatprep.subr.bf16.mxu1 %v2096_v36  ;;  %v1075_v36 = vld [vmem:[%s2729_s9 + $0x30] sm:$0xff] }
  0x56   :  { %612 = vmatpush1.bf16.msra.mxu0 %v2067_v12  ;;  %v769_v12 = vld [vmem:[%s2728_s1] sm:$0xff] }
  0x57   :  { %613 = vmatprep.subr.bf16.mxu0 %v2072_v13 }
  0x58   :  { %1767 = vmatpush3.bf16.msra.mxu1 %v2097_v37  ;;  %v1076_v37 = vld [vmem:[%s2729_s9 + $0x38] sm:$0xff] }
  0x59   :  { %1768 = vmatprep.subr.bf16.mxu1 %v2098_v38  ;;  %v1956_v38 = vpack.c.bf16 %v1076_v37, %v1075_v36 }
  0x5a   :  { %614 = vmatpush1.bf16.msra.mxu0 %v2070_v14 }
  0x5b   :  { %615 = vmatprep.subr.bf16.mxu0 %v2075_v15 }
  0x5c   :  { %1769 = vmatpush3.bf16.msra.mxu1 %v2099_v39  ;;  %v1077_v39 = vld [vmem:[%s2729_s9 + $0x40] sm:$0xff] }
  0x5d   :  { %1770 = vmatprep.subr.bf16.mxu1 %v2100_v40  ;;  %v1078_v40 = vld [vmem:[%s2729_s9 + $0x48] sm:$0xff] }
  0x5e   :  { %616 = vmatpush1.bf16.msra.mxu0 %v2073_v16 }
  0x5f   :  { %617 = vmatprep.subr.bf16.mxu0 %v2078_v17 }
  0x60   :  { %1771 = vmatpush3.bf16.msra.mxu1 %v2101_v41  ;;  %v1959_v41 = vpack.c.bf16 %v1078_v40, %v1077_v39  ;;  %v1727_v40 = vld [vmem:[%s2739_s16] ss:$0 sm:$0xff] }
  0x61   :  { %1772 = vmatprep.subr.bf16.mxu1 %v2102_v42  ;;  %v1079_v42 = vld [vmem:[%s2729_s9 + $0x50] sm:$0xff] }
  0x62   :  { %618 = vmatpush1.bf16.msra.mxu0 %v2076_v18 }
  0x63   :  { %619 = vmatprep.subr.bf16.mxu0 %v2081_v19  ;;  %v772_v19 = vcombine.high %v769_v12, %v769_v12 }
  0x64   :  { %1773 = vmatpush3.bf16.msra.mxu1 %v2103_v43  ;;  %v1080_v43 = vld [vmem:[%s2729_s9 + $0x58] sm:$0xff] }
  0x65   :  { %1774 = vmatprep.subr.bf16.mxu1 %v2104_v44  ;;  %v1962_v44 = vpack.c.bf16 %v1080_v43, %v1079_v42  ;;  %v1728_v42 = vld [vmem:[%s2741_s17] ss:$0 sm:$0xff] }
  0x66   :  { %620 = vmatpush1.bf16.msra.mxu0 %v2079_v20 }
  0x67   :  { %1847 = vmatprep.subr.bf16.mxu0 %v2120_v45 }
  0x68   :  { %1775 = vmatpush3.bf16.msra.mxu1 %v2105_v46  ;;  %v1081_v46 = vld [vmem:[%s2729_s9 + $0x60] sm:$0xff] }
  0x69   :  { %638 = vmatmul.mubr.bf16.vlgmr.msra.gmra.mrb[0].mxu0 %v175_v6  ;;  %1902 = vmatprep.subr.mxu1 %v2120_v45  ;;  %v731_v6 = vrot.slane %v726_v53, %v730_v4  ;;  %v1235_v4 = vld [vmem:[%s2732_s10 + $0x8] sm:$0xff] }
  0x6a   :  { %1848 = vmatpush3.bf16.msra.mxu0 %v2082_v21  ;;  %1863 = vmatprep.mubr.msk.bf16.mxu0 %vm2121_vm0, %v2120_v45 }
  0x6b   :  { %1849 = vmatprep.subr.bf16.mxu0 %v2120_v45 }
  0x6e   :  { %1850 = vmatpush3.bf16.msra.mxu0 %v2083_v22 }
  0x6f   :  { %1851 = vmatprep.subr.bf16.mxu0 %v2120_v45 }
  0x72   :  { %1852 = vmatpush3.bf16.msra.mxu0 %v2084_v23 }
  0x73   :  { %1853 = vmatprep.subr.bf16.mxu0 %v2120_v45 }
  0x76   :  { %1854 = vmatpush3.bf16.msra.mxu0 %v2085_v24 }
  0x77   :  { %1855 = vmatprep.subr.bf16.mxu0 %v2120_v45 }
  0x7a   :  { %1856 = vmatpush3.bf16.msra.mxu0 %v2086_v25  ;;  %v2123_v25 = vmov 0.0|0.0  }
  0x7b   :  { %1857 = vmatprep.subr.bf16.mxu0 %v2120_v45 }
  0x7e   :  { %1858 = vmatpush3.bf16.msra.mxu0 %v2087_v27  ;;  %v1069_v27 = vld [vmem:[%s2729_s9] sm:$0xff] }
  0x7f   :  { %1859 = vmatprep.subr.bf16.mxu0 %v2120_v45 }
  0x82   :  { %1860 = vmatpush3.bf16.msra.mxu0 %v2088_v28  ;;  %v1070_v28 = vld [vmem:[%s2729_s9 + $0x8] sm:$0xff] }
  0x83   :  { %1861 = vmatprep.subr.bf16.mxu0 %v2120_v45 }
  0x86   :  { %1862 = vmatpush3.bf16.msra.mxu0 %v2090_v30  ;;  %v1947_v30 = vpack.c.bf16 %v1070_v28, %v1069_v27  ;;  %v2107_v27 = vld [vmem:[%s2737_s15] sm:$0xff]  }
  0x87   :  { %1946 = vmatprep.subr.bf16.mxu0 %v2123_v25 }
  0xfd   :  { %v1745_v47 = vpop.f32.mrb[0].mxu1 }
  0xfe   :  { %v1746_v48 = vpop.f32.mrb[1].mxu1 }
  0xff   :  { %v1747_v49 = vadd.f32 %v1746_v48, %v1745_v47  ;;  %v1748_v50 = vpop.f32.mrb[2].mxu1  ;;  %v1082_v47 = vld [vmem:[%s2729_s9 + $0x68] sm:$0xff] }
 0x100   :  { %v1749_v51 = vpop.f32.mrb[3].mxu1  ;;  %v1965_v48 = vpack.c.bf16 %v1082_v47, %v1081_v46  ;;  %v1084_v50 = vld [vmem:[%s2729_s9 + $0x78] sm:$0xff] }
 0x11e   :  { %v720_v56 = vpop.f32.mrb[4].mxu1 }
 0x11f   :  { %v721_v57 = vadd.f32 %v1747_v49, %v720_v56  ;;  %v1845_v59 = vpop.f32.mrb[5].mxu1  ;;  %v1083_v49 = vld [vmem:[%s2729_s9 + $0x70] sm:$0xff] }
 0x120   :  { %v723_v60 = vpop.f32.mrb[6].mxu1  ;;  %v1968_v51 = vpack.c.bf16 %v1084_v50, %v1083_v49 }
 0x121   :  { %v745_v61 = vmul.f32 %v739_v55, %v721_v57  ;;  %v1846_v62 = vpop.f32.mrb[7].mxu1  ;;  %v1709_v60 = vld [vmem:[%s2730_s6] ss:$0 sm:$0xff] }
 0x123   :  { %v765_v63 = vadd.f32 %v759_v58, %v745_v61 }
 0x125   :  { %v768_v1 = vmax.f32 %v765_v63, 0.0  ;;  %v1710_v63 = vld [vmem:[%s2731_s7] ss:$0 sm:$0xff] }
 0x127   :  { %v776_v2 = vmul.f32 %v770_v0, %v768_v1 }
 0x129   :  { %v779_v3 = vpack.c.bf16 %v776_v2, %v776_v2 }
 0x12b   :  { %1864 = vmatmul.mubr.bf16.vlgmr.msra.gmra.mrb[4].mxu0 %v779_v3  ;;  %v1234_v3 = vld [vmem:[%s2732_s10] sm:$0xff] }
 0x12c   :  { %1899 = vmatprep.mubr.msk.f32.mxu0 %vm2121_vm0, %v2120_v45  ;;  %1948 = vmatpush3.bf16.msra.mxu0 %v1947_v30  ;;  %v2109_v30 = vld [vmem:[%s2737_s15 + $0x10] sm:$0xff]  }
 0x12d   :  { %1949 = vmatprep.subr.bf16.mxu0 %v2123_v25 }
 0x130   :  { %1951 = vmatpush3.bf16.msra.mxu0 %v1950_v32  ;;  %v2111_v32 = vld [vmem:[%s2737_s15 + $0x20] sm:$0xff]  }
 0x131   :  { %1952 = vmatprep.subr.bf16.mxu0 %v2123_v25 }
 0x134   :  { %1954 = vmatpush3.bf16.msra.mxu0 %v1953_v35  ;;  %v2114_v35 = vld [vmem:[%s2737_s15 + $0x38] sm:$0xff]  }
 0x135   :  { %1955 = vmatprep.subr.bf16.mxu0 %v2123_v25 }
 0x138   :  { %1957 = vmatpush3.bf16.msra.mxu0 %v1956_v38 }
 0x139   :  { %1958 = vmatprep.subr.bf16.mxu0 %v2123_v25 }
 0x13c   :  { %v639_v9 = vpop.f32.mrb[0].mxu0  ;;  %1960 = vmatpush3.bf16.msra.mxu0 %v1959_v41 }
 0x13d   :  { %v743_v11 = vmul.f32 %v731_v6, %v639_v9  ;;  %v641_v13 = vpop.f32.mrb[1].mxu0  ;;  %1961 = vmatprep.subr.bf16.mxu0 %v2123_v25  ;;  %v1971_v6 = vpack.c.bf16 %v1235_v4, %v1234_v3 }
 0x13e   :  { %v744_v14 = vmul.f32 %v735_v7, %v641_v13  ;;  %v643_v15 = vpop.f32.mrb[2].mxu0 }
 0x13f   :  { %v763_v16 = vadd.f32 %v751_v8, %v743_v11  ;;  %v644_v17 = vpop.f32.mrb[3].mxu0  ;;  %v1318_v11 = vld [vmem:[%s2734_s12] sm:$0xff] }
 0x140   :  { %v764_v18 = vadd.f32 %v755_v10, %v744_v14  ;;  %1963 = vmatpush3.bf16.msra.mxu0 %v1962_v44  ;;  %v1406_v17 = vld [vmem:[%s2736_s14] sm:$0xff] }
 0x141   :  { %v766_v20 = vmax.f32 %v763_v16, 0.0  ;;  %1964 = vmatprep.subr.bf16.mxu0 %v2123_v25 }
 0x142   :  { %v767_v21 = vmax.f32 %v764_v18, 0.0  ;;  %v1407_v18 = vld [vmem:[%s2736_s14 + $0x8] sm:$0xff] }
 0x143   :  { %v774_v26 = vmul.f32 %v769_v12, %v766_v20  ;;  %v1713_v12 = vld [vmem:[%s2735_s11] ss:$0 sm:$0xff] }
 0x144   :  { %v775_v22 = vmul.f32 %v772_v19, %v767_v21  ;;  %1966 = vmatpush3.bf16.msra.mxu0 %v1965_v48  ;;  %v1974_v19 = vpack.c.bf16 %v1407_v18, %v1406_v17  ;;  %v1715_v20 = vld [vmem:[%s2738_s13] ss:$0 sm:$0xff] }
 0x145   :  { %v777_v24 = vpack.c.bf16 %v774_v26, %v774_v26  ;;  %1967 = vmatprep.subr.bf16.mxu0 %v2123_v25 }
 0x146   :  { %v778_v23 = vpack.c.bf16 %v775_v22, %v775_v22 }
 0x148   :  { %1004 = vmatprep.mubr.bf16.mxu1 %v778_v23  ;;  %1969 = vmatpush3.bf16.msra.mxu0 %v1968_v51 }
 0x149   :  { %1005 = vmatmul.mubr.bf16.vlgmr.msra.gmra.mrb[8].mxu1 %v777_v24 }
 0x14a   :  { %1904 = vmatprep.mubr.msk.f32.mxu1 %vm2121_vm0, %v2120_v45 }
 0x1fe   :  { %v1046_v52 = vpop.f32.mrb[4].mxu0 }
 0x1ff   :  { %v1865_v53 = vpop.f32.mrb[5].mxu0 }
 0x200   :  { %v1049_v54 = vpop.f32.mrb[6].mxu0 }
 0x201   :  { %v1866_v55 = vpop.f32.mrb[7].mxu0 }
 0x21c   :  { %v1776_v56 = vpop.f32.mrb[8].mxu1 }
 0x21d   :  { %v1777_v57 = vpop.f32.mrb[9].mxu1 }
 0x21e   :  { %v1778_v58 = vadd.f32 %v1777_v57, %v1776_v56  ;;  %v1779_v59 = vpop.f32.mrb[10].mxu1 }
 0x21f   :  { %v1780_v61 = vpop.f32.mrb[11].mxu1 }
 0x220   :  { %v1047_v62 = vadd.f32 %v1778_v58, %v1046_v52 }
 0x222   :  { %v1059_v0 = vmul.f32 %v1709_v60, %v1047_v62 }
 0x224   :  { %v2635_v1 = vadd.f32 %v1710_v63, %v1059_v0 }
 0x226   :  { %v1068_v2 = vmax.f32 %v2635_v1, 0.0 }
 0x228   :  { %1900 = vmatmul.mubr.f32.vlgmr.msra.gmra.mrb[8].mxu0 %v1068_v2 }
 0x2fb   :  { %v1151_v7 = vpop.f32.mrb[8].mxu0 }
 0x2fc   :  { %v1901_v8 = vpop.f32.mrb[9].mxu0  ;;  %1903 = vmatpush3.msk.msra.mxu1 %vm1160_vm1, %v1151_v7 }
 0x2fd   :  { %1905 = vmatmul.mubr.msk.f32.vlgmr.msra.gmra.mrb[12].mxu1 %vm1156_vm2, %v1155_v5  ;;  %1970 = vmatprep.subr.bf16.mxu1 %v2123_v25 }
 0x2fe   :  { %1972 = vmatpush3.bf16.msra.mxu1 %v1971_v6  ;;  %1911 = vmatprep.mubr.msk.f32.mxu1 %vm2121_vm0, %v2120_v45 }
 0x2ff   :  { %1914 = vmatprep.subr.mxu1 %v2120_v45 }
 0x3d0   :  { %v1230_v9 = vpop.f32.mrb[12].mxu1 }
 0x3d1   :  { %1912 = vmatmul.mubr.msk.f32.vlgmr.msra.gmra.mrb[14].mxu1 %vm1243_vm3, %v1230_v9  ;;  %v1906_v10 = vpop.f32.mrb[13].mxu1 }
 0x3d2   :  { %1916 = vmatprep.mubr.msk.f32.mxu1 %vm2121_vm0, %v2120_v45  ;;  %1915 = vmatpush3.msra.mxu1 %v1318_v11 }
 0x3d3   :  { %1973 = vmatprep.subr.bf16.mxu1 %v2123_v25 }
 0x4a4   :  { %v1313_v13 = vpop.f32.mrb[14].mxu1 }
 0x4a5   :  { %v1314_v14 = vadd.f32 %v1713_v12, %v1313_v13  ;;  %v1913_v15 = vpop.f32.mrb[15].mxu1 }
 0x4a7   :  { %v1317_v16 = vmax.f32 %v1314_v14, 0.0 }
 0x4a9   :  { %1917 = vmatmul.mubr.msk.f32.vlgmr.msra.gmra.mrb[16].mxu1 %vm1326_vm4, %v1317_v16 }
 0x4aa   :  { %1923 = vmatprep.mubr.msk.f32.mxu1 %vm2121_vm0, %v2120_v45  ;;  %1975 = vmatpush3.bf16.msra.mxu1 %v1974_v19 }
 0x4ab   :  { %1926 = vmatprep.subr.bf16.mxu1 %v2120_v45 }
 0x57c   :  { %v1396_v21 = vpop.f32.mrb[16].mxu1 }
 0x57d   :  { %v1397_v26 = vadd.f32 %v1715_v20, %v1396_v21  ;;  %v1918_v22 = vpop.f32.mrb[17].mxu1 }
 0x57f   :  { %v1717_v23 = vmul.f32 -1.442695, %v1397_v26 }
 0x581   :  { %2115 = vpow2.f32 %v1717_v23 }
 0x58b   :  { %v2116_v24 = vpop.eup %2115 }
 0x58c   :  { %v1403_v25 = vadd.f32 1.0, %v2116_v24 }
 0x58e   :  { %2117 = vrcp.f32 %v1403_v25 }
 0x598   :  { %v2118_v28 = vpop.eup %2117 }
 0x599   :  { %1924 = vmatmul.mubr.msk.f32.vlgmr.msra.gmra.mrb[18].mxu1 %vm1243_vm3, %v2118_v28 }
 0x59a   :  { %1927 = vmatpush3.bf16.msra.mxu1 %v2107_v27  ;;  %1942 = vmatprep.mubr.msk.bf16.mxu1 %vm2121_vm0, %v2120_v45 }
 0x59b   :  { %1928 = vmatprep.subr.bf16.mxu1 %v2120_v45 }
 0x59e   :  { %1929 = vmatpush3.bf16.msra.mxu1 %v2108_v29 }
 0x59f   :  { %1930 = vmatprep.subr.bf16.mxu1 %v2120_v45 }
 0x5a2   :  { %1931 = vmatpush3.bf16.msra.mxu1 %v2109_v30 }
 0x5a3   :  { %1932 = vmatprep.subr.bf16.mxu1 %v2120_v45 }
 0x5a6   :  { %1933 = vmatpush3.bf16.msra.mxu1 %v2110_v31 }
 0x5a7   :  { %1934 = vmatprep.subr.bf16.mxu1 %v2120_v45 }
 0x5aa   :  { %1935 = vmatpush3.bf16.msra.mxu1 %v2111_v32 }
 0x5ab   :  { %1936 = vmatprep.subr.bf16.mxu1 %v2120_v45 }
 0x5ae   :  { %1937 = vmatpush3.bf16.msra.mxu1 %v2112_v33 }
 0x5af   :  { %1938 = vmatprep.subr.bf16.mxu1 %v2120_v45 }
 0x5b2   :  { %1939 = vmatpush3.bf16.msra.mxu1 %v2113_v34 }
 0x5b3   :  { %1940 = vmatprep.subr.bf16.mxu1 %v2120_v45  ;;  %v1603_v45 = vld [vmem:[%s2740_s18] sm:$0x3] }
 0x5b4   :  { %v1604_v44 = vunpack.c.l.bf16 %v1603_v45 }
 0x5b6   :  { %1941 = vmatpush3.bf16.msra.mxu1 %v2114_v35 }
 0x66c   :  { %v1477_v36 = vpop.f32.mrb[18].mxu1 }
 0x66d   :  { %v1481_v37 = vmul.f32 %v1477_v36, %v1068_v2  ;;  %v1925_v38 = vpop.f32.mrb[19].mxu1 }
 0x66f   :  { %v1482_v39 = vpack.c.bf16 %v1481_v37, %v1481_v37 }
 0x671   :  { %1943 = vmatmul.mubr.bf16.vlgmr.msra.gmra.mrb[20].mxu1 %v1482_v39 }
 0x744   :  { %v1581_v41 = vpop.f32.mrb[20].mxu1 }
 0x745   :  { %v1594_v43 = vmul.f32 %v1727_v40, %v1581_v41  ;;  %v1944_v46 = vpop.f32.mrb[21].mxu1 }
 0x746   :  { %v1584_v47 = vpop.f32.mrb[22].mxu1 }
 0x747   :  { %v1602_v48 = vadd.f32 %v1728_v42, %v1594_v43  ;;  %v1945_v49 = vpop.f32.mrb[23].mxu1 }
 0x749   :  { %v1605_v50 = vadd.f32 %v1604_v44, %v1602_v48 }
 0x74b   :  { %v1606_v51 = vmax.f32 %v1605_v50, 0.0 }
 0x74d   :  { %v1607_v52 = vpack.c.bf16 %v1606_v51, %v1606_v51 }
 0x74f   :  { %1608 = vst [vmem:[%s2742_s19] sm:$0x3] %v1607_v52 }

// kernel: stage_forward.2
= control target key start
LH: loop header
LB: loop body
LE: loop exit
PB: predicated region body
PF: predicated region fallthrough
CT: control target
= control target key end

     0   :  { %s5187_s0 = inlined_call_operand.vmem [shape: bf16[4,400], index: 0, kind: input, shape index: {}]   ;;  %s5188_s1 = inlined_call_operand.vmem [shape: f32[4,800], index: 1, kind: input, shape index: {}]   ;;  %s5189_s2 = inlined_call_operand.vmem [shape: bf16[400,800], index: 2, kind: input, shape index: {}]   ;;  %s5190_s3 = inlined_call_operand.vmem [shape: f32[1,800], index: 3, kind: input, shape index: {}]   ;;  %s5191_s4 = inlined_call_operand.hbm [shape: f32[1,800], index: 4, kind: input, shape index: {}]   ;;  %s5192_s5 = inlined_call_operand.hbm [shape: bf16[800,128], index: 5, kind: input, shape index: {}]   ;;  %s5193_s6 = inlined_call_operand.vmem [shape: f32[1,128], index: 6, kind: input, shape index: {}]   ;;  %s5194_s7 = inlined_call_operand.hbm [shape: f32[1,128], index: 7, kind: input, shape index: {}]   ;;  %s5195_s8 = inlined_call_operand.hbm [shape: f32[4,4], index: 8, kind: input, shape index: {}]   ;;  %s5196_s9 = inlined_call_operand.vmem [shape: f32[128,16], index: 9, kind: input, shape index: {}]   ;;  %s5197_s10 = inlined_call_operand.vmem [shape: f32[16,8], index: 10, kind: input, shape index: {}]   ;;  %s5198_s11 = inlined_call_operand.hbm [shape: f32[1,8], index: 11, kind: input, shape index: {}]   ;;  %s5199_s12 = inlined_call_operand.hbm [shape: f32[8,16], index: 12, kind: input, shape index: {}]   ;;  %s5200_s13 = inlined_call_operand.hbm [shape: f32[1,16], index: 13, kind: input, shape index: {}]   ;;  %s5201_s14 = inlined_call_operand.hbm [shape: f32[16,128], index: 14, kind: input, shape index: {}]   ;;  %s5202_s15 = inlined_call_operand.hbm [shape: bf16[128,128], index: 15, kind: input, shape index: {}]   ;;  %s5203_s16 = inlined_call_operand.vmem [shape: f32[1,128], index: 16, kind: input, shape index: {}]   ;;  %s5204_s17 = inlined_call_operand.hbm [shape: f32[1,128], index: 17, kind: input, shape index: {}]   ;;  %s5205_s18 = inlined_call_operand.vmem [shape: bf16[4,64], index: 18, kind: input, shape index: {}]   ;;  %s5206_s19 = inlined_call_operand.vmem [shape: bf16[64,128], index: 19, kind: input, shape index: {}]   ;;  %s5207_s20 = inlined_call_operand.hbm [shape: f32[1,128], index: 20, kind: input, shape index: {}]   ;;  %s5208_s21 = inlined_call_operand.hbm [shape: f32[1,128], index: 21, kind: input, shape index: {}]   ;;  %s5209_s22 = inlined_call_operand.vmem [shape: bf16[4,128], index: 22, kind: output, shape index: {}]  }
   0x1   :  { %5214 = sst [smem:[#allocation28_spill]] %s5187_s0 }
   0x2   :  { %5215 = sst [smem:[#allocation29_spill]] %s5188_s1 }
   0x3   :  { %5216 = sst [smem:[#allocation30_spill]] %s5189_s2 }
   0x4   :  { %5217 = sst [smem:[#allocation31_spill]] %s5190_s3 }
   0x5   :  { %5218 = sst [smem:[#allocation32_spill]] %s5191_s4 }
   0x6   :  { %5219 = sst [smem:[#allocation33_spill]] %s5192_s5 }
   0x7   :  { %5220 = sst [smem:[#allocation34_spill]] %s5193_s6 }
   0x8   :  { %5221 = sst [smem:[#allocation35_spill]] %s5203_s16 }
   0x9   :  { %5222 = sst [smem:[#allocation36_spill]] %s5209_s22 }
   0xa   :  { %27 = vsyncpa [#allocation3], 0 }
   0xb   :  { %28 = vsyncpa [#allocation5], 0 }
   0xc   :  { %29 = vsyncpa [#allocation8], 0 }
   0xd   :  { %30 = vsyncpa [#allocation11], 0 }
   0xe   :  { %31 = vsyncpa [#allocation14], 0 }
   0xf   :  { %32 = vsyncpa [#allocation17], 0 }
  0x10   :  { %33 = vsyncpa [#allocation20], 0  ;;  %s4162_s3 = smov [#allocation4]   ;;  %s5223_s4 = sld [smem:[#allocation33_spill]] }
  0x11   :  { %s57_s28 = sshll.u32 %s4162_s3, 4  ;;  %s58_s28 = int_to_ptr.vmem [resolvable:$true] %s57_s28 }
  0x16   :  { %s3884_s0 = scalar_lea.hbm %s5223_s4, 6400 }
  0x17   :  { %p3885_p0 = scmp.ne.s32.totalorder %s5223_s4, %s3884_s0  ;;  %p3888_p1 = scmp.lt.u32.totalorder %s3884_s0, %s5223_s4 }
  0x19   :  { %p3890_p2 = pnand %p3888_p1, %p3885_p0 }
  0x1b   :  { %3893 = shalt.err (!%p3890_p2)
}
  0x1c   :  { %s3894_s6 = scalar_lea.vmem %s58_s28, 6400  ;;  %p3899_p4 = scmp.lt.s32.totalorder %s58_s28, %s58_s28 }
  0x1d   :  { %p3895_p3 = scmp.ne.s32.totalorder %s58_s28, %s3894_s6  ;;  %p3900_p5 = scmp.lt.s32.totalorder %s3894_s6, %s3894_s6 }
  0x1f   :  { %p3901_p6 = por %p3900_p5, %p3899_p4 }
  0x21   :  { %p3902_p7 = pnand %p3901_p6, %p3895_p3 }
  0x23   :  { %3905 = shalt.err (!%p3902_p7)
}
  0x24   :  { %s4163_s25 = smov 64   ;;  %s4164_s26 = smov 4  }
  0x25   :  { %63 = dma.hbm_to_vmem [thread:$0]  %s5223_s4, 6400, %s58_s28, [#allocation5], %s4163_s25, %s4163_s25, %s4164_s26  }
  0x26   :  { %s4165_s3 = smov [#allocation7]   ;;  %s4166_s30 = smov [#allocation10]  }
  0x27   :  { %s82_s29 = sshll.u32 %s4165_s3, 4  ;;  %s106_s0 = sshll.u32 %s4166_s30, 4  ;;  %s83_s29 = int_to_ptr.vmem [resolvable:$true] %s82_s29  ;;  %s107_s0 = int_to_ptr.vmem [resolvable:$true] %s106_s0 }
  0x28   :  { %s3906_s5 = scalar_lea.hbm %s5195_s8, 64 }
  0x29   :  { %p3907_p8 = scmp.ne.s32.totalorder %s5195_s8, %s3906_s5  ;;  %p3910_p9 = scmp.lt.u32.totalorder %s3906_s5, %s5195_s8 }
  0x2b   :  { %p3912_p10 = pnand %p3910_p9, %p3907_p8 }
  0x2d   :  { %3915 = shalt.err (!%p3912_p10)
}
  0x2e   :  { %s3916_s28 = scalar_lea.vmem %s83_s29, 64  ;;  %p3921_p12 = scmp.lt.s32.totalorder %s83_s29, %s83_s29 }
  0x2f   :  { %p3917_p11 = scmp.ne.s32.totalorder %s83_s29, %s3916_s28  ;;  %p3922_p13 = scmp.lt.s32.totalorder %s3916_s28, %s3916_s28 }
  0x31   :  { %p3923_p0 = por %p3922_p13, %p3921_p12 }
  0x33   :  { %p3924_p1 = pnand %p3923_p0, %p3917_p11 }
  0x35   :  { %3927 = shalt.err (!%p3924_p1)
}
  0x36   :  { %85 = dma.hbm_to_vmem [thread:$0]  %s5195_s8, 64, %s83_s29, [#allocation8]  }
  0x37   :  { %s3928_s30 = scalar_lea.hbm %s5199_s12, 128 }
  0x38   :  { %p3929_p2 = scmp.ne.s32.totalorder %s5199_s12, %s3928_s30  ;;  %p3932_p3 = scmp.lt.u32.totalorder %s3928_s30, %s5199_s12 }
  0x3a   :  { %p3934_p4 = pnand %p3932_p3, %p3929_p2 }
  0x3c   :  { %3937 = shalt.err (!%p3934_p4)
}
  0x3d   :  { %s3938_s5 = scalar_lea.vmem %s107_s0, 128  ;;  %p3943_p6 = scmp.lt.s32.totalorder %s107_s0, %s107_s0 }
  0x3e   :  { %p3939_p5 = scmp.ne.s32.totalorder %s107_s0, %s3938_s5  ;;  %p3944_p7 = scmp.lt.s32.totalorder %s3938_s5, %s3938_s5 }
  0x40   :  { %p3945_p8 = por %p3944_p7, %p3943_p6 }
  0x42   :  { %p3946_p9 = pnand %p3945_p8, %p3939_p5 }
  0x44   :  { %3949 = shalt.err (!%p3946_p9)
}
  0x45   :  { %109 = dma.hbm_to_vmem [thread:$0]  %s5199_s12, 128, %s107_s0, [#allocation11]  }
  0x46   :  { %s4167_s24 = smov [#allocation13]   ;;  %s3950_s2 = scalar_lea.hbm %s5201_s14, 256 }
  0x47   :  { %s125_s6 = sshll.u32 %s4167_s24, 4  ;;  %p3951_p10 = scmp.ne.s32.totalorder %s5201_s14, %s3950_s2  ;;  %s126_s6 = int_to_ptr.vmem [resolvable:$true] %s125_s6 }
  0x48   :  { %p3954_p11 = scmp.lt.u32.totalorder %s3950_s2, %s5201_s14 }
  0x4a   :  { %p3956_p12 = pnand %p3954_p11, %p3951_p10 }
  0x4c   :  { %3959 = shalt.err (!%p3956_p12)
}
  0x4d   :  { %s3960_s22 = scalar_lea.vmem %s126_s6, 256  ;;  %p3965_p0 = scmp.lt.s32.totalorder %s126_s6, %s126_s6 }
  0x4e   :  { %p3961_p13 = scmp.ne.s32.totalorder %s126_s6, %s3960_s22  ;;  %p3966_p1 = scmp.lt.s32.totalorder %s3960_s22, %s3960_s22 }
  0x50   :  { %p3967_p2 = por %p3966_p1, %p3965_p0 }
  0x52   :  { %p3968_p3 = pnand %p3967_p2, %p3961_p13 }
  0x54   :  { %3971 = shalt.err (!%p3968_p3)
}
  0x55   :  { %s4168_s12 = smov 128   ;;  %s4169_s0 = smov 8  }
  0x56   :  { %131 = dma.hbm_to_vmem [thread:$0]  %s5201_s14, 256, %s126_s6, [#allocation14], %s4168_s12, %s4168_s12, %s4169_s0  }
  0x57   :  { %s4170_s5 = smov [#allocation16]   ;;  %s4171_s29 = smov [#allocation2]  }
  0x58   :  { %s152_s8 = sshll.u32 %s4170_s5, 4  ;;  %s48_s24 = sshll.u32 %s4171_s29, 4  ;;  %s153_s8 = int_to_ptr.vmem [resolvable:$true] %s152_s8  ;;  %s49_s24 = int_to_ptr.vmem [resolvable:$true] %s48_s24 }
  0x59   :  { %s3972_s2 = scalar_lea.hbm %s5204_s17, 16 }
  0x5a   :  { %p3973_p4 = scmp.ne.s32.totalorder %s5204_s17, %s3972_s2  ;;  %p3976_p5 = scmp.lt.u32.totalorder %s3972_s2, %s5204_s17 }
  0x5c   :  { %p3978_p6 = pnand %p3976_p5, %p3973_p4 }
  0x5e   :  { %3981 = shalt.err (!%p3978_p6)
}
  0x5f   :  { %s3982_s14 = scalar_lea.vmem %s153_s8, 16  ;;  %s3986_s6 = scalar_lea.vmem %s153_s8, 32 }
  0x60   :  { %p3983_p7 = scmp.ne.s32.totalorder %s153_s8, %s3982_s14  ;;  %p3987_p8 = scmp.lt.s32.totalorder %s153_s8, %s153_s8 }
  0x61   :  { %p3988_p9 = scmp.lt.s32.totalorder %s3986_s6, %s3982_s14 }
  0x63   :  { %p3989_p10 = por %p3988_p9, %p3987_p8 }
  0x65   :  { %p3990_p11 = pnand %p3989_p10, %p3983_p7 }
  0x67   :  { %3993 = shalt.err (!%p3990_p11)
}
  0x68   :  { %155 = dma.hbm_to_vmem [thread:$0]  %s5204_s17, 16, %s153_s8, [#allocation17]  }
  0x69   :  { %s5224_s1 = sld [smem:[#allocation32_spill]] }
  0x6f   :  { %s3994_s5 = scalar_lea.hbm %s5224_s1, 112 }
  0x70   :  { %p3995_p12 = scmp.ne.s32.totalorder %s5224_s1, %s3994_s5  ;;  %p3998_p13 = scmp.lt.u32.totalorder %s3994_s5, %s5224_s1 }
  0x72   :  { %p4000_p0 = pnand %p3998_p13, %p3995_p12 }
  0x74   :  { %4003 = shalt.err (!%p4000_p0)
}
  0x75   :  { %s4004_s27 = scalar_lea.vmem %s49_s24, 112  ;;  %s4008_s3 = scalar_lea.vmem %s49_s24, 128 }
  0x76   :  { %p4005_p1 = scmp.ne.s32.totalorder %s49_s24, %s4004_s27  ;;  %p4009_p2 = scmp.lt.s32.totalorder %s49_s24, %s49_s24 }
  0x77   :  { %p4010_p3 = scmp.lt.s32.totalorder %s4008_s3, %s4004_s27 }
  0x79   :  { %p4011_p4 = por %p4010_p3, %p4009_p2 }
  0x7b   :  { %p4012_p5 = pnand %p4011_p4, %p4005_p1 }
  0x7d   :  { %4015 = shalt.err (!%p4012_p5)
}
  0x7e   :  { %51 = dma.hbm_to_vmem [thread:$0]  %s5224_s1, 112, %s49_s24, [#allocation3]  }
  0x7f   :  { %s4172_s30 = smov [#allocation6]   ;;  %s4173_s14 = smov [#allocation9]  }
  0x80   :  { %s72_s16 = sshll.u32 %s4172_s30, 4  ;;  %s96_s6 = sshll.u32 %s4173_s14, 4  ;;  %s73_s16 = int_to_ptr.vmem [resolvable:$true] %s72_s16  ;;  %s97_s6 = int_to_ptr.vmem [resolvable:$true] %s96_s6 }
  0x81   :  { %s4016_s0 = scalar_lea.hbm %s5194_s7, 16 }
  0x82   :  { %p4017_p6 = scmp.ne.s32.totalorder %s5194_s7, %s4016_s0  ;;  %p4020_p7 = scmp.lt.u32.totalorder %s4016_s0, %s5194_s7 }
  0x84   :  { %p4022_p8 = pnand %p4020_p7, %p4017_p6 }
  0x86   :  { %4025 = shalt.err (!%p4022_p8)
}
  0x87   :  { %s4026_s24 = scalar_lea.vmem %s73_s16, 16  ;;  %s4030_s1 = scalar_lea.vmem %s73_s16, 32 }
  0x88   :  { %p4027_p9 = scmp.ne.s32.totalorder %s73_s16, %s4026_s24  ;;  %p4031_p10 = scmp.lt.s32.totalorder %s73_s16, %s73_s16 }
  0x89   :  { %p4032_p11 = scmp.lt.s32.totalorder %s4030_s1, %s4026_s24 }
  0x8b   :  { %p4033_p12 = por %p4032_p11, %p4031_p10 }
  0x8d   :  { %p4034_p13 = pnand %p4033_p12, %p4027_p9 }
  0x8f   :  { %4037 = shalt.err (!%p4034_p13)
}
  0x90   :  { %75 = dma.hbm_to_vmem [thread:$0]  %s5194_s7, 16, %s73_s16, [#allocation5]  }
  0x91   :  { %s4038_s17 = scalar_lea.hbm %s5198_s11, 16 }
  0x92   :  { %p4039_p0 = scmp.ne.s32.totalorder %s5198_s11, %s4038_s17  ;;  %p4042_p1 = scmp.lt.u32.totalorder %s4038_s17, %s5198_s11 }
  0x94   :  { %p4044_p2 = pnand %p4042_p1, %p4039_p0 }
  0x96   :  { %4047 = shalt.err (!%p4044_p2)
}
  0x97   :  { %s4048_s12 = scalar_lea.vmem %s97_s6, 16  ;;  %s4052_s0 = scalar_lea.vmem %s97_s6, 32 }
  0x98   :  { %p4049_p3 = scmp.ne.s32.totalorder %s97_s6, %s4048_s12  ;;  %p4053_p4 = scmp.lt.s32.totalorder %s97_s6, %s97_s6 }
  0x99   :  { %p4054_p5 = scmp.lt.s32.totalorder %s4052_s0, %s4048_s12 }
  0x9b   :  { %p4055_p6 = por %p4054_p5, %p4053_p4 }
  0x9d   :  { %p4056_p7 = pnand %p4055_p6, %p4049_p3 }
  0x9f   :  { %4059 = shalt.err (!%p4056_p7)
}
  0xa0   :  { %99 = dma.hbm_to_vmem [thread:$0]  %s5198_s11, 16, %s97_s6, [#allocation8]  }
  0xa1   :  { %s4174_s23 = smov [#allocation12]   ;;  %s4175_s29 = smov [#allocation15]  }
  0xa2   :  { %s116_s5 = sshll.u32 %s4174_s23, 4  ;;  %s137_s28 = sshll.u32 %s4175_s29, 4  ;;  %s117_s5 = int_to_ptr.vmem [resolvable:$true] %s116_s5  ;;  %s4397_s28 = int_to_ptr.vmem [resolvable:$true] %s137_s28 }
  0xa3   :  { %s4060_s4 = scalar_lea.hbm %s5200_s13, 16 }
  0xa4   :  { %p4061_p8 = scmp.ne.s32.totalorder %s5200_s13, %s4060_s4  ;;  %p4064_p9 = scmp.lt.u32.totalorder %s4060_s4, %s5200_s13 }
  0xa6   :  { %p4066_p10 = pnand %p4064_p9, %p4061_p8 }
  0xa8   :  { %4069 = shalt.err (!%p4066_p10)
}
  0xa9   :  { %s4070_s11 = scalar_lea.vmem %s117_s5, 16  ;;  %s4074_s6 = scalar_lea.vmem %s117_s5, 32 }
  0xaa   :  { %p4071_p11 = scmp.ne.s32.totalorder %s117_s5, %s4070_s11  ;;  %p4075_p12 = scmp.lt.s32.totalorder %s117_s5, %s117_s5 }
  0xab   :  { %p4076_p13 = scmp.lt.s32.totalorder %s4074_s6, %s4070_s11 }
  0xad   :  { %p4077_p0 = por %p4076_p13, %p4075_p12 }
  0xaf   :  { %p4078_p1 = pnand %p4077_p0, %p4071_p11 }
  0xb1   :  { %4081 = shalt.err (!%p4078_p1)
}
  0xb2   :  { %119 = dma.hbm_to_vmem [thread:$0]  %s5200_s13, 16, %s117_s5, [#allocation11]  }
  0xb3   :  { %s4082_s12 = scalar_lea.hbm %s5202_s15, 1024 }
  0xb4   :  { %p4083_p2 = scmp.ne.s32.totalorder %s5202_s15, %s4082_s12  ;;  %p4086_p3 = scmp.lt.u32.totalorder %s4082_s12, %s5202_s15 }
  0xb6   :  { %p4088_p4 = pnand %p4086_p3, %p4083_p2 }
  0xb8   :  { %4091 = shalt.err (!%p4088_p4)
}
  0xb9   :  { %s4092_s29 = scalar_lea.vmem %s4397_s28, 1024  ;;  %p4097_p6 = scmp.lt.s32.totalorder %s4397_s28, %s4397_s28 }
  0xba   :  { %p4093_p5 = scmp.ne.s32.totalorder %s4397_s28, %s4092_s29  ;;  %p4098_p7 = scmp.lt.s32.totalorder %s4092_s29, %s4092_s29 }
  0xbc   :  { %p4099_p8 = por %p4098_p7, %p4097_p6 }
  0xbe   :  { %p4100_p9 = pnand %p4099_p8, %p4093_p5 }
  0xc0   :  { %4103 = shalt.err (!%p4100_p9)
}
  0xc1   :  { %143 = dma.hbm_to_vmem [thread:$0]  %s5202_s15, 1024, %s4397_s28, [#allocation14], %s4163_s25, %s4163_s25, %s4164_s26  }
  0xc2   :  { %s4176_s24 = smov [#allocation18]   ;;  %s4177_s4 = smov [#allocation19]  }
  0xc3   :  { %s166_s1 = sshll.u32 %s4176_s24, 4  ;;  %s176_s2 = sshll.u32 %s4177_s4, 4  ;;  %s167_s1 = int_to_ptr.vmem [resolvable:$true] %s166_s1  ;;  %s177_s2 = int_to_ptr.vmem [resolvable:$true] %s176_s2 }
  0xc4   :  { %s4104_s17 = scalar_lea.hbm %s5207_s20, 16 }
  0xc5   :  { %p4105_p10 = scmp.ne.s32.totalorder %s5207_s20, %s4104_s17  ;;  %p4108_p11 = scmp.lt.u32.totalorder %s4104_s17, %s5207_s20 }
  0xc7   :  { %p4110_p12 = pnand %p4108_p11, %p4105_p10 }
  0xc9   :  { %4113 = shalt.err (!%p4110_p12)
}
  0xca   :  { %s4114_s15 = scalar_lea.vmem %s167_s1, 16  ;;  %s4118_s25 = scalar_lea.vmem %s167_s1, 32 }
  0xcb   :  { %p4115_p13 = scmp.ne.s32.totalorder %s167_s1, %s4114_s15  ;;  %p4119_p0 = scmp.lt.s32.totalorder %s167_s1, %s167_s1 }
  0xcc   :  { %p4120_p1 = scmp.lt.s32.totalorder %s4118_s25, %s4114_s15 }
  0xce   :  { %p4121_p2 = por %p4120_p1, %p4119_p0 }
  0xd0   :  { %p4122_p3 = pnand %p4121_p2, %p4115_p13 }
  0xd2   :  { %4125 = shalt.err (!%p4122_p3)
}
  0xd3   :  { %169 = dma.hbm_to_vmem [thread:$0]  %s5207_s20, 16, %s167_s1, [#allocation17]  }
  0xd4   :  { %s4126_s12 = scalar_lea.hbm %s5208_s21, 16 }
  0xd5   :  { %p4127_p4 = scmp.ne.s32.totalorder %s5208_s21, %s4126_s12  ;;  %p4130_p5 = scmp.lt.u32.totalorder %s4126_s12, %s5208_s21 }
  0xd7   :  { %p4132_p6 = pnand %p4130_p5, %p4127_p4 }
  0xd9   :  { %4135 = shalt.err (!%p4132_p6)
}
  0xda   :  { %s4136_s29 = scalar_lea.vmem %s177_s2, 16  ;;  %s4140_s13 = scalar_lea.vmem %s177_s2, 32 }
  0xdb   :  { %p4137_p7 = scmp.ne.s32.totalorder %s177_s2, %s4136_s29  ;;  %p4141_p8 = scmp.lt.s32.totalorder %s177_s2, %s177_s2 }
  0xdc   :  { %p4142_p9 = scmp.lt.s32.totalorder %s4140_s13, %s4136_s29 }
  0xde   :  { %p4143_p10 = por %p4142_p9, %p4141_p8 }
  0xe0   :  { %p4144_p11 = pnand %p4143_p10, %p4137_p7 }
  0xe2   :  { %4147 = shalt.err (!%p4144_p11)
}
  0xe3   :  { %179 = dma.hbm_to_vmem [thread:$0]  %s5208_s21, 16, %s177_s2, [#allocation20]  }
  0xe4   :  { %4148 = dma.done.wait [#allocation3], 112  }
  0xe5   :  { %4149 = vsyncadd [#allocation3], 4294967184 }
  0xe6   :  { %4150 = dma.done.wait [#allocation5], 6416  }
  0xe7   :  { %4151 = vsyncadd [#allocation5], 4294960880 }
  0xe8   :  { %4152 = dma.done.wait [#allocation8], 80  }
  0xe9   :  { %4153 = vsyncadd [#allocation8], 4294967216 }
  0xea   :  { %4154 = dma.done.wait [#allocation11], 144  }
  0xeb   :  { %4155 = vsyncadd [#allocation11], 4294967152 }
  0xec   :  { %4156 = dma.done.wait [#allocation14], 1280  }
  0xed   :  { %4157 = vsyncadd [#allocation14], 4294966016 }
  0xee   :  { %4158 = dma.done.wait [#allocation17], 32  }
  0xef   :  { %4159 = vsyncadd [#allocation17], 4294967264 }
  0xf0   :  { %4160 = dma.done.wait [#allocation20], 16  }
  0xf1   :  { %4161 = vsyncadd [#allocation20], 4294967280  ;;  %s5225_s4 = sld [smem:[#allocation30_spill]]  ;;  %v4178_v36 = vmov 1983009808   ;;  %v423_v38 = vlaneseq  ;;  %s5226_s22 = sld [smem:[#allocation28_spill]] }
  0xf2   :  { %v421_v37 = vunpack.c.l.s4 %v4178_v36  ;;  %vm1339_vm0 = vcmask 130048   ;;  %s5228_s7 = sld [smem:[#allocation29_spill]]  ;;  %vm4181_vm1 = vmmov 0   ;;  %vm2191_vm2 = vcmask 261120   ;;  %s5229_s17 = sld [smem:[#allocation34_spill]] }
  0xf3   :  { %v4572_v43 = vshrl.u32 %v423_v38, 7  ;;  %vm2463_vm3 = vcmask 1043456   ;;  %vm2459_vm4 = vcmask 31744   ;;  %vm2628_vm5 = vcmask 64512   ;;  %s5230_s16 = sld [smem:[#allocation35_spill]]  ;;  %s5231_s29 = sld [smem:[#allocation36_spill]] }
  0xf4   :  { %v422_v42 = vunpack.c.0.s8 %v421_v37  ;;  %vm2938_vm6 = vcmask 523264  }
  0xf6   :  { %v425_v49 = vsub.s32 %v422_v42, %v4572_v43 }
  0xf7   :  { %v3564_v0 = vld [vmem:[%s5225_s4 + $0x4] ss:$28 sps:$4 sm:$0xff]   ;;  %v3566_v1 = vld [vmem:[%s5225_s4 + $0xc] ss:$28 sps:$4 sm:$0xff]   ;;  %v3570_v4 = vld [vmem:[%s5225_s4 + $0x3c] ss:$28 sps:$4 sm:$0xff]  }
  0xf8   :  { %1343 = vmatprep.subr.bf16.mxu0 %v3564_v0  ;;  %v3568_v2 = vld [vmem:[%s5225_s4] ss:$28 sps:$4 sm:$0xff]   ;;  %v3569_v3 = vld [vmem:[%s5225_s4 + $0x8] ss:$28 sps:$4 sm:$0xff]   ;;  %1425 = vmatprep.subr.bf16.mxu1 %v3566_v1  ;;  %v3574_v6 = vld [vmem:[%s5225_s4 + $0x38] ss:$28 sps:$4 sm:$0xff]  }
  0xf9   :  { %1344 = vmatpush1.bf16.msra.mxu0 %v3568_v2  ;;  %1426 = vmatpush1.bf16.msra.mxu1 %v3569_v3  ;;  %v3572_v5 = vld [vmem:[%s5225_s4 + $0x44] ss:$28 sps:$4 sm:$0xff]   ;;  %v3576_v8 = vld [vmem:[%s5225_s4 + $0x74] ss:$28 sps:$4 sm:$0xff]   ;;  %v3578_v9 = vld [vmem:[%s5225_s4 + $0x7c] ss:$28 sps:$4 sm:$0xff]  }
  0xfa   :  { %1345 = vmatprep.subr.bf16.mxu0 %v3570_v4  ;;  %v3575_v7 = vld [vmem:[%s5225_s4 + $0x40] ss:$28 sps:$4 sm:$0xff]   ;;  %1427 = vmatprep.subr.bf16.mxu1 %v3572_v5  ;;  %v3580_v10 = vld [vmem:[%s5225_s4 + $0x70] ss:$28 sps:$4 sm:$0xff]   ;;  %v3581_v11 = vld [vmem:[%s5225_s4 + $0x78] ss:$28 sps:$4 sm:$0xff]  }
  0xfb   :  { %v3582_v12 = vld [vmem:[%s5225_s4 + $0xac] ss:$28 sps:$4 sm:$0xff]   ;;  %v3584_v13 = vld [vmem:[%s5225_s4 + $0xb4] ss:$28 sps:$4 sm:$0xff]   ;;  %v3588_v16 = vld [vmem:[%s5225_s4 + $0xe4] ss:$28 sps:$4 sm:$0xff]  }
  0xfc   :  { %v3586_v14 = vld [vmem:[%s5225_s4 + $0xa8] ss:$28 sps:$4 sm:$0xff]   ;;  %v3587_v15 = vld [vmem:[%s5225_s4 + $0xb0] ss:$28 sps:$4 sm:$0xff]   ;;  %v3592_v18 = vld [vmem:[%s5225_s4 + $0xe0] ss:$28 sps:$4 sm:$0xff]  }
  0xfd   :  { %1346 = vmatpush1.bf16.msra.mxu0 %v3574_v6  ;;  %1428 = vmatpush1.bf16.msra.mxu1 %v3575_v7  ;;  %v3590_v17 = vld [vmem:[%s5225_s4 + $0xec] ss:$28 sps:$4 sm:$0xff]   ;;  %v3594_v20 = vld [vmem:[%s5225_s4 + $0x11c] ss:$28 sps:$4 sm:$0xff]   ;;  %v3596_v21 = vld [vmem:[%s5225_s4 + $0x124] ss:$28 sps:$4 sm:$0xff]  }
  0xfe   :  { %1347 = vmatprep.subr.bf16.mxu0 %v3576_v8  ;;  %1429 = vmatprep.subr.bf16.mxu1 %v3578_v9  ;;  %v3593_v19 = vld [vmem:[%s5225_s4 + $0xe8] ss:$28 sps:$4 sm:$0xff]   ;;  %v3598_v22 = vld [vmem:[%s5225_s4 + $0x118] ss:$28 sps:$4 sm:$0xff]   ;;  %v3599_v23 = vld [vmem:[%s5225_s4 + $0x120] ss:$28 sps:$4 sm:$0xff]  }
  0xff   :  { %v3600_v24 = vld [vmem:[%s5225_s4 + $0x154] ss:$28 sps:$4 sm:$0xff]   ;;  %v3602_v25 = vld [vmem:[%s5225_s4 + $0x15c] ss:$28 sps:$4 sm:$0xff]   ;;  %v3606_v28 = vld [vmem:[%s5225_s4 + $0x18c] ss:$28 sps:$4 sm:$0xff]  }
 0x100   :  { %v3604_v26 = vld [vmem:[%s5225_s4 + $0x150] ss:$28 sps:$4 sm:$0xff]   ;;  %v3605_v27 = vld [vmem:[%s5225_s4 + $0x158] ss:$28 sps:$4 sm:$0xff]   ;;  %v3610_v30 = vld [vmem:[%s5225_s4 + $0x188] ss:$28 sps:$4 sm:$0xff]  }
 0x101   :  { %1348 = vmatpush1.bf16.msra.mxu0 %v3580_v10  ;;  %1430 = vmatpush1.bf16.msra.mxu1 %v3581_v11  ;;  %v3608_v29 = vld [vmem:[%s5225_s4 + $0x194] ss:$28 sps:$4 sm:$0xff]   ;;  %v3612_v32 = vld [vmem:[%s5225_s4 + $0x1c4] ss:$28 sps:$4 sm:$0xff]   ;;  %v3614_v33 = vld [vmem:[%s5225_s4 + $0x1cc] ss:$28 sps:$4 sm:$0xff]  }
 0x102   :  { %1349 = vmatprep.subr.bf16.mxu0 %v3582_v12  ;;  %1431 = vmatprep.subr.bf16.mxu1 %v3584_v13  ;;  %v3611_v31 = vld [vmem:[%s5225_s4 + $0x190] ss:$28 sps:$4 sm:$0xff]   ;;  %v3616_v34 = vld [vmem:[%s5225_s4 + $0x1c0] ss:$28 sps:$4 sm:$0xff]   ;;  %v3617_v35 = vld [vmem:[%s5225_s4 + $0x1c8] ss:$28 sps:$4 sm:$0xff]  }
 0x103   :  { %v3618_v39 = vld [vmem:[%s5225_s4 + $0x1fc] ss:$28 sps:$4 sm:$0xff]   ;;  %v3620_v40 = vld [vmem:[%s5225_s4 + $0x204] ss:$28 sps:$4 sm:$0xff]   ;;  %v3624_v45 = vld [vmem:[%s5225_s4 + $0x234] ss:$28 sps:$4 sm:$0xff]  }
 0x104   :  { %v3622_v41 = vld [vmem:[%s5225_s4 + $0x1f8] ss:$28 sps:$4 sm:$0xff]   ;;  %v3623_v44 = vld [vmem:[%s5225_s4 + $0x200] ss:$28 sps:$4 sm:$0xff]   ;;  %v3628_v47 = vld [vmem:[%s5225_s4 + $0x230] ss:$28 sps:$4 sm:$0xff]  }
 0x105   :  { %1350 = vmatpush1.bf16.msra.mxu0 %v3586_v14  ;;  %1432 = vmatpush1.bf16.msra.mxu1 %v3587_v15  ;;  %v3626_v46 = vld [vmem:[%s5225_s4 + $0x23c] ss:$28 sps:$4 sm:$0xff]   ;;  %v3630_v50 = vld [vmem:[%s5225_s4 + $0x26c] ss:$28 sps:$4 sm:$0xff]   ;;  %v3632_v51 = vld [vmem:[%s5225_s4 + $0x274] ss:$28 sps:$4 sm:$0xff]  }
 0x106   :  { %1351 = vmatprep.subr.bf16.mxu0 %v3588_v16  ;;  %1433 = vmatprep.subr.bf16.mxu1 %v3590_v17  ;;  %v3629_v48 = vld [vmem:[%s5225_s4 + $0x238] ss:$28 sps:$4 sm:$0xff]   ;;  %v217_v52 = vld [vmem:[%s5226_s22] sm:$0xff]  ;;  %v3635_v55 = vld [vmem:[%s5225_s4 + $0x270] ss:$28 sps:$4 sm:$0xff]   ;;  %s5227_s22 = sld [smem:[#allocation31_spill]] }
 0x107   :  { %v3634_v53 = vld [vmem:[%s5225_s4 + $0x268] ss:$28 sps:$4 sm:$0xff]   ;;  %v4602_v54 = vrot.slane %v217_v52, %v425_v49  ;;  %v3640_v59 = vld [vmem:[%s5225_s4 + $0x2a0] ss:$28 sps:$4 sm:$0xff]   ;;  %v3646_v63 = vld [vmem:[%s5225_s4 + $0x2d8] ss:$28 sps:$4 sm:$0xff]   ;;  %v419_v7 = vcombine.high %v217_v52, %v217_v52 }
 0x108   :  { %v3636_v56 = vld [vmem:[%s5225_s4 + $0x2a4] ss:$28 sps:$4 sm:$0xff]   ;;  %v3638_v57 = vld [vmem:[%s5225_s4 + $0x2ac] ss:$28 sps:$4 sm:$0xff]   ;;  %v3642_v61 = vld [vmem:[%s5225_s4 + $0x2dc] ss:$28 sps:$4 sm:$0xff]  }
 0x109   :  { %1352 = vmatpush1.bf16.msra.mxu0 %v3592_v18  ;;  %1434 = vmatpush1.bf16.msra.mxu1 %v3593_v19  ;;  %v4615_v58 = vcombine.high %v4602_v54, %v4602_v54  ;;  %v3641_v60 = vld [vmem:[%s5225_s4 + $0x2a8] ss:$28 sps:$4 sm:$0xff]   ;;  %v3647_v0 = vld [vmem:[%s5225_s4 + $0x2e0] ss:$28 sps:$4 sm:$0xff]   ;;  %v3648_v1 = vld [vmem:[%s5225_s4 + $0x314] ss:$28 sps:$4 sm:$0xff]   ;;  %v4667_v12 = vrot.slane %v419_v7, %v425_v49 }
 0x10a   :  { %1353 = vmatprep.subr.bf16.mxu0 %v3594_v20  ;;  %1435 = vmatprep.subr.bf16.mxu1 %v3596_v21  ;;  %v3644_v62 = vld [vmem:[%s5225_s4 + $0x2e4] ss:$28 sps:$4 sm:$0xff]   ;;  %v3650_v2 = vld [vmem:[%s5225_s4 + $0x31c] ss:$28 sps:$4 sm:$0xff]   ;;  %v3652_v3 = vld [vmem:[%s5225_s4 + $0x310] ss:$28 sps:$4 sm:$0xff]  }
 0x10b   :  { %1375 = vmatprep.mubr.bf16.mxu0 %v4615_v58  ;;  %1457 = vmatprep.mubr.bf16.mxu1 %v4615_v58  ;;  %v3653_v4 = vld [vmem:[%s5225_s4 + $0x318] ss:$28 sps:$4 sm:$0xff]   ;;  %v3654_v5 = vld [vmem:[%s5225_s4 + $0x34c] ss:$28 sps:$4 sm:$0xff]   ;;  %v3662_v10 = vld [vmem:[%s5225_s4 + $0x384] ss:$28 sps:$4 sm:$0xff]   ;;  %v4683_v17 = vcombine.high %v4667_v12, %v4667_v12 }
 0x10c   :  { %v3656_v6 = vld [vmem:[%s5225_s4 + $0x354] ss:$28 sps:$4 sm:$0xff]   ;;  %v3658_v8 = vld [vmem:[%s5225_s4 + $0x348] ss:$28 sps:$4 sm:$0xff]   ;;  %v3660_v13 = vld [vmem:[%s5225_s4 + $0x380] ss:$28 sps:$4 sm:$0xff]  }
 0x10d   :  { %1354 = vmatpush1.bf16.msra.mxu0 %v3598_v22  ;;  %1436 = vmatpush1.bf16.msra.mxu1 %v3599_v23  ;;  %v3659_v9 = vld [vmem:[%s5225_s4 + $0x350] ss:$28 sps:$4 sm:$0xff]   ;;  %v3663_v14 = vld [vmem:[%s5225_s4 + $0x388] ss:$28 sps:$4 sm:$0xff]   ;;  %v3668_v15 = vld [vmem:[%s5225_s4 + $0x3bc] ss:$28 sps:$4 sm:$0xff]  }
 0x10e   :  { %1355 = vmatprep.subr.bf16.mxu0 %v3600_v24  ;;  %1437 = vmatprep.subr.bf16.mxu1 %v3602_v25  ;;  %v3665_v11 = vld [vmem:[%s5225_s4 + $0x38c] ss:$28 sps:$4 sm:$0xff]   ;;  %v3671_v16 = vld [vmem:[%s5225_s4 + $0x3c4] ss:$28 sps:$4 sm:$0xff]   ;;  %v3666_v18 = vld [vmem:[%s5225_s4 + $0x3b8] ss:$28 sps:$4 sm:$0xff]  }
 0x10f   :  { %v3669_v19 = vld [vmem:[%s5225_s4 + $0x3c0] ss:$28 sps:$4 sm:$0xff]   ;;  %v3674_v20 = vld [vmem:[%s5225_s4 + $0x3f4] ss:$28 sps:$4 sm:$0xff]   ;;  %v3680_v24 = vld [vmem:[%s5225_s4 + $0x42c] ss:$28 sps:$4 sm:$0xff]  }
 0x110   :  { %v3677_v21 = vld [vmem:[%s5225_s4 + $0x3fc] ss:$28 sps:$4 sm:$0xff]   ;;  %v3672_v22 = vld [vmem:[%s5225_s4 + $0x3f0] ss:$28 sps:$4 sm:$0xff]   ;;  %v3702_v42 = vld [vmem:[%s5225_s4 + $0x508] ss:$28 sps:$4 sm:$0xff]  }
 0x111   :  { %1356 = vmatpush1.bf16.msra.mxu0 %v3604_v26  ;;  %1438 = vmatpush1.bf16.msra.mxu1 %v3605_v27  ;;  %v3675_v23 = vld [vmem:[%s5225_s4 + $0x3f8] ss:$28 sps:$4 sm:$0xff]   ;;  %v3678_v26 = vld [vmem:[%s5225_s4 + $0x428] ss:$28 sps:$4 sm:$0xff]   ;;  %v3681_v27 = vld [vmem:[%s5225_s4 + $0x430] ss:$28 sps:$4 sm:$0xff]  }
 0x112   :  { %1357 = vmatprep.subr.bf16.mxu0 %v3606_v28  ;;  %1439 = vmatprep.subr.bf16.mxu1 %v3608_v29  ;;  %v3683_v25 = vld [vmem:[%s5225_s4 + $0x434] ss:$28 sps:$4 sm:$0xff]   ;;  %v3686_v28 = vld [vmem:[%s5225_s4 + $0x464] ss:$28 sps:$4 sm:$0xff]   ;;  %v3689_v29 = vld [vmem:[%s5225_s4 + $0x46c] ss:$28 sps:$4 sm:$0xff]  }
 0x113   :  { %v3698_v36 = vld [vmem:[%s5225_s4 + $0x4d4] ss:$28 sps:$4 sm:$0xff]   ;;  %v3701_v37 = vld [vmem:[%s5225_s4 + $0x4dc] ss:$28 sps:$4 sm:$0xff]   ;;  %v3720_v52 = vld [vmem:[%s5225_s4 + $0x4c] ss:$28 sps:$4 sm:$0xff]  }
 0x114   :  { %v3696_v38 = vld [vmem:[%s5225_s4 + $0x4d0] ss:$28 sps:$4 sm:$0xff]  }
 0x115   :  { %1358 = vmatpush1.bf16.msra.mxu0 %v3610_v30  ;;  %1440 = vmatpush1.bf16.msra.mxu1 %v3611_v31  ;;  %v3684_v30 = vld [vmem:[%s5225_s4 + $0x460] ss:$28 sps:$4 sm:$0xff]   ;;  %v3687_v31 = vld [vmem:[%s5225_s4 + $0x468] ss:$28 sps:$4 sm:$0xff]   ;;  %v3717_v49 = vld [vmem:[%s5225_s4 + $0x14] ss:$28 sps:$4 sm:$0xff]  }
 0x116   :  { %1359 = vmatprep.subr.bf16.mxu0 %v3612_v32  ;;  %1441 = vmatprep.subr.bf16.mxu1 %v3614_v33  ;;  %v3692_v32 = vld [vmem:[%s5225_s4 + $0x49c] ss:$28 sps:$4 sm:$0xff]   ;;  %v3695_v33 = vld [vmem:[%s5225_s4 + $0x4a4] ss:$28 sps:$4 sm:$0xff]   ;;  %v3746_v7 = vld [vmem:[%s5225_s4 + $0x2f0] ss:$28 sps:$4 sm:$0xff]  }
 0x119   :  { %1360 = vmatpush1.bf16.msra.mxu0 %v3616_v34  ;;  %1442 = vmatpush1.bf16.msra.mxu1 %v3617_v35  ;;  %v3690_v34 = vld [vmem:[%s5225_s4 + $0x498] ss:$28 sps:$4 sm:$0xff]   ;;  %v3693_v35 = vld [vmem:[%s5225_s4 + $0x4a0] ss:$28 sps:$4 sm:$0xff]  }
 0x11a   :  { %1361 = vmatprep.subr.bf16.mxu0 %v3618_v39  ;;  %1443 = vmatprep.subr.bf16.mxu1 %v3620_v40  ;;  %v3699_v39 = vld [vmem:[%s5225_s4 + $0x4d8] ss:$28 sps:$4 sm:$0xff]   ;;  %v3704_v40 = vld [vmem:[%s5225_s4 + $0x50c] ss:$28 sps:$4 sm:$0xff]  }
 0x11d   :  { %1362 = vmatpush1.bf16.msra.mxu0 %v3622_v41  ;;  %1444 = vmatpush1.bf16.msra.mxu1 %v3623_v44  ;;  %v3707_v41 = vld [vmem:[%s5225_s4 + $0x514] ss:$28 sps:$4 sm:$0xff]  }
 0x11e   :  { %1363 = vmatprep.subr.bf16.mxu0 %v3624_v45  ;;  %1445 = vmatprep.subr.bf16.mxu1 %v3626_v46  ;;  %v3705_v44 = vld [vmem:[%s5225_s4 + $0x510] ss:$28 sps:$4 sm:$0xff]   ;;  %v3710_v45 = vld [vmem:[%s5225_s4 + $0x544] ss:$28 sps:$4 sm:$0xff]  }
 0x11f   :  { %v3713_v46 = vld [vmem:[%s5225_s4 + $0x54c] ss:$28 sps:$4 sm:$0xff]  }
 0x121   :  { %1364 = vmatpush1.bf16.msra.mxu0 %v3628_v47  ;;  %1446 = vmatpush1.bf16.msra.mxu1 %v3629_v48  ;;  %v3708_v47 = vld [vmem:[%s5225_s4 + $0x540] ss:$28 sps:$4 sm:$0xff]   ;;  %v3711_v48 = vld [vmem:[%s5225_s4 + $0x548] ss:$28 sps:$4 sm:$0xff]  }
 0x122   :  { %1365 = vmatprep.subr.bf16.mxu0 %v3630_v50  ;;  %1447 = vmatprep.subr.bf16.mxu1 %v3632_v51  ;;  %v3721_v50 = vld [vmem:[%s5225_s4 + $0x1d8] ss:$28 sps:$4 sm:$0xff]   ;;  %v3715_v51 = vld [vmem:[%s5225_s4 + $0x10] ss:$28 sps:$4 sm:$0xff]  }
 0x125   :  { %1366 = vmatpush1.bf16.msra.mxu0 %v3634_v53  ;;  %1448 = vmatpush1.bf16.msra.mxu1 %v3635_v55  ;;  %v3725_v53 = vld [vmem:[%s5225_s4 + $0x18] ss:$28 sps:$4 sm:$0xff]   ;;  %v3726_v55 = vld [vmem:[%s5225_s4 + $0x210] ss:$28 sps:$4 sm:$0xff]  }
 0x126   :  { %1367 = vmatprep.subr.bf16.mxu0 %v3636_v56  ;;  %1449 = vmatprep.subr.bf16.mxu1 %v3638_v57  ;;  %v3718_v56 = vld [vmem:[%s5225_s4 + $0x48] ss:$28 sps:$4 sm:$0xff]  }
 0x127   :  { %v3724_v57 = vld [vmem:[%s5225_s4 + $0x84] ss:$28 sps:$4 sm:$0xff]  }
 0x129   :  { %1368 = vmatpush1.bf16.msra.mxu0 %v3640_v59  ;;  %1450 = vmatpush1.bf16.msra.mxu1 %v3641_v60  ;;  %v3730_v59 = vld [vmem:[%s5225_s4 + $0x50] ss:$28 sps:$4 sm:$0xff]   ;;  %v3731_v60 = vld [vmem:[%s5225_s4 + $0x248] ss:$28 sps:$4 sm:$0xff]  }
 0x12a   :  { %1369 = vmatprep.subr.bf16.mxu0 %v3642_v61  ;;  %1451 = vmatprep.subr.bf16.mxu1 %v3644_v62  ;;  %v3722_v61 = vld [vmem:[%s5225_s4 + $0x80] ss:$28 sps:$4 sm:$0xff]  }
 0x12b   :  { %v3729_v62 = vld [vmem:[%s5225_s4 + $0xbc] ss:$28 sps:$4 sm:$0xff]  }
 0x12d   :  { %1370 = vmatpush1.bf16.msra.mxu0 %v3646_v63  ;;  %1452 = vmatpush1.bf16.msra.mxu1 %v3647_v0  ;;  %v3735_v63 = vld [vmem:[%s5225_s4 + $0x88] ss:$28 sps:$4 sm:$0xff]   ;;  %v3736_v0 = vld [vmem:[%s5225_s4 + $0x280] ss:$28 sps:$4 sm:$0xff]  }
 0x12e   :  { %1371 = vmatprep.subr.bf16.mxu0 %v3648_v1  ;;  %1453 = vmatprep.subr.bf16.mxu1 %v3650_v2  ;;  %v3740_v1 = vld [vmem:[%s5225_s4 + $0xc0] ss:$28 sps:$4 sm:$0xff]   ;;  %v3734_v2 = vld [vmem:[%s5225_s4 + $0xf4] ss:$28 sps:$4 sm:$0xff]  }
 0x131   :  { %1372 = vmatpush1.bf16.msra.mxu0 %v3652_v3  ;;  %1454 = vmatpush1.bf16.msra.mxu1 %v3653_v4  ;;  %v3741_v3 = vld [vmem:[%s5225_s4 + $0x2b8] ss:$28 sps:$4 sm:$0xff]   ;;  %v3732_v4 = vld [vmem:[%s5225_s4 + $0xf0] ss:$28 sps:$4 sm:$0xff]  }
 0x132   :  { %1373 = vmatprep.subr.bf16.mxu0 %v3654_v5  ;;  %1455 = vmatprep.subr.bf16.mxu1 %v3656_v6  ;;  %v3739_v5 = vld [vmem:[%s5225_s4 + $0x12c] ss:$28 sps:$4 sm:$0xff]   ;;  %v3745_v6 = vld [vmem:[%s5225_s4 + $0xf8] ss:$28 sps:$4 sm:$0xff]  }
 0x135   :  { %1374 = vmatpush1.bf16.msra.mxu0 %v3658_v8  ;;  %1456 = vmatpush1.bf16.msra.mxu1 %v3659_v9  ;;  %v3737_v8 = vld [vmem:[%s5225_s4 + $0x128] ss:$28 sps:$4 sm:$0xff]  }
 0x136   :  { %1384 = vmatprep.subr.bf16.mxu0 %v3662_v10  ;;  %1466 = vmatprep.subr.bf16.mxu1 %v3665_v11  ;;  %v3744_v9 = vld [vmem:[%s5225_s4 + $0x164] ss:$28 sps:$4 sm:$0xff]   ;;  %v3750_v10 = vld [vmem:[%s5225_s4 + $0x130] ss:$28 sps:$4 sm:$0xff]  }
 0x137   :  { %v3751_v11 = vld [vmem:[%s5225_s4 + $0x328] ss:$28 sps:$4 sm:$0xff]  }
 0x138   :  { %1376 = vmatmul.mubr.bf16.vlgmr.msra.gmra.mrb[0].mxu0 %v4602_v54  ;;  %1458 = vmatmul.mubr.bf16.vlgmr.msra.gmra.mrb[0].mxu1 %v4602_v54 }
 0x139   :  { %1385 = vmatpush1.bf16.msra.mxu0 %v3660_v13  ;;  %1467 = vmatpush1.bf16.msra.mxu1 %v3663_v14  ;;  %v3742_v13 = vld [vmem:[%s5225_s4 + $0x160] ss:$28 sps:$4 sm:$0xff]  }
 0x13a   :  { %1386 = vmatprep.subr.bf16.mxu0 %v3668_v15  ;;  %1468 = vmatprep.subr.bf16.mxu1 %v3671_v16  ;;  %v3749_v14 = vld [vmem:[%s5225_s4 + $0x19c] ss:$28 sps:$4 sm:$0xff]   ;;  %v3755_v15 = vld [vmem:[%s5225_s4 + $0x168] ss:$28 sps:$4 sm:$0xff]  }
 0x13b   :  { %3188 = vmatprep.mubr.msk.bf16.mxu0 %vm1339_vm0, %v4683_v17  ;;  %3189 = vmatprep.mubr.msk.bf16.mxu1 %vm1339_vm0, %v4683_v17  ;;  %v3756_v16 = vld [vmem:[%s5225_s4 + $0x360] ss:$28 sps:$4 sm:$0xff]  }
 0x13d   :  { %1387 = vmatpush1.bf16.msra.mxu0 %v3666_v18  ;;  %1469 = vmatpush1.bf16.msra.mxu1 %v3669_v19  ;;  %v3747_v18 = vld [vmem:[%s5225_s4 + $0x198] ss:$28 sps:$4 sm:$0xff]   ;;  %v3760_v19 = vld [vmem:[%s5225_s4 + $0x1a0] ss:$28 sps:$4 sm:$0xff]  }
 0x13e   :  { %1388 = vmatprep.subr.bf16.mxu0 %v3674_v20  ;;  %1470 = vmatprep.subr.bf16.mxu1 %v3677_v21  ;;  %v3754_v20 = vld [vmem:[%s5225_s4 + $0x1d4] ss:$28 sps:$4 sm:$0xff]  }
 0x13f   :  { %v3752_v21 = vld [vmem:[%s5225_s4 + $0x1d0] ss:$28 sps:$4 sm:$0xff]  }
 0x141   :  { %1389 = vmatpush1.bf16.msra.mxu0 %v3672_v22  ;;  %1471 = vmatpush1.bf16.msra.mxu1 %v3675_v23  ;;  %v3764_v22 = vld [vmem:[%s5225_s4 + $0x398] ss:$28 sps:$4 sm:$0xff]   ;;  %v3759_v23 = vld [vmem:[%s5225_s4 + $0x20c] ss:$28 sps:$4 sm:$0xff]  }
 0x142   :  { %1390 = vmatprep.subr.bf16.mxu0 %v3680_v24  ;;  %1472 = vmatprep.subr.bf16.mxu1 %v3683_v25  ;;  %v4179_v24 = vmov 0   ;;  %v3757_v25 = vld [vmem:[%s5225_s4 + $0x208] ss:$28 sps:$4 sm:$0xff]  }
 0x145   :  { %1391 = vmatpush1.bf16.msra.mxu0 %v3678_v26  ;;  %1473 = vmatpush1.bf16.msra.mxu1 %v3681_v27  ;;  %v3768_v26 = vld [vmem:[%s5225_s4 + $0x3d0] ss:$28 sps:$4 sm:$0xff]   ;;  %v3763_v27 = vld [vmem:[%s5225_s4 + $0x244] ss:$28 sps:$4 sm:$0xff]  }
 0x146   :  { %1392 = vmatprep.subr.bf16.mxu0 %v3686_v28  ;;  %1474 = vmatprep.subr.bf16.mxu1 %v3689_v29  ;;  %v3761_v28 = vld [vmem:[%s5225_s4 + $0x240] ss:$28 sps:$4 sm:$0xff]   ;;  %v3772_v29 = vld [vmem:[%s5225_s4 + $0x408] ss:$28 sps:$4 sm:$0xff]  }
 0x149   :  { %1393 = vmatpush1.bf16.msra.mxu0 %v3684_v30  ;;  %1475 = vmatpush1.bf16.msra.mxu1 %v3687_v31  ;;  %v3767_v30 = vld [vmem:[%s5225_s4 + $0x27c] ss:$28 sps:$4 sm:$0xff]  }
 0x14a   :  { %1394 = vmatprep.subr.bf16.mxu0 %v3692_v32  ;;  %1476 = vmatprep.subr.bf16.mxu1 %v3695_v33  ;;  %v3765_v31 = vld [vmem:[%s5225_s4 + $0x278] ss:$28 sps:$4 sm:$0xff]   ;;  %v3776_v32 = vld [vmem:[%s5225_s4 + $0x440] ss:$28 sps:$4 sm:$0xff]  }
 0x14b   :  { %v3771_v33 = vld [vmem:[%s5225_s4 + $0x2b4] ss:$28 sps:$4 sm:$0xff]  }
 0x14d   :  { %1395 = vmatpush1.bf16.msra.mxu0 %v3690_v34  ;;  %1477 = vmatpush1.bf16.msra.mxu1 %v3693_v35  ;;  %v3769_v34 = vld [vmem:[%s5225_s4 + $0x2b0] ss:$28 sps:$4 sm:$0xff]   ;;  %v3780_v35 = vld [vmem:[%s5225_s4 + $0x478] ss:$28 sps:$4 sm:$0xff]  }
 0x14e   :  { %1396 = vmatprep.subr.bf16.mxu0 %v3698_v36  ;;  %1478 = vmatprep.subr.bf16.mxu1 %v3701_v37  ;;  %v3775_v36 = vld [vmem:[%s5225_s4 + $0x2ec] ss:$28 sps:$4 sm:$0xff]  }
 0x14f   :  { %v3773_v37 = vld [vmem:[%s5225_s4 + $0x2e8] ss:$28 sps:$4 sm:$0xff]  }
 0x151   :  { %1397 = vmatpush1.bf16.msra.mxu0 %v3696_v38  ;;  %1479 = vmatpush1.bf16.msra.mxu1 %v3699_v39  ;;  %v3784_v38 = vld [vmem:[%s5225_s4 + $0x4b0] ss:$28 sps:$4 sm:$0xff]   ;;  %v3779_v39 = vld [vmem:[%s5225_s4 + $0x324] ss:$28 sps:$4 sm:$0xff]  }
 0x152   :  { %1398 = vmatprep.subr.bf16.mxu0 %v3704_v40  ;;  %1480 = vmatprep.subr.bf16.mxu1 %v3707_v41  ;;  %v3777_v40 = vld [vmem:[%s5225_s4 + $0x320] ss:$28 sps:$4 sm:$0xff]   ;;  %v3788_v41 = vld [vmem:[%s5225_s4 + $0x4e8] ss:$28 sps:$4 sm:$0xff]  }
 0x155   :  { %1399 = vmatpush1.bf16.msra.mxu0 %v3702_v42  ;;  %1481 = vmatpush1.bf16.msra.mxu1 %v3705_v44  ;;  %v3783_v42 = vld [vmem:[%s5225_s4 + $0x35c] ss:$28 sps:$4 sm:$0xff]  }
 0x156   :  { %1400 = vmatprep.subr.bf16.mxu0 %v3710_v45  ;;  %1482 = vmatprep.subr.bf16.mxu1 %v3713_v46  ;;  %v3781_v44 = vld [vmem:[%s5225_s4 + $0x358] ss:$28 sps:$4 sm:$0xff]   ;;  %v3792_v45 = vld [vmem:[%s5225_s4 + $0x520] ss:$28 sps:$4 sm:$0xff]  }
 0x157   :  { %v3787_v46 = vld [vmem:[%s5225_s4 + $0x394] ss:$28 sps:$4 sm:$0xff]  }
 0x159   :  { %1401 = vmatpush1.bf16.msra.mxu0 %v3708_v47  ;;  %1483 = vmatpush1.bf16.msra.mxu1 %v3711_v48  ;;  %v3785_v47 = vld [vmem:[%s5225_s4 + $0x390] ss:$28 sps:$4 sm:$0xff]   ;;  %v3796_v48 = vld [vmem:[%s5225_s4 + $0x558] ss:$28 sps:$4 sm:$0xff]  }
 0x15a   :  { %1507 = vmatprep.subr.bf16.mxu0 %v3717_v49  ;;  %3270 = vmatprep.subr.bf16.mxu1 %v3721_v50  ;;  %v3791_v49 = vld [vmem:[%s5225_s4 + $0x3cc] ss:$28 sps:$4 sm:$0xff]  }
 0x15b   :  { %v3815_v50 = vld [vmem:[#allocation4 + $0x40] sm:$0xff]  }
 0x15c   :  { %1417 = vmatmul.mubr.bf16.vlgmr.msra.gmra.mrb[0].mxu0 %v4667_v12  ;;  %1499 = vmatmul.mubr.bf16.vlgmr.msra.gmra.mrb[0].mxu1 %v4667_v12 }
 0x15d   :  { %1508 = vmatpush1.bf16.msra.mxu0 %v3715_v51  ;;  %3271 = vmatpush3.bf16.msra.mxu1 %v3725_v53  ;;  %v3789_v51 = vld [vmem:[%s5225_s4 + $0x3c8] ss:$28 sps:$4 sm:$0xff]  }
 0x15e   :  { %1509 = vmatprep.subr.bf16.mxu0 %v3720_v52  ;;  %3272 = vmatprep.subr.bf16.mxu1 %v3726_v55  ;;  %v3817_v52 = vld [vmem:[#allocation4] sm:$0xff]   ;;  %v3795_v53 = vld [vmem:[%s5225_s4 + $0x404] ss:$28 sps:$4 sm:$0xff]   ;;  %v3819_v55 = vld [vmem:[#allocation4 + $0x48] sm:$0xff]  }
 0x15f   :  { %1621 = vmatprep.mubr.bf16.mxu1 %v4615_v58  ;;  %1539 = vmatprep.mubr.bf16.mxu0 %v4615_v58  ;;  %v3727_v58 = vld [vmem:[%s5225_s4 + $0xb8] ss:$28 sps:$4 sm:$0xff]  }
 0x161   :  { %1510 = vmatpush1.bf16.msra.mxu0 %v3718_v56  ;;  %3273 = vmatpush3.bf16.msra.mxu1 %v3730_v59  ;;  %v3793_v56 = vld [vmem:[%s5225_s4 + $0x400] ss:$28 sps:$4 sm:$0xff]  }
 0x162   :  { %1511 = vmatprep.subr.bf16.mxu0 %v3724_v57  ;;  %3274 = vmatprep.subr.bf16.mxu1 %v3731_v60  ;;  %v3821_v57 = vld [vmem:[#allocation4 + $0x8] sm:$0xff]   ;;  %v3823_v59 = vld [vmem:[#allocation4 + $0x50] sm:$0xff]  }
 0x163   :  { %v3825_v60 = vld [vmem:[#allocation4 + $0x10] sm:$0xff]  }
 0x165   :  { %1512 = vmatpush1.bf16.msra.mxu0 %v3722_v61  ;;  %3275 = vmatpush3.bf16.msra.mxu1 %v3735_v63  ;;  %v3802_v61 = vld [vmem:[%s5225_s4 + $0x474] ss:$28 sps:$4 sm:$0xff]  }
 0x166   :  { %1513 = vmatprep.subr.bf16.mxu0 %v3729_v62  ;;  %3276 = vmatprep.subr.bf16.mxu1 %v3736_v0  ;;  %v3827_v62 = vld [vmem:[#allocation4 + $0x58] sm:$0xff]   ;;  %v3800_v63 = vld [vmem:[%s5225_s4 + $0x470] ss:$28 sps:$4 sm:$0xff]  }
 0x167   :  { %v3829_v0 = vld [vmem:[#allocation4 + $0x18] sm:$0xff]  }
 0x169   :  { %1514 = vmatpush1.bf16.msra.mxu0 %v3727_v58  ;;  %3277 = vmatpush3.bf16.msra.mxu1 %v3740_v1  ;;  %v3805_v58 = vld [vmem:[%s5225_s4 + $0x4ac] ss:$28 sps:$4 sm:$0xff]  }
 0x16a   :  { %1515 = vmatprep.subr.bf16.mxu0 %v3734_v2  ;;  %3278 = vmatprep.subr.bf16.mxu1 %v3741_v3  ;;  %v3831_v1 = vld [vmem:[#allocation4 + $0x60] sm:$0xff]  }
 0x16b   :  { %v3803_v2 = vld [vmem:[%s5225_s4 + $0x4a8] ss:$28 sps:$4 sm:$0xff]  }
 0x16c   :  { %v3833_v3 = vld [vmem:[#allocation4 + $0x20] sm:$0xff]  }
 0x16d   :  { %1516 = vmatpush1.bf16.msra.mxu0 %v3732_v4  ;;  %3279 = vmatpush3.bf16.msra.mxu1 %v3745_v6  ;;  %v3808_v4 = vld [vmem:[%s5225_s4 + $0x4e4] ss:$28 sps:$4 sm:$0xff]  }
 0x16e   :  { %1517 = vmatprep.subr.bf16.mxu0 %v3739_v5  ;;  %3280 = vmatprep.subr.bf16.mxu1 %v3746_v7  ;;  %v3835_v5 = vld [vmem:[#allocation4 + $0x68] sm:$0xff]   ;;  %v3806_v6 = vld [vmem:[%s5225_s4 + $0x4e0] ss:$28 sps:$4 sm:$0xff]  }
 0x16f   :  { %v3837_v7 = vld [vmem:[#allocation4 + $0x28] sm:$0xff]  }
 0x171   :  { %1518 = vmatpush1.bf16.msra.mxu0 %v3737_v8  ;;  %3281 = vmatpush3.bf16.msra.mxu1 %v3750_v10  ;;  %v3811_v8 = vld [vmem:[%s5225_s4 + $0x51c] ss:$28 sps:$4 sm:$0xff]  }
 0x172   :  { %1519 = vmatprep.subr.bf16.mxu0 %v3744_v9  ;;  %3282 = vmatprep.subr.bf16.mxu1 %v3751_v11  ;;  %v3839_v9 = vld [vmem:[#allocation4 + $0x70] sm:$0xff]  }
 0x173   :  { %v3809_v10 = vld [vmem:[%s5225_s4 + $0x518] ss:$28 sps:$4 sm:$0xff]  }
 0x174   :  { %v3841_v11 = vld [vmem:[#allocation4 + $0x30] sm:$0xff]  }
 0x175   :  { %1520 = vmatpush1.bf16.msra.mxu0 %v3742_v13  ;;  %3283 = vmatpush3.bf16.msra.mxu1 %v3755_v15  ;;  %v3814_v13 = vld [vmem:[%s5225_s4 + $0x554] ss:$28 sps:$4 sm:$0xff]  }
 0x176   :  { %1521 = vmatprep.subr.bf16.mxu0 %v3749_v14  ;;  %3284 = vmatprep.subr.bf16.mxu1 %v3756_v16  ;;  %v3843_v14 = vld [vmem:[#allocation4 + $0x78] sm:$0xff]   ;;  %v3812_v15 = vld [vmem:[%s5225_s4 + $0x550] ss:$28 sps:$4 sm:$0xff]  }
 0x177   :  { %v3845_v16 = vld [vmem:[#allocation4 + $0x38] sm:$0xff]  }
 0x179   :  { %1522 = vmatpush1.bf16.msra.mxu0 %v3747_v18  ;;  %3285 = vmatpush3.bf16.msra.mxu1 %v3760_v19  ;;  %v3816_v18 = vld [vmem:[#allocation4 + $0xc0] sm:$0xff]  }
 0x17a   :  { %1523 = vmatprep.subr.bf16.mxu0 %v3754_v20  ;;  %1629 = vmatprep.subr.bf16.mxu1 %v4179_v24  ;;  %v3818_v19 = vld [vmem:[#allocation4 + $0x80] sm:$0xff]   ;;  %v3820_v20 = vld [vmem:[#allocation4 + $0xc8] sm:$0xff]  }
 0x17c   :  { %1622 = vmatmul.mubr.bf16.vlgmr.msra.gmra.mrb[4].mxu1 %v4602_v54 }
 0x17d   :  { %1524 = vmatpush1.bf16.msra.mxu0 %v3752_v21  ;;  %1630 = vmatpush1.bf16.msra.mxu1 %v3764_v22  ;;  %v3822_v21 = vld [vmem:[#allocation4 + $0x88] sm:$0xff]   ;;  %v3824_v22 = vld [vmem:[#allocation4 + $0xd0] sm:$0xff]  }
 0x17e   :  { %1525 = vmatprep.subr.bf16.mxu0 %v3759_v23  ;;  %1631 = vmatprep.subr.bf16.mxu1 %v4179_v24  ;;  %v3826_v23 = vld [vmem:[#allocation4 + $0x90] sm:$0xff]  }
 0x17f   :  { %3191 = vmatprep.mubr.msk.bf16.mxu1 %vm1339_vm0, %v4683_v17 }
 0x181   :  { %1526 = vmatpush1.bf16.msra.mxu0 %v3757_v25  ;;  %1632 = vmatpush1.bf16.msra.mxu1 %v3768_v26  ;;  %v3830_v25 = vld [vmem:[#allocation4 + $0x98] sm:$0xff]   ;;  %v3832_v26 = vld [vmem:[#allocation4 + $0xe0] sm:$0xff]  }
 0x182   :  { %1527 = vmatprep.subr.bf16.mxu0 %v3763_v27  ;;  %1633 = vmatprep.subr.bf16.mxu1 %v4179_v24  ;;  %v3834_v27 = vld [vmem:[#allocation4 + $0xa0] sm:$0xff]  }
 0x185   :  { %1528 = vmatpush1.bf16.msra.mxu0 %v3761_v28  ;;  %1634 = vmatpush1.bf16.msra.mxu1 %v3772_v29  ;;  %v3836_v28 = vld [vmem:[#allocation4 + $0xe8] sm:$0xff]  }
 0x186   :  { %1529 = vmatprep.subr.bf16.mxu0 %v3767_v30  ;;  %1635 = vmatprep.subr.bf16.mxu1 %v4179_v24  ;;  %v3838_v29 = vld [vmem:[#allocation4 + $0xa8] sm:$0xff]   ;;  %v3842_v30 = vld [vmem:[#allocation4 + $0xb0] sm:$0xff]  }
 0x189   :  { %1530 = vmatpush1.bf16.msra.mxu0 %v3765_v31  ;;  %1636 = vmatpush1.bf16.msra.mxu1 %v3776_v32  ;;  %v3844_v31 = vld [vmem:[#allocation4 + $0xf8] sm:$0xff]  }
 0x18a   :  { %1531 = vmatprep.subr.bf16.mxu0 %v3771_v33  ;;  %1637 = vmatprep.subr.bf16.mxu1 %v4179_v24  ;;  %v3846_v32 = vld [vmem:[#allocation4 + $0xb8] sm:$0xff]   ;;  %v3849_v33 = vld [vmem:[#allocation4 + $0x140] sm:$0xff]  }
 0x18d   :  { %1532 = vmatpush1.bf16.msra.mxu0 %v3769_v34  ;;  %1638 = vmatpush1.bf16.msra.mxu1 %v3780_v35  ;;  %v4180_v34 = vmov 0.0   ;;  %v1673_v35 = vsub.s32 0, %v4572_v43 }
 0x18e   :  { %1533 = vmatprep.subr.bf16.mxu0 %v3775_v36  ;;  %1639 = vmatprep.subr.bf16.mxu1 %v4179_v24  ;;  %v1681_v36 = vsub.s32 2, %v4572_v43 }
 0x191   :  { %1534 = vmatpush1.bf16.msra.mxu0 %v3773_v37  ;;  %1640 = vmatpush1.bf16.msra.mxu1 %v3784_v38  ;;  %v5024_v37 = vld [vmem:[%s5227_s22] sm:$0x7f]  ;;  %v1677_v38 = vsub.s32 1, %v4572_v43 }
 0x192   :  { %1535 = vmatprep.subr.bf16.mxu0 %v3779_v39  ;;  %1641 = vmatprep.subr.bf16.mxu1 %v4179_v24  ;;  %v1685_v39 = vsub.s32 3, %v4572_v43 }
 0x195   :  { %1536 = vmatpush1.bf16.msra.mxu0 %v3777_v40  ;;  %1642 = vmatpush1.bf16.msra.mxu1 %v3788_v41  ;;  %v5028_v40 = vld [vmem:[#allocation2] sm:$0x7f]  ;;  %v1674_v41 = vrot.slane %v5024_v37, %v1673_v35 }
 0x196   :  { %1537 = vmatprep.subr.bf16.mxu0 %v3783_v42  ;;  %1643 = vmatprep.subr.bf16.mxu1 %v4179_v24  ;;  %v1682_v42 = vrot.slane %v5024_v37, %v1681_v36 }
 0x199   :  { %1538 = vmatpush1.bf16.msra.mxu0 %v3781_v44  ;;  %1644 = vmatpush1.bf16.msra.mxu1 %v3792_v45  ;;  %v1678_v44 = vrot.slane %v5024_v37, %v1677_v38  ;;  %v1686_v45 = vrot.slane %v5024_v37, %v1685_v39 }
 0x19a   :  { %1548 = vmatprep.subr.bf16.mxu0 %v3787_v46  ;;  %1645 = vmatprep.subr.bf16.mxu1 %v4179_v24  ;;  %v3828_v24 = vld [vmem:[#allocation4 + $0xd8] sm:$0xff]   ;;  %v1718_v46 = vrot.slane %v5028_v40, %v1673_v35  ;;  %v3862_v35 = vld [vmem:[#allocation4 + $0x130] sm:$0xff]  }
 0x19c   :  { %1540 = vmatmul.mubr.bf16.vlgmr.msra.gmra.mrb[4].mxu0 %v4602_v54  ;;  %v3799_v54 = vld [vmem:[%s5225_s4 + $0x43c] ss:$28 sps:$4 sm:$0xff]  }
 0x19d   :  { %1549 = vmatpush1.bf16.msra.mxu0 %v3785_v47  ;;  %1646 = vmatpush1.bf16.msra.mxu1 %v3796_v48  ;;  %v1726_v47 = vrot.slane %v5028_v40, %v1681_v36 }
 0x19e   :  { %1550 = vmatprep.subr.bf16.mxu0 %v3791_v49  ;;  %3190 = vmatprep.mubr.msk.bf16.mxu0 %vm1339_vm0, %v4683_v17  ;;  %v3797_v17 = vld [vmem:[%s5225_s4 + $0x438] ss:$28 sps:$4 sm:$0xff]  }
 0x19f   :  { %3292 = vmatprep.subr.bf16.mxu1 %v3815_v50  ;;  %v1722_v50 = vrot.slane %v5028_v40, %v1677_v38  ;;  %v3863_v38 = vld [vmem:[#allocation4 + $0x178] sm:$0xff]  }
 0x1a0   :  { %1662 = vmatmul.mubr.bf16.vlgmr.msra.gmra.mrb[8].mxu1 %v4667_v12 }
 0x1a1   :  { %1551 = vmatpush1.bf16.msra.mxu0 %v3789_v51  ;;  %3293 = vmatpush3.bf16.msra.mxu1 %v3817_v52  ;;  %v1730_v51 = vrot.slane %v5028_v40, %v1685_v39  ;;  %v3864_v39 = vld [vmem:[#allocation4 + $0x138] sm:$0xff]  }
 0x1a2   :  { %1552 = vmatprep.subr.bf16.mxu0 %v3795_v53  ;;  %3294 = vmatprep.subr.bf16.mxu1 %v3819_v55  ;;  %v1764_v53 = vld [vmem:[%s5228_s7] sm:$0xff] }
 0x1a5   :  { %1553 = vmatpush1.bf16.msra.mxu0 %v3793_v56  ;;  %3295 = vmatpush3.bf16.msra.mxu1 %v3821_v57  ;;  %v1765_v56 = vld [vmem:[%s5228_s7 + $0x8] sm:$0xff] }
 0x1a6   :  { %1554 = vmatprep.subr.bf16.mxu0 %v3799_v54  ;;  %3296 = vmatprep.subr.bf16.mxu1 %v3823_v59 }
 0x1a9   :  { %1555 = vmatpush1.bf16.msra.mxu0 %v3797_v17  ;;  %3297 = vmatpush3.bf16.msra.mxu1 %v3825_v60 }
 0x1aa   :  { %1556 = vmatprep.subr.bf16.mxu0 %v3802_v61  ;;  %3298 = vmatprep.subr.bf16.mxu1 %v3827_v62 }
 0x1ad   :  { %1557 = vmatpush1.bf16.msra.mxu0 %v3800_v63  ;;  %3299 = vmatpush3.bf16.msra.mxu1 %v3829_v0 }
 0x1ae   :  { %1558 = vmatprep.subr.bf16.mxu0 %v3805_v58  ;;  %3300 = vmatprep.subr.bf16.mxu1 %v3831_v1 }
 0x1b1   :  { %1559 = vmatpush1.bf16.msra.mxu0 %v3803_v2  ;;  %3301 = vmatpush3.bf16.msra.mxu1 %v3833_v3  ;;  %v1771_v3 = vcombine.high %v1764_v53, %v1764_v53 }
 0x1b2   :  { %1560 = vmatprep.subr.bf16.mxu0 %v3808_v4  ;;  %3302 = vmatprep.subr.bf16.mxu1 %v3835_v5  ;;  %v1772_v4 = vcombine.high %v1765_v56, %v1765_v56 }
 0x1b5   :  { %1561 = vmatpush1.bf16.msra.mxu0 %v3806_v6  ;;  %3303 = vmatpush3.bf16.msra.mxu1 %v3837_v7 }
 0x1b6   :  { %1562 = vmatprep.subr.bf16.mxu0 %v3811_v8  ;;  %3304 = vmatprep.subr.bf16.mxu1 %v3839_v9 }
 0x1b9   :  { %1563 = vmatpush1.bf16.msra.mxu0 %v3809_v10  ;;  %3305 = vmatpush3.bf16.msra.mxu1 %v3841_v11 }
 0x1ba   :  { %1564 = vmatprep.subr.bf16.mxu0 %v3814_v13  ;;  %3306 = vmatprep.subr.bf16.mxu1 %v3843_v14 }
 0x1bd   :  { %1565 = vmatpush1.bf16.msra.mxu0 %v3812_v15  ;;  %3307 = vmatpush3.bf16.msra.mxu1 %v3845_v16 }
 0x1be   :  { %3314 = vmatprep.subr.bf16.mxu0 %v3816_v18  ;;  %3336 = vmatprep.subr.bf16.mxu1 %v3849_v33  ;;  %v3850_v18 = vld [vmem:[#allocation4 + $0x100] sm:$0xff]  }
 0x1c0   :  { %1581 = vmatmul.mubr.bf16.vlgmr.msra.gmra.mrb[4].mxu0 %v4667_v12  ;;  %v3840_v12 = vld [vmem:[#allocation4 + $0xf0] sm:$0xff]  }
 0x1c1   :  { %3315 = vmatpush3.bf16.msra.mxu0 %v3818_v19 }
 0x1c2   :  { %3316 = vmatprep.subr.bf16.mxu0 %v3820_v20  ;;  %v3851_v20 = vld [vmem:[#allocation4 + $0x148] sm:$0xff]  }
 0x1c5   :  { %3317 = vmatpush3.bf16.msra.mxu0 %v3822_v21  ;;  %v3852_v21 = vld [vmem:[#allocation4 + $0x108] sm:$0xff]  }
 0x1c6   :  { %3318 = vmatprep.subr.bf16.mxu0 %v3824_v22  ;;  %v3853_v22 = vld [vmem:[#allocation4 + $0x150] sm:$0xff]  }
 0x1c9   :  { %3319 = vmatpush3.bf16.msra.mxu0 %v3826_v23  ;;  %v3854_v23 = vld [vmem:[#allocation4 + $0x110] sm:$0xff]  }
 0x1ca   :  { %3320 = vmatprep.subr.bf16.mxu0 %v3828_v24  ;;  %v3855_v24 = vld [vmem:[#allocation4 + $0x158] sm:$0xff]  }
 0x1cd   :  { %3321 = vmatpush3.bf16.msra.mxu0 %v3830_v25  ;;  %v3856_v25 = vld [vmem:[#allocation4 + $0x118] sm:$0xff]  }
 0x1ce   :  { %3322 = vmatprep.subr.bf16.mxu0 %v3832_v26  ;;  %v3857_v26 = vld [vmem:[#allocation4 + $0x160] sm:$0xff]  }
 0x1d1   :  { %3323 = vmatpush3.bf16.msra.mxu0 %v3834_v27  ;;  %v3858_v27 = vld [vmem:[#allocation4 + $0x120] sm:$0xff]  }
 0x1d2   :  { %3324 = vmatprep.subr.bf16.mxu0 %v3836_v28  ;;  %v3859_v28 = vld [vmem:[#allocation4 + $0x168] sm:$0xff]  }
 0x1d5   :  { %3325 = vmatpush3.bf16.msra.mxu0 %v3838_v29  ;;  %v3860_v29 = vld [vmem:[#allocation4 + $0x128] sm:$0xff]  }
 0x1d6   :  { %3326 = vmatprep.subr.bf16.mxu0 %v3840_v12  ;;  %v3861_v12 = vld [vmem:[#allocation4 + $0x170] sm:$0xff]  }
 0x1d9   :  { %3327 = vmatpush3.bf16.msra.mxu0 %v3842_v30 }
 0x1da   :  { %3328 = vmatprep.subr.bf16.mxu0 %v3844_v31 }
 0x1dd   :  { %3329 = vmatpush3.bf16.msra.mxu0 %v3846_v32 }
 0x1de   :  { %3445 = vmatprep.subr.mxu0 %v4180_v34 }
 0x22f   :  { %v1418_v48 = vpop.f32.mrb[0].mxu0  ;;  %v1500_v49 = vpop.f32.mrb[0].mxu1 }
 0x230   :  { %v1706_v52 = vmul.f32 %v1674_v41, %v1418_v48  ;;  %v1708_v55 = vmul.f32 %v1682_v42, %v1500_v49  ;;  %v1420_v57 = vpop.f32.mrb[1].mxu0  ;;  %v1502_v54 = vpop.f32.mrb[1].mxu1  ;;  %v1693_v48 = vsub.s32 5, %v4572_v43  ;;  %v1697_v49 = vsub.s32 6, %v4572_v43 }
 0x231   :  { %v1707_v59 = vmul.f32 %v1678_v44, %v1420_v57  ;;  %v1709_v17 = vmul.f32 %v1686_v45, %v1502_v54  ;;  %v1422_v60 = vpop.f32.mrb[2].mxu0  ;;  %v1504_v61 = vpop.f32.mrb[2].mxu1  ;;  %v1766_v54 = vld [vmem:[%s5228_s7 + $0x10] sm:$0xff] }
 0x232   :  { %v1750_v62 = vadd.f32 %v1718_v46, %v1706_v52  ;;  %v1752_v63 = vadd.f32 %v1726_v47, %v1708_v55  ;;  %v1423_v0 = vpop.f32.mrb[3].mxu0  ;;  %v1505_v58 = vpop.f32.mrb[3].mxu1  ;;  %v1689_v47 = vsub.s32 4, %v4572_v43  ;;  %v1698_v52 = vrot.slane %v5024_v37, %v1697_v49 }
 0x233   :  { %v1751_v1 = vadd.f32 %v1722_v50, %v1707_v59  ;;  %v1753_v2 = vadd.f32 %v1730_v51, %v1709_v17  ;;  %v1694_v51 = vrot.slane %v5024_v37, %v1693_v48  ;;  %v1742_v61 = vrot.slane %v5028_v40, %v1697_v49 }
 0x234   :  { %v1757_v5 = vmax.f32 %v1750_v62, 0.0  ;;  %v1759_v6 = vmax.f32 %v1752_v63, 0.0  ;;  %v1690_v50 = vrot.slane %v5024_v37, %v1689_v47  ;;  %v1773_v37 = vcombine.high %v1766_v54, %v1766_v54 }
 0x235   :  { %v1758_v7 = vmax.f32 %v1751_v1, 0.0  ;;  %v1760_v8 = vmax.f32 %v1753_v2, 0.0 }
 0x236   :  { %v1777_v9 = vmul.f32 %v1764_v53, %v1757_v5  ;;  %v1779_v10 = vmul.f32 %v1765_v56, %v1759_v6  ;;  %v1734_v53 = vrot.slane %v5028_v40, %v1689_v47  ;;  %v1738_v56 = vrot.slane %v5028_v40, %v1693_v48  ;;  %v3866_v6 = vld [vmem:[#allocation4 + $0x180] sm:$0xff]   ;;  %v3867_v40 = vld [vmem:[#allocation4 + $0x188] sm:$0xff]  }
 0x237   :  { %v1778_v11 = vmul.f32 %v1771_v3, %v1758_v7  ;;  %v1780_v13 = vmul.f32 %v1772_v4, %v1760_v8 }
 0x238   :  { %v1786_v14 = vpack.c.bf16 %v1779_v10, %v1779_v10  ;;  %v1784_v19 = vpack.c.bf16 %v1777_v9, %v1777_v9  ;;  %v1767_v9 = vld [vmem:[%s5228_s7 + $0x18] sm:$0xf] }
 0x239   :  { %v1785_v15 = vpack.c.bf16 %v1778_v11, %v1778_v11  ;;  %v1787_v16 = vpack.c.bf16 %v1780_v13, %v1780_v13  ;;  %v2372_v11 = vld [vmem:[%s5196_s9] sm:$0xff]  ;;  %v2373_v13 = vld [vmem:[%s5196_s9 + $0x8] sm:$0xff] }
 0x23b   :  { %2227 = vmatprep.mubr.bf16.mxu1 %v1785_v15  ;;  %2267 = vmatprep.mubr.bf16.mxu0 %v1787_v16  ;;  %v4182_v16 = vmov 0.0|0.0  }
 0x23c   :  { %2228 = vmatmul.mubr.bf16.vlgmr.msra.gmra.mrb[12].mxu1 %v1784_v19  ;;  %2268 = vmatmul.mubr.bf16.vlgmr.msra.gmra.mrb[8].mxu0 %v1786_v14  ;;  %v3502_v14 = vpack.c.bf16 %v2373_v13, %v2372_v11  ;;  %v2375_v19 = vld [vmem:[%s5196_s9 + $0x18] sm:$0xff] }
 0x23d   :  { %3337 = vmatpush3.bf16.msra.mxu1 %v3850_v18  ;;  %3447 = vmatprep.mubr.msk.f32.mxu0 %vm4181_vm1, %v4180_v34  ;;  %v2374_v18 = vld [vmem:[%s5196_s9 + $0x10] sm:$0xff] }
 0x23e   :  { %3338 = vmatprep.subr.bf16.mxu1 %v3851_v20  ;;  %v3505_v20 = vpack.c.bf16 %v2375_v19, %v2374_v18  ;;  %v2708_v18 = vld [vmem:[#allocation13] sm:$0xff]  ;;  %v2709_v19 = vld [vmem:[#allocation13 + $0x8] sm:$0xff] }
 0x241   :  { %3339 = vmatpush3.bf16.msra.mxu1 %v3852_v21  ;;  %v2376_v21 = vld [vmem:[%s5196_s9 + $0x20] sm:$0xff] }
 0x242   :  { %3340 = vmatprep.subr.bf16.mxu1 %v3853_v22  ;;  %v2377_v22 = vld [vmem:[%s5196_s9 + $0x28] sm:$0xff] }
 0x245   :  { %3341 = vmatpush3.bf16.msra.mxu1 %v3854_v23  ;;  %v3508_v23 = vpack.c.bf16 %v2377_v22, %v2376_v21  ;;  %v3875_v21 = vld [vmem:[%s5206_s19 + $0x8] sm:$0xff]  }
 0x246   :  { %3342 = vmatprep.subr.bf16.mxu1 %v3855_v24  ;;  %v2378_v24 = vld [vmem:[%s5196_s9 + $0x30] sm:$0xff]  ;;  %v3249_v22 = vld [vmem:[#allocation12] ss:$0 sm:$0xff] }
 0x249   :  { %3343 = vmatpush3.bf16.msra.mxu1 %v3856_v25  ;;  %v2379_v25 = vld [vmem:[%s5196_s9 + $0x38] sm:$0xff] }
 0x24a   :  { %3344 = vmatprep.subr.bf16.mxu1 %v3857_v26  ;;  %v3511_v26 = vpack.c.bf16 %v2379_v25, %v2378_v24 }
 0x24d   :  { %3345 = vmatpush3.bf16.msra.mxu1 %v3858_v27  ;;  %v2380_v27 = vld [vmem:[%s5196_s9 + $0x40] sm:$0xff] }
 0x24e   :  { %3346 = vmatprep.subr.bf16.mxu1 %v3859_v28  ;;  %v2381_v28 = vld [vmem:[%s5196_s9 + $0x48] sm:$0xff] }
 0x24f   :  { %v3286_v30 = vpop.f32.mrb[4].mxu1 }
 0x250   :  { %v3287_v31 = vpop.f32.mrb[5].mxu1 }
 0x251   :  { %v3288_v32 = vadd.f32 %v3287_v31, %v3286_v30  ;;  %v3289_v33 = vpop.f32.mrb[6].mxu1  ;;  %3347 = vmatpush3.bf16.msra.mxu1 %v3860_v29  ;;  %v3514_v29 = vpack.c.bf16 %v2381_v28, %v2380_v27  ;;  %v2383_v30 = vld [vmem:[%s5196_s9 + $0x58] sm:$0xff] }
 0x252   :  { %v3290_v36 = vpop.f32.mrb[7].mxu1  ;;  %3348 = vmatprep.subr.bf16.mxu1 %v3861_v12  ;;  %v2382_v12 = vld [vmem:[%s5196_s9 + $0x50] sm:$0xff]  ;;  %v2385_v33 = vld [vmem:[%s5196_s9 + $0x68] sm:$0xff] }
 0x253   :  { %v3517_v31 = vpack.c.bf16 %v2383_v30, %v2382_v12  ;;  %v2386_v36 = vld [vmem:[%s5196_s9 + $0x70] sm:$0xff]  ;;  %v3869_v30 = vld [vmem:[#allocation15 + $0x8] sm:$0xff]  }
 0x255   :  { %3349 = vmatpush3.bf16.msra.mxu1 %v3862_v35 }
 0x256   :  { %3350 = vmatprep.subr.bf16.mxu1 %v3863_v38  ;;  %v2387_v38 = vld [vmem:[%s5196_s9 + $0x78] sm:$0xff] }
 0x259   :  { %3351 = vmatpush3.bf16.msra.mxu1 %v3864_v39  ;;  %v3523_v39 = vpack.c.bf16 %v2387_v38, %v2386_v36  ;;  %v3876_v36 = vld [vmem:[#allocation15 + $0x30] sm:$0xff]  }
 0x25a   :  { %3402 = vmatprep.subr.bf16.mxu1 %v4180_v34  ;;  %v3877_v38 = vld [vmem:[%s5206_s19 + $0x10] sm:$0xff]  }
 0x273   :  { %v1663_v41 = vpop.f32.mrb[8].mxu1 }
 0x274   :  { %v1664_v42 = vadd.f32 %v3288_v32, %v1663_v41  ;;  %v1665_v44 = vpop.f32.mrb[9].mxu1  ;;  %v2384_v32 = vld [vmem:[%s5196_s9 + $0x60] sm:$0xff] }
 0x275   :  { %v1666_v45 = vpop.f32.mrb[10].mxu1  ;;  %v3520_v35 = vpack.c.bf16 %v2385_v33, %v2384_v32  ;;  %v3871_v32 = vld [vmem:[#allocation15 + $0x18] sm:$0xff]   ;;  %v3872_v33 = vld [vmem:[#allocation15 + $0x20] sm:$0xff]  }
 0x276   :  { %v1667_v46 = vpop.f32.mrb[11].mxu1  ;;  %v1712_v43 = vmul.f32 %v1698_v52, %v1664_v42 }
 0x278   :  { %v1756_v2 = vadd.f32 %v1742_v61, %v1712_v43 }
 0x27a   :  { %v1763_v7 = vmax.f32 %v1756_v2, 0.0  ;;  %v2537_v2 = vld [vmem:[%s5197_s10] sm:$0xff] }
 0x27c   :  { %v1783_v10 = vmul.f32 %v1767_v9, %v1763_v7 }
 0x27e   :  { %v1790_v15 = vpack.c.bf16 %v1783_v10, %v1783_v10  ;;  %v3247_v10 = vld [vmem:[#allocation9] ss:$0 sm:$0xff] }
 0x293   :  { %v1582_v55 = vpop.f32.mrb[4].mxu0 }
 0x294   :  { %v1710_v57 = vmul.f32 %v1690_v50, %v1582_v55  ;;  %v1584_v59 = vpop.f32.mrb[5].mxu0 }
 0x295   :  { %v1711_v17 = vmul.f32 %v1694_v51, %v1584_v59  ;;  %v1586_v60 = vpop.f32.mrb[6].mxu0 }
 0x296   :  { %v1754_v62 = vadd.f32 %v1734_v53, %v1710_v57  ;;  %v1587_v63 = vpop.f32.mrb[7].mxu0  ;;  %v3243_v60 = vld [vmem:[%s5229_s17] ss:$0 sm:$0xff] }
 0x297   :  { %v1755_v0 = vadd.f32 %v1738_v56, %v1711_v17 }
 0x298   :  { %v1761_v58 = vmax.f32 %v1754_v62, 0.0  ;;  %v3244_v62 = vld [vmem:[#allocation6] ss:$0 sm:$0xff] }
 0x299   :  { %v1762_v1 = vmax.f32 %v1755_v0, 0.0 }
 0x29a   :  { %v1781_v3 = vmul.f32 %v1766_v54, %v1761_v58 }
 0x29b   :  { %v1782_v4 = vmul.f32 %v1773_v37, %v1762_v1 }
 0x29c   :  { %v1788_v8 = vpack.c.bf16 %v1781_v3, %v1781_v3  ;;  %v2538_v3 = vld [vmem:[%s5197_s10 + $0x8] sm:$0xff] }
 0x29d   :  { %v1789_v5 = vpack.c.bf16 %v1782_v4, %v1782_v4  ;;  %v2458_v4 = vld [vmem:[#allocation7] sm:$0xf] }
 0x29f   :  { %2307 = vmatprep.mubr.bf16.mxu1 %v1789_v5  ;;  %v3526_v5 = vpack.c.bf16 %v2538_v3, %v2537_v2 }
 0x2a0   :  { %2308 = vmatmul.mubr.bf16.vlgmr.msra.gmra.mrb[16].mxu1 %v1788_v8 }
 0x2a1   :  { %3403 = vmatpush3.bf16.msra.mxu1 %v3866_v6  ;;  %3406 = vmatprep.mubr.msk.bf16.mxu1 %vm4181_vm1, %v4180_v34 }
 0x2a2   :  { %3404 = vmatprep.subr.bf16.mxu1 %v4180_v34 }
 0x2a5   :  { %3405 = vmatpush3.bf16.msra.mxu1 %v3867_v40  ;;  %v2620_v40 = vld [vmem:[#allocation10] sm:$0xff] }
 0x2a6   :  { %3501 = vmatprep.subr.bf16.mxu1 %v4182_v16 }
 0x2a8   :  { %3407 = vmatmul.mubr.msk.bf16.vlgmr.msra.gmra.mrb[20].mxu1 %vm2191_vm2, %v1790_v15 }
 0x2a9   :  { %3503 = vmatpush3.bf16.msra.mxu1 %v3502_v14  ;;  %3442 = vmatprep.mubr.msk.f32.mxu1 %vm4181_vm1, %v4180_v34 }
 0x2aa   :  { %3504 = vmatprep.subr.bf16.mxu1 %v4182_v16 }
 0x2ad   :  { %3506 = vmatpush3.bf16.msra.mxu1 %v3505_v20  ;;  %v3529_v20 = vpack.c.bf16 %v2709_v19, %v2708_v18 }
 0x2ae   :  { %3507 = vmatprep.subr.bf16.mxu1 %v4182_v16 }
 0x2b1   :  { %3509 = vmatpush3.bf16.msra.mxu1 %v3508_v23 }
 0x2b2   :  { %3510 = vmatprep.subr.bf16.mxu1 %v4182_v16 }
 0x2b5   :  { %3512 = vmatpush3.bf16.msra.mxu1 %v3511_v26 }
 0x2b6   :  { %3513 = vmatprep.subr.bf16.mxu1 %v4182_v16 }
 0x2b9   :  { %3515 = vmatpush3.bf16.msra.mxu1 %v3514_v29  ;;  %v3868_v29 = vld [vmem:[#allocation15] sm:$0xff]  }
 0x2ba   :  { %3516 = vmatprep.subr.bf16.mxu1 %v4182_v16 }
 0x2bd   :  { %3518 = vmatpush3.bf16.msra.mxu1 %v3517_v31  ;;  %v3870_v31 = vld [vmem:[#allocation15 + $0x10] sm:$0xff]  }
 0x2be   :  { %3519 = vmatprep.subr.bf16.mxu1 %v4182_v16 }
 0x2c1   :  { %3521 = vmatpush3.bf16.msra.mxu1 %v3520_v35  ;;  %v3874_v35 = vld [vmem:[#allocation15 + $0x28] sm:$0xff]  }
 0x2c2   :  { %3522 = vmatprep.subr.bf16.mxu1 %v4182_v16 }
 0x2c5   :  { %3524 = vmatpush3.bf16.msra.mxu1 %v3523_v39  ;;  %v3879_v39 = vld [vmem:[%s5206_s19 + $0x18] sm:$0xff]  }
 0x2c6   :  { %3489 = vmatprep.subr.bf16.mxu1 %v4180_v34 }
 0x30f   :  { %v3308_v41 = vpop.f32.mrb[12].mxu1  ;;  %v3330_v42 = vpop.f32.mrb[8].mxu0 }
 0x310   :  { %v3309_v44 = vpop.f32.mrb[13].mxu1  ;;  %v3331_v45 = vpop.f32.mrb[9].mxu0 }
 0x311   :  { %v3310_v46 = vadd.f32 %v3309_v44, %v3308_v41  ;;  %v3332_v47 = vadd.f32 %v3331_v45, %v3330_v42  ;;  %v3311_v48 = vpop.f32.mrb[14].mxu1  ;;  %v3333_v49 = vpop.f32.mrb[10].mxu0  ;;  %v3878_v41 = vld [vmem:[#allocation15 + $0x38] sm:$0xff]   ;;  %v2905_v42 = vld [vmem:[%s5205_s18] sm:$0x3] }
 0x312   :  { %v3312_v50 = vpop.f32.mrb[15].mxu1  ;;  %v3334_v51 = vpop.f32.mrb[11].mxu0 }
 0x313   :  { %v2270_v52 = vadd.f32 %v3332_v47, %v3310_v46  ;;  %v3261_v51 = vld [vmem:[%s5230_s16] ss:$0 sm:$0xff] }
 0x373   :  { %v3352_v53 = vpop.f32.mrb[16].mxu1 }
 0x374   :  { %v3353_v55 = vpop.f32.mrb[17].mxu1 }
 0x375   :  { %v3354_v56 = vadd.f32 %v3353_v55, %v3352_v53  ;;  %v3355_v57 = vpop.f32.mrb[18].mxu1  ;;  %v3262_v55 = vld [vmem:[#allocation16] ss:$0 sm:$0xff] }
 0x376   :  { %v3356_v54 = vpop.f32.mrb[19].mxu1 }
 0x377   :  { %v2310_v59 = vadd.f32 %v3354_v56, %v2270_v52  ;;  %v3268_v52 = vld [vmem:[#allocation18] ss:$0 sm:$0xff] }
 0x37b   :  { %v2349_v17 = vpop.f32.mrb[20].mxu1 }
 0x37c   :  { %v2350_v43 = vadd.f32 %v2349_v17, %v2310_v59  ;;  %v3408_v61 = vpop.f32.mrb[21].mxu1 }
 0x37d   :  { %v2352_v63 = vpop.f32.mrb[22].mxu1 }
 0x37e   :  { %v2362_v0 = vmul.f32 %v3243_v60, %v2350_v43  ;;  %v3409_v37 = vpop.f32.mrb[23].mxu1  ;;  %v3269_v43 = vld [vmem:[#allocation19] ss:$0 sm:$0xff] }
 0x380   :  { %v5127_v58 = vadd.f32 %v3244_v62, %v2362_v0 }
 0x382   :  { %v2371_v1 = vmax.f32 %v5127_v58, 0.0 }
 0x384   :  { %3443 = vmatmul.mubr.f32.vlgmr.msra.gmra.mrb[24].mxu1 %v2371_v1 }
 0x385   :  { %3497 = vmatprep.mubr.msk.bf16.mxu1 %vm4181_vm1, %v4180_v34 }
 0x457   :  { %v2454_v6 = vpop.f32.mrb[24].mxu1 }
 0x458   :  { %v3444_v7 = vpop.f32.mrb[25].mxu1  ;;  %3446 = vmatpush3.msk.msra.mxu0 %vm2463_vm3, %v2454_v6 }
 0x459   :  { %3448 = vmatmul.mubr.msk.f32.vlgmr.msra.gmra.mrb[12].mxu0 %vm2459_vm4, %v2458_v4  ;;  %3525 = vmatprep.subr.bf16.mxu0 %v4182_v16 }
 0x45a   :  { %3527 = vmatpush3.bf16.msra.mxu0 %v3526_v5  ;;  %3454 = vmatprep.mubr.msk.f32.mxu0 %vm4181_vm1, %v4180_v34 }
 0x45b   :  { %3457 = vmatprep.subr.mxu0 %v4180_v34 }
 0x52c   :  { %v2533_v8 = vpop.f32.mrb[12].mxu0 }
 0x52d   :  { %3455 = vmatmul.mubr.msk.f32.vlgmr.msra.gmra.mrb[14].mxu0 %vm1339_vm0, %v2533_v8  ;;  %v3449_v9 = vpop.f32.mrb[13].mxu0 }
 0x52e   :  { %3459 = vmatprep.mubr.msk.f32.mxu0 %vm4181_vm1, %v4180_v34  ;;  %3458 = vmatpush3.msra.mxu0 %v2620_v40 }
 0x52f   :  { %3528 = vmatprep.subr.bf16.mxu0 %v4182_v16  ;;  %v3873_v16 = vld [vmem:[%s5206_s19] sm:$0xff]  }
 0x530   :  { %3490 = vmatpush3.bf16.msra.mxu1 %v3873_v16 }
 0x531   :  { %3491 = vmatprep.subr.bf16.mxu1 %v4180_v34 }
 0x534   :  { %3492 = vmatpush3.bf16.msra.mxu1 %v3875_v21 }
 0x535   :  { %3493 = vmatprep.subr.bf16.mxu1 %v4180_v34 }
 0x538   :  { %3494 = vmatpush3.bf16.msra.mxu1 %v3877_v38 }
 0x539   :  { %3495 = vmatprep.subr.bf16.mxu1 %v4180_v34 }
 0x53c   :  { %3496 = vmatpush3.bf16.msra.mxu1 %v3879_v39 }
 0x53f   :  { %3498 = vmatmul.mubr.msk.bf16.vlgmr.msra.gmra.mrb[28].mxu1 %vm2938_vm6, %v2905_v42 }
 0x600   :  { %v2615_v11 = vpop.f32.mrb[14].mxu0 }
 0x601   :  { %v2616_v13 = vadd.f32 %v3247_v10, %v2615_v11  ;;  %v3456_v14 = vpop.f32.mrb[15].mxu0 }
 0x603   :  { %v2619_v15 = vmax.f32 %v2616_v13, 0.0 }
 0x605   :  { %3460 = vmatmul.mubr.msk.f32.vlgmr.msra.gmra.mrb[16].mxu0 %vm2628_vm5, %v2619_v15 }
 0x606   :  { %3466 = vmatprep.mubr.msk.f32.mxu0 %vm4181_vm1, %v4180_v34  ;;  %3530 = vmatpush3.bf16.msra.mxu0 %v3529_v20 }
 0x607   :  { %3469 = vmatprep.subr.bf16.mxu0 %v4180_v34 }
 0x6d8   :  { %v2698_v23 = vpop.f32.mrb[16].mxu0 }
 0x6d9   :  { %v2699_v24 = vadd.f32 %v3249_v22, %v2698_v23  ;;  %v3461_v25 = vpop.f32.mrb[17].mxu0 }
 0x6db   :  { %v3251_v26 = vmul.f32 -1.442695, %v2699_v24 }
 0x6dd   :  { %3880 = vpow2.f32 %v3251_v26 }
 0x6e7   :  { %v3881_v27 = vpop.eup %3880 }
 0x6e8   :  { %v2705_v28 = vadd.f32 1.0, %v3881_v27 }
 0x6ea   :  { %3882 = vrcp.f32 %v2705_v28 }
 0x6f4   :  { %v3883_v12 = vpop.eup %3882 }
 0x6f5   :  { %3467 = vmatmul.mubr.msk.f32.vlgmr.msra.gmra.mrb[18].mxu0 %vm1339_vm0, %v3883_v12 }
 0x6f6   :  { %3470 = vmatpush3.bf16.msra.mxu0 %v3868_v29  ;;  %3485 = vmatprep.mubr.msk.bf16.mxu0 %vm4181_vm1, %v4180_v34 }
 0x6f7   :  { %3471 = vmatprep.subr.bf16.mxu0 %v4180_v34 }
 0x6fa   :  { %3472 = vmatpush3.bf16.msra.mxu0 %v3869_v30 }
 0x6fb   :  { %3473 = vmatprep.subr.bf16.mxu0 %v4180_v34 }
 0x6fe   :  { %3474 = vmatpush3.bf16.msra.mxu0 %v3870_v31 }
 0x6ff   :  { %3475 = vmatprep.subr.bf16.mxu0 %v4180_v34 }
 0x702   :  { %3476 = vmatpush3.bf16.msra.mxu0 %v3871_v32 }
 0x703   :  { %3477 = vmatprep.subr.bf16.mxu0 %v4180_v34 }
 0x706   :  { %3478 = vmatpush3.bf16.msra.mxu0 %v3872_v33 }
 0x707   :  { %3479 = vmatprep.subr.bf16.mxu0 %v4180_v34 }
 0x70a   :  { %3480 = vmatpush3.bf16.msra.mxu0 %v3874_v35 }
 0x70b   :  { %3481 = vmatprep.subr.bf16.mxu0 %v4180_v34 }
 0x70e   :  { %3482 = vmatpush3.bf16.msra.mxu0 %v3876_v36 }
 0x70f   :  { %3483 = vmatprep.subr.bf16.mxu0 %v4180_v34  ;;  %v2976_v34 = vpop.f32.mrb[28].mxu1 }
 0x710   :  { %v3499_v48 = vpop.f32.mrb[29].mxu1  ;;  %v2989_v54 = vmul.f32 %v3268_v52, %v2976_v34 }
 0x711   :  { %v2979_v49 = vpop.f32.mrb[30].mxu1 }
 0x712   :  { %3484 = vmatpush3.bf16.msra.mxu0 %v3878_v41  ;;  %v3500_v50 = vpop.f32.mrb[31].mxu1 }
 0x7c8   :  { %v2779_v44 = vpop.f32.mrb[18].mxu0 }
 0x7c9   :  { %v2783_v45 = vmul.f32 %v2779_v44, %v2371_v1  ;;  %v3468_v46 = vpop.f32.mrb[19].mxu0 }
 0x7cb   :  { %v2784_v47 = vpack.c.bf16 %v2783_v45, %v2783_v45 }
 0x7cd   :  { %3486 = vmatmul.mubr.bf16.vlgmr.msra.gmra.mrb[20].mxu0 %v2784_v47 }
 0x8a0   :  { %v2883_v53 = vpop.f32.mrb[20].mxu0 }
 0x8a1   :  { %v2896_v56 = vmul.f32 %v3261_v51, %v2883_v53  ;;  %v3487_v57 = vpop.f32.mrb[21].mxu0 }
 0x8a2   :  { %v2886_v59 = vpop.f32.mrb[22].mxu0 }
 0x8a3   :  { %v2904_v17 = vadd.f32 %v3262_v55, %v2896_v56  ;;  %v3488_v60 = vpop.f32.mrb[23].mxu0 }
 0x8a5   :  { %v2990_v61 = vadd.f32 %v2989_v54, %v2904_v17 }
 0x8a7   :  { %v2998_v62 = vadd.f32 %v3269_v43, %v2990_v61 }
 0x8a9   :  { %v2999_v63 = vmax.f32 %v2998_v62, 0.0 }
 0x8ab   :  { %v3000_v0 = vpack.c.bf16 %v2999_v63, %v2999_v63 }
 0x8ad   :  { %3001 = vst [vmem:[%s5231_s29] sm:$0x3] %v3000_v0 }
 0x8ae   :  { %3006 = vsyncpa [#allocation3], 1 }
 0x8af   :  { %3007 = vsyncpa [#allocation5], 1 }
 0x8b0   :  { %3008 = vsyncpa [#allocation8], 1 }
 0x8b1   :  { %3009 = vsyncpa [#allocation11], 1 }
 0x8b2   :  { %3010 = vsyncpa [#allocation14], 1 }
 0x8b3   :  { %3011 = vsyncpa [#allocation17], 1 }
 0x8b4   :  { %3012 = vsyncpa [#allocation20], 1 }

</bundles_post_ra>
